<compile_context>
chip_gen: v6e
topology: v6e:2x2x1
jax: 0.10.0
libtpu: 0.0.40
codegen_flags: <defaults>
</compile_context>

<pallas_src>
import math

import jax
import jax.numpy as jnp
from jax import lax
from jax.experimental import pallas as pl
from jax.experimental.pallas import tpu as pltpu

# ---- Config (mirrors the PyTorch Config class) ------------------------------
BACKBONE_FEATURE_DIM = 1536
EMBEDDING_DIM = 1280
NUM_CLASSES = 35
NUM_CLASSES_PAD = 128          # lane-dense output / MXU-friendly N
SPHEREFACE_SCALE = 32.0
CLAMP_EPS = 1e-7
NORM_EPS = 1e-12               # F.normalize default eps


def _round_up(x, m):
    return ((x + m - 1) // m) * m


def _disease_classifier_kernel(feat_ref, we_ref, be_ref, wsn_ref, out_ref):
    """Fused embedding Linear + SphereFace(labels=None) for one batch tile."""
    # embedding = feat @ We + be   (bf16 x bf16 -> f32 accumulate on the MXU)
    emb = jnp.dot(feat_ref[...], we_ref[...],
                  preferred_element_type=jnp.float32) + be_ref[...]   # [TB, E] f32

    # nn.Dropout(0.2) in eval mode is the identity -> nothing to do.

    # F.normalize(emb, dim=1) folded into a post-matmul row scale:
    #   cos = (emb @ W_norm^T) * rsqrt(max(||emb||^2, eps^2))
    # SphereFace scale (32.0) rides on the same [TB, 1] vector for free.
    x_sq = jnp.sum(emb * emb, axis=-1, keepdims=True)                 # [TB, 1] (f32)
    inv_norm_scaled = SPHEREFACE_SCALE * lax.rsqrt(
        jnp.maximum(x_sq, NORM_EPS * NORM_EPS))                       # EUP rsqrt

    # W_norm was pre-normalized, pre-transposed to [E, C_pad] and cast to bf16 in the
    # wrapper; feed emb as bf16 too so the MXU runs at full (non-emulated) rate.
    s = jnp.dot(emb.astype(jnp.bfloat16), wsn_ref[...],
                preferred_element_type=jnp.float32)                   # [TB, C_pad] f32

    # labels is None -> clip(cos, -1+eps, 1-eps) * scale  ==  clip(cos*scale, ±scale*(1-eps))
    lo = -SPHEREFACE_SCALE * (1.0 - CLAMP_EPS)
    hi = SPHEREFACE_SCALE * (1.0 - CLAMP_EPS)
    out_ref[...] = jnp.clip(s * inv_norm_scaled, lo, hi).astype(out_ref.dtype)


def disease_classifier(features, w_embed, b_embed, w_sphere, *, block_b=512):
    """features: [B, 1536].  Returns logits [B, NUM_CLASSES] f32."""
    B = features.shape[0]

    # ---- static weight prep (runs in XLA, outside the kernel) ----
    # SphereFace: W_norm = F.normalize(W, dim=1); pre-transpose to [E, C], pad C -> 128,
    # cast to bf16 so the second matmul is a native bf16 MXU op.
    w = w_sphere.astype(jnp.float32)
    w_norm = w / jnp.maximum(
        jnp.sqrt(jnp.sum(w * w, axis=-1, keepdims=True)), NORM_EPS)
    wsn = jnp.zeros((EMBEDDING_DIM, NUM_CLASSES_PAD), jnp.float32)
    wsn = wsn.at[:, :NUM_CLASSES].set(w_norm.T)
    wsn = wsn.astype(jnp.bfloat16)

    we_bf16 = w_embed.astype(jnp.bfloat16)              # halve dominant weight DMA
    be_2d = b_embed.reshape(1, EMBEDDING_DIM).astype(jnp.float32)

    # ---- batch tiling: sublane-aligned, "parallel" grid axis ----
    b_al = _round_up(max(B, 8), 8)
    if b_al > 256:
        # ensure >= 2 grid steps so both v7x TensorCores get work
        tb = min(block_b, _round_up(pl.cdiv(b_al, 2), 8))
    else:
        # small batch: weight-DMA bound, keep a single grid step
        tb = min(block_b, b_al)
    b_pad = _round_up(b_al, tb)

    feat = features.astype(jnp.bfloat16)
    if b_pad != B:
        feat = jnp.pad(feat, ((0, b_pad - B), (0, 0)))

    flops = (2 * b_pad * BACKBONE_FEATURE_DIM * EMBEDDING_DIM
             + 2 * b_pad * EMBEDDING_DIM * NUM_CLASSES_PAD)
    bytes_accessed = (we_bf16.size * 2 + wsn.size * 2 + be_2d.size * 4
                      + b_pad * BACKBONE_FEATURE_DIM * 2
                      + b_pad * NUM_CLASSES_PAD * 4)

    out = pl.pallas_call(
        _disease_classifier_kernel,
        out_shape=jax.ShapeDtypeStruct((b_pad, NUM_CLASSES_PAD), jnp.float32),
        grid=(b_pad // tb,),
        in_specs=[
            pl.BlockSpec((tb, BACKBONE_FEATURE_DIM), lambda i: (i, 0)),
            # constant block indices -> weights stay resident across batch steps;
            # single-buffered (Buffered(1)) since they are DMA'd exactly once.
            pl.BlockSpec((BACKBONE_FEATURE_DIM, EMBEDDING_DIM), lambda i: (0, 0),
                         pipeline_mode=pl.Buffered(1)),
            pl.BlockSpec((1, EMBEDDING_DIM), lambda i: (0, 0),
                         pipeline_mode=pl.Buffered(1)),
            pl.BlockSpec((EMBEDDING_DIM, NUM_CLASSES_PAD), lambda i: (0, 0),
                         pipeline_mode=pl.Buffered(1)),
        ],
        out_specs=pl.BlockSpec((tb, NUM_CLASSES_PAD), lambda i: (i, 0)),
        compiler_params=pltpu.CompilerParams(
            dimension_semantics=("parallel",),
            vmem_limit_bytes=32 << 20,
        ),
        cost_estimate=pl.CostEstimate(
            flops=flops, transcendentals=b_pad, bytes_accessed=bytes_accessed),
    )(feat, we_bf16, be_2d, wsn)

    return out[:B, :NUM_CLASSES]


def disease_classifier_reference(features, w_embed, b_embed, w_sphere):
    """Pure-JAX reference with the same bf16 input/weight casts (PyTorch semantics)."""
    feat = features.astype(jnp.bfloat16).astype(jnp.float32)
    we = w_embed.astype(jnp.bfloat16).astype(jnp.float32)
    emb = feat @ we + b_embed
    x_norm = emb / jnp.maximum(
        jnp.sqrt(jnp.sum(emb * emb, axis=-1, keepdims=True)), NORM_EPS)
    w = w_sphere.astype(jnp.float32)
    w_norm = w / jnp.maximum(
        jnp.sqrt(jnp.sum(w * w, axis=-1, keepdims=True)), NORM_EPS)
    cos = jnp.clip(x_norm @ w_norm.T, -1.0 + CLAMP_EPS, 1.0 - CLAMP_EPS)
    return cos * SPHEREFACE_SCALE


def init_params(key):
    """Deterministic param init mirroring PyTorch defaults (kaiming_uniform, a=sqrt(5))."""
    k_we, k_be, k_ws = jax.random.split(key, 3)

    # nn.Linear(1536, 1280): weight/bias U(-1/sqrt(fan_in), 1/sqrt(fan_in)).
    bound_e = 1.0 / math.sqrt(BACKBONE_FEATURE_DIM)
    # stored transposed as [in, out] so the kernel does feat @ We directly
    w_embed = jax.random.uniform(
        k_we, (BACKBONE_FEATURE_DIM, EMBEDDING_DIM), jnp.float32, -bound_e, bound_e)
    b_embed = jax.random.uniform(
        k_be, (EMBEDDING_DIM,), jnp.float32, -bound_e, bound_e)

    # SphereFace W: [out_features, in_features], kaiming_uniform(a=sqrt(5))
    bound_s = 1.0 / math.sqrt(EMBEDDING_DIM)
    w_sphere = jax.random.uniform(
        k_ws, (NUM_CLASSES, EMBEDDING_DIM), jnp.float32, -bound_s, bound_s)

    return w_embed, b_embed, w_sphere


if __name__ == "__main__":
    key = jax.random.PRNGKey(0)
    k_params, k_x = jax.random.split(key)

    w_embed, b_embed, w_sphere = init_params(k_params)

    # Small batch of backbone features (stand-in for efficientnet_b3 output).
    B = 2
    x = jax.random.normal(k_x, (B, BACKBONE_FEATURE_DIM), jnp.float32)

    logits = disease_classifier(x, w_embed, b_embed, w_sphere)
    logits = jax.block_until_ready(logits)

    assert logits.shape == (B, NUM_CLASSES)
    assert logits.dtype == jnp.float32
    # cos_theta is clamped to (-1, 1) then scaled by 32 -> bounded in magnitude.
    assert bool(jnp.all(jnp.abs(logits) <= SPHEREFACE_SCALE))

    # Loose check vs. pure-JAX reference (MXU bf16/f32 matmul numerics differ slightly).
    ref = disease_classifier_reference(x, w_embed, b_embed, w_sphere)
    max_err = float(jnp.max(jnp.abs(logits - ref)))
    assert max_err < 0.5, f"max abs error vs reference too large: {max_err}"

    print("KERNEL_OK")
</pallas_src>

<mosaic_0001>
module attributes {stable_mosaic.version = 11 : i64} {
  func.func @_disease_classifier_kernel(%arg0: i32, %arg1: memref<8x1536xbf16, #tpu.memory_space<vmem>>, %arg2: memref<1536x1280xbf16, #tpu.memory_space<vmem>>, %arg3: memref<1x1280xf32, #tpu.memory_space<vmem>>, %arg4: memref<1280x128xbf16, #tpu.memory_space<vmem>>, %arg5: memref<8x128xf32, #tpu.memory_space<vmem>>) attributes {dimension_semantics = [#tpu.dimension_semantics<parallel>], iteration_bounds = array<i64: 1>, scalar_prefetch = 0 : i64, scratch_operands = 0 : i64, tpu.core_type = #tpu.core_type<tc>, window_params = [{transform_indices = @transform_0, window_bounds = array<i64: 8, 1536>}, {pipeline_mode = #tpu.pipeline_mode<synchronous>, transform_indices = @transform_1, window_bounds = array<i64: 1536, 1280>}, {pipeline_mode = #tpu.pipeline_mode<synchronous>, transform_indices = @transform_2, window_bounds = array<i64: 1, 1280>}, {pipeline_mode = #tpu.pipeline_mode<synchronous>, transform_indices = @transform_3, window_bounds = array<i64: 1280, 128>}, {transform_indices = @transform_4, window_bounds = array<i64: 8, 128>}]} {
    %c0 = arith.constant 0 : index
    %c0_0 = arith.constant 0 : index
    %0 = vector.load %arg1[%c0, %c0_0] : memref<8x1536xbf16, #tpu.memory_space<vmem>>, vector<8x1536xbf16>
    %c0_1 = arith.constant 0 : index
    %c0_2 = arith.constant 0 : index
    %1 = vector.load %arg2[%c0_1, %c0_2] : memref<1536x1280xbf16, #tpu.memory_space<vmem>>, vector<1536x1280xbf16>
    %cst = arith.constant dense<0.000000e+00> : vector<8x1280xf32>
    %2 = tpu.matmul %0, %1, %cst {dimension_numbers = #tpu.dot_dimension_numbers<[1], [0], [0], [1], [0, 0, 1, 1], [], []>} : vector<8x1536xbf16>, vector<1536x1280xbf16>, vector<8x1280xf32> -> vector<8x1280xf32>
    %c0_3 = arith.constant 0 : index
    %c0_4 = arith.constant 0 : index
    %3 = vector.load %arg3[%c0_3, %c0_4] : memref<1x1280xf32, #tpu.memory_space<vmem>>, vector<1x1280xf32>
    %4 = vector.broadcast %3 : vector<1x1280xf32> to vector<8x1280xf32>
    %5 = arith.addf %2, %4 : vector<8x1280xf32>
    %6 = arith.mulf %5, %5 : vector<8x1280xf32>
    %cst_5 = arith.constant dense<0.000000e+00> : vector<8xf32>
    %7 = vector.multi_reduction <add>, %6, %cst_5 [1] : vector<8x1280xf32> to vector<8xf32>
    %8 = vector.shape_cast %7 : vector<8xf32> to vector<8x1xf32>
    %cst_6 = arith.constant 1.000000e-24 : f32
    %9 = vector.broadcast %cst_6 : f32 to vector<8x1xf32>
    %10 = arith.maximumf %8, %9 : vector<8x1xf32>
    %11 = math.rsqrt %10 : vector<8x1xf32>
    %cst_7 = arith.constant 3.200000e+01 : f32
    %12 = vector.broadcast %cst_7 : f32 to vector<8x1xf32>
    %13 = arith.mulf %12, %11 : vector<8x1xf32>
    %14 = arith.truncf %5 : vector<8x1280xf32> to vector<8x1280xbf16>
    %c0_8 = arith.constant 0 : index
    %c0_9 = arith.constant 0 : index
    %15 = vector.load %arg4[%c0_8, %c0_9] : memref<1280x128xbf16, #tpu.memory_space<vmem>>, vector<1280x128xbf16>
    %cst_10 = arith.constant dense<0.000000e+00> : vector<8x128xf32>
    %16 = tpu.matmul %14, %15, %cst_10 {dimension_numbers = #tpu.dot_dimension_numbers<[1], [0], [0], [1], [0, 0, 1, 1], [], []>} : vector<8x1280xbf16>, vector<1280x128xbf16>, vector<8x128xf32> -> vector<8x128xf32>
    %17 = vector.broadcast %13 : vector<8x1xf32> to vector<8x128xf32>
    %18 = arith.mulf %16, %17 : vector<8x128xf32>
    %cst_11 = arith.constant -31.9999962 : f32
    %cst_12 = arith.constant 31.9999962 : f32
    %19 = vector.broadcast %cst_11 : f32 to vector<8x128xf32>
    %20 = arith.maximumf %19, %18 : vector<8x128xf32>
    %21 = vector.broadcast %cst_12 : f32 to vector<8x128xf32>
    %22 = arith.minimumf %21, %20 : vector<8x128xf32>
    %c0_13 = arith.constant 0 : index
    %c0_14 = arith.constant 0 : index
    %23 = vector.load %arg5[%c0_13, %c0_14] : memref<8x128xf32, #tpu.memory_space<vmem>>, vector<8x128xf32>
    tpu.vector_store %arg5[%c0_13, %c0_14], %22 {strides = array<i32>} : memref<8x128xf32, #tpu.memory_space<vmem>>, vector<8x128xf32>,
    return
  }
  func.func @transform_0(%arg0: i32) -> (i32, i32) {
    %c0_i32 = arith.constant 0 : i32
    %c0_i32_0 = arith.constant 0 : i32
    return %arg0, %c0_i32 : i32, i32
  }
  func.func @transform_1(%arg0: i32) -> (i32, i32) {
    %c0_i32 = arith.constant 0 : i32
    %c0_i32_0 = arith.constant 0 : i32
    %c0_i32_1 = arith.constant 0 : i32
    return %c0_i32, %c0_i32_0 : i32, i32
  }
  func.func @transform_2(%arg0: i32) -> (i32, i32) {
    %c0_i32 = arith.constant 0 : i32
    %c0_i32_0 = arith.constant 0 : i32
    %c0_i32_1 = arith.constant 0 : i32
    return %c0_i32, %c0_i32_0 : i32, i32
  }
  func.func @transform_3(%arg0: i32) -> (i32, i32) {
    %c0_i32 = arith.constant 0 : i32
    %c0_i32_0 = arith.constant 0 : i32
    %c0_i32_1 = arith.constant 0 : i32
    return %c0_i32, %c0_i32_0 : i32, i32
  }
  func.func @transform_4(%arg0: i32) -> (i32, i32) {
    %c0_i32 = arith.constant 0 : i32
    %c0_i32_0 = arith.constant 0 : i32
    return %arg0, %c0_i32 : i32, i32
  }
}

</mosaic_0001>

<bundles_post_ra>
// kernel: tpu_custom_call.1
= control target key start
LH: loop header
LB: loop body
LE: loop exit
PB: predicated region body
PF: predicated region fallthrough
CT: control target
= control target key end

     0   :  { %9 = vsyncpa [#allocation3], 0  ;;  %s11165_s0 = inlined_call_operand.hbm [shape: bf16[8,1536], index: 0, kind: input, shape index: {}]   ;;  %s11166_s1 = inlined_call_operand.hbm [shape: bf16[1536,1280], index: 1, kind: input, shape index: {}]   ;;  %s11167_s2 = inlined_call_operand.hbm [shape: f32[1,1280], index: 2, kind: input, shape index: {}]   ;;  %s11168_s3 = inlined_call_operand.hbm [shape: bf16[1280,128], index: 3, kind: input, shape index: {}]   ;;  %s11169_s4 = inlined_call_operand.hbm [shape: f32[8,128], index: 4, kind: output, shape index: {}]  }
   0x1   :  { %10 = vsyncpa [#allocation6], 0 }
   0x2   :  { %11 = vsyncpa [#allocation9], 0 }
   0x3   :  { %12 = vsyncpa [#allocation4], 0  ;;  %s10873_s15 = smov [#allocation5]  }
   0x4   :  { %s28_s16 = sshll.u32 %s10873_s15, 4  ;;  %s29_s16 = int_to_ptr.vmem [resolvable:$true] %s28_s16 }
   0x5   :  { %s10773_s17 = scalar_lea.vmem %s29_s16, 122880  ;;  %p10778_p1 = scmp.lt.s32.totalorder %s29_s16, %s29_s16 }
   0x6   :  { %p10774_p0 = scmp.ne.s32.totalorder %s29_s16, %s10773_s17  ;;  %p10779_p2 = scmp.lt.s32.totalorder %s10773_s17, %s10773_s17 }
   0x8   :  { %p10780_p3 = por %p10779_p2, %p10778_p1 }
   0xa   :  { %p10781_p4 = pnand %p10780_p3, %p10774_p0 }
   0xc   :  { %10784 = shalt.err (!%p10781_p4)
}
   0xd   :  { %s10874_s18 = smov 640   ;;  %s10875_s19 = smov 40  }
   0xe   :  { %34 = dma.hbm_to_vmem [thread:$0]  %s11166_s1, 122880, %s29_s16, [#allocation6], %s10874_s18, %s10874_s18, %s10875_s19  }
   0xf   :  { %s10876_s22 = smov [#allocation2]   ;;  %s10877_s24 = smov [#allocation7]  }
  0x10   :  { %s19_s23 = sshll.u32 %s10876_s22, 4  ;;  %s41_s25 = sshll.u32 %s10877_s24, 4  ;;  %s20_s23 = int_to_ptr.vmem [resolvable:$true] %s19_s23  ;;  %s42_s25 = int_to_ptr.vmem [resolvable:$true] %s41_s25 }
  0x11   :  { %s10793_s26 = scalar_lea.vmem %s20_s23, 768  ;;  %p10798_p6 = scmp.lt.s32.totalorder %s20_s23, %s20_s23 }
  0x12   :  { %p10794_p5 = scmp.ne.s32.totalorder %s20_s23, %s10793_s26  ;;  %p10799_p7 = scmp.lt.s32.totalorder %s10793_s26, %s10793_s26 }
  0x14   :  { %p10800_p8 = por %p10799_p7, %p10798_p6 }
  0x16   :  { %p10801_p9 = pnand %p10800_p8, %p10794_p5 }
  0x18   :  { %10804 = shalt.err (!%p10801_p9)
}
  0x19   :  { %22 = dma.hbm_to_vmem [thread:$0]  %s11165_s0, 768, %s20_s23, [#allocation3]  }
  0x1a   :  { %s10813_s29 = scalar_lea.vmem %s42_s25, 160  ;;  %p10818_p11 = scmp.lt.s32.totalorder %s42_s25, %s42_s25 }
  0x1b   :  { %p10814_p10 = scmp.ne.s32.totalorder %s42_s25, %s10813_s29  ;;  %p10819_p12 = scmp.lt.s32.totalorder %s10813_s29, %s10813_s29 }
  0x1d   :  { %p10820_p13 = por %p10819_p12, %p10818_p11 }
  0x1f   :  { %p10821_p0 = pnand %p10820_p13, %p10814_p10 }
  0x21   :  { %10824 = shalt.err (!%p10821_p0)
}
  0x22   :  { %44 = dma.hbm_to_vmem [thread:$0]  %s11167_s2, 160, %s42_s25, [#allocation6]  }
  0x23   :  { %s10878_s5 = smov [#allocation8]  }
  0x24   :  { %s50_s6 = sshll.u32 %s10878_s5, 4  ;;  %s51_s6 = int_to_ptr.vmem [resolvable:$true] %s50_s6 }
  0x25   :  { %s10833_s7 = scalar_lea.vmem %s51_s6, 10240  ;;  %p10838_p2 = scmp.lt.s32.totalorder %s51_s6, %s51_s6 }
  0x26   :  { %p10834_p1 = scmp.ne.s32.totalorder %s51_s6, %s10833_s7  ;;  %p10839_p3 = scmp.lt.s32.totalorder %s10833_s7, %s10833_s7 }
  0x28   :  { %p10840_p4 = por %p10839_p3, %p10838_p2 }
  0x2a   :  { %p10841_p5 = pnand %p10840_p4, %p10834_p1 }
  0x2c   :  { %10844 = shalt.err (!%p10841_p5)
}
  0x2d   :  { %s10879_s0 = smov 64   ;;  %s10880_s8 = smov 4  }
  0x2e   :  { %56 = dma.hbm_to_vmem [thread:$0]  %s11168_s3, 10240, %s51_s6, [#allocation9], %s10879_s0, %s10879_s0, %s10880_s8  }
  0x2f   :  { %10865 = dma.done.wait [#allocation3], 768  }
  0x30   :  { %10866 = vsyncadd [#allocation3], 4294966528 }
  0x31   :  { %10867 = dma.done.wait [#allocation6], 123040  }
  0x32   :  { %10868 = vsyncadd [#allocation6], 4294844256 }
  0x33   :  { %10869 = dma.done.wait [#allocation9], 10240  }
  0x34   :  { %10870 = vsyncadd [#allocation9], 4294957056  ;;  %v9229_v0 = vld [vmem:[#allocation5 + $0x234] ss:$40 sps:$4 sm:$0xff]   ;;  %v9233_v2 = vld [vmem:[#allocation5 + $0x230] ss:$40 sps:$4 sm:$0xff]  }
  0x35   :  { %v9231_v1 = vld [vmem:[#allocation5 + $0x734] ss:$40 sps:$4 sm:$0xff]   ;;  %5932 = vmatprep.subr.bf16.mxu0 %v9229_v0  ;;  %v9234_v3 = vld [vmem:[#allocation5 + $0x730] ss:$40 sps:$4 sm:$0xff]   ;;  %v9235_v4 = vld [vmem:[#allocation5 + $0x1e4] ss:$40 sps:$4 sm:$0xff]  }
  0x36   :  { %5973 = vmatprep.subr.bf16.mxu1 %v9231_v1  ;;  %5933 = vmatpush1.bf16.msra.mxu0 %v9233_v2  ;;  %v9237_v5 = vld [vmem:[#allocation5 + $0x6e4] ss:$40 sps:$4 sm:$0xff]   ;;  %v9239_v6 = vld [vmem:[#allocation5 + $0x1e0] ss:$40 sps:$4 sm:$0xff]   ;;  %v9241_v8 = vld [vmem:[#allocation5 + $0x194] ss:$40 sps:$4 sm:$0xff]  }
  0x37   :  { %5974 = vmatpush1.bf16.msra.mxu1 %v9234_v3  ;;  %5934 = vmatprep.subr.bf16.mxu0 %v9235_v4  ;;  %v9240_v7 = vld [vmem:[#allocation5 + $0x6e0] ss:$40 sps:$4 sm:$0xff]   ;;  %v9243_v9 = vld [vmem:[#allocation5 + $0x694] ss:$40 sps:$4 sm:$0xff]   ;;  %v9245_v10 = vld [vmem:[#allocation5 + $0x190] ss:$40 sps:$4 sm:$0xff]  }
  0x38   :  { %5975 = vmatprep.subr.bf16.mxu1 %v9237_v5  ;;  %v9246_v11 = vld [vmem:[#allocation5 + $0x690] ss:$40 sps:$4 sm:$0xff]   ;;  %v9247_v12 = vld [vmem:[#allocation5 + $0x144] ss:$40 sps:$4 sm:$0xff]   ;;  %v9251_v14 = vld [vmem:[#allocation5 + $0x140] ss:$40 sps:$4 sm:$0xff]  }
  0x39   :  { %v9249_v13 = vld [vmem:[#allocation5 + $0x644] ss:$40 sps:$4 sm:$0xff]   ;;  %v9252_v15 = vld [vmem:[#allocation5 + $0x640] ss:$40 sps:$4 sm:$0xff]   ;;  %v9253_v16 = vld [vmem:[#allocation5 + $0xf4] ss:$40 sps:$4 sm:$0xff]  }
  0x3a   :  { %5935 = vmatpush1.bf16.msra.mxu0 %v9239_v6  ;;  %v9255_v17 = vld [vmem:[#allocation5 + $0x5f4] ss:$40 sps:$4 sm:$0xff]   ;;  %v9257_v18 = vld [vmem:[#allocation5 + $0xf0] ss:$40 sps:$4 sm:$0xff]   ;;  %v9259_v20 = vld [vmem:[#allocation5 + $0xa4] ss:$40 sps:$4 sm:$0xff]  }
  0x3b   :  { %5976 = vmatpush1.bf16.msra.mxu1 %v9240_v7  ;;  %5936 = vmatprep.subr.bf16.mxu0 %v9241_v8  ;;  %v9258_v19 = vld [vmem:[#allocation5 + $0x5f0] ss:$40 sps:$4 sm:$0xff]   ;;  %v9261_v21 = vld [vmem:[#allocation5 + $0x5a4] ss:$40 sps:$4 sm:$0xff]   ;;  %v9263_v22 = vld [vmem:[#allocation5 + $0xa0] ss:$40 sps:$4 sm:$0xff]  }
  0x3c   :  { %5977 = vmatprep.subr.bf16.mxu1 %v9243_v9  ;;  %v9264_v23 = vld [vmem:[#allocation5 + $0x5a0] ss:$40 sps:$4 sm:$0xff]   ;;  %v9265_v24 = vld [vmem:[#allocation5 + $0x54] ss:$40 sps:$4 sm:$0xff]   ;;  %v9269_v26 = vld [vmem:[#allocation5 + $0x50] ss:$40 sps:$4 sm:$0xff]  }
  0x3d   :  { %v9267_v25 = vld [vmem:[#allocation5 + $0x554] ss:$40 sps:$4 sm:$0xff]   ;;  %v9270_v27 = vld [vmem:[#allocation5 + $0x550] ss:$40 sps:$4 sm:$0xff]   ;;  %v9271_v28 = vld [vmem:[#allocation5 + $0x4] ss:$40 sps:$4 sm:$0xff]  }
  0x3e   :  { %5937 = vmatpush1.bf16.msra.mxu0 %v9245_v10  ;;  %v9273_v29 = vld [vmem:[#allocation5 + $0x504] ss:$40 sps:$4 sm:$0xff]   ;;  %v9275_v30 = vld [vmem:[#allocation5] ss:$40 sps:$4 sm:$0xff]   ;;  %v9277_v32 = vld [vmem:[#allocation5 + $0x4b4] ss:$40 sps:$4 sm:$0xff]  }
  0x3f   :  { %5978 = vmatpush1.bf16.msra.mxu1 %v9246_v11  ;;  %5938 = vmatprep.subr.bf16.mxu0 %v9247_v12  ;;  %v9276_v31 = vld [vmem:[#allocation5 + $0x500] ss:$40 sps:$4 sm:$0xff]   ;;  %v9279_v33 = vld [vmem:[#allocation5 + $0x9b4] ss:$40 sps:$4 sm:$0xff]   ;;  %v9281_v34 = vld [vmem:[#allocation5 + $0x4b0] ss:$40 sps:$4 sm:$0xff]  }
  0x40   :  { %5979 = vmatprep.subr.bf16.mxu1 %v9249_v13  ;;  %v9282_v35 = vld [vmem:[#allocation5 + $0x9b0] ss:$40 sps:$4 sm:$0xff]   ;;  %v9283_v36 = vld [vmem:[#allocation5 + $0x464] ss:$40 sps:$4 sm:$0xff]   ;;  %v9287_v38 = vld [vmem:[#allocation5 + $0x460] ss:$40 sps:$4 sm:$0xff]  }
  0x41   :  { %v9285_v37 = vld [vmem:[#allocation5 + $0x964] ss:$40 sps:$4 sm:$0xff]   ;;  %v9288_v39 = vld [vmem:[#allocation5 + $0x960] ss:$40 sps:$4 sm:$0xff]   ;;  %v9289_v40 = vld [vmem:[#allocation5 + $0x414] ss:$40 sps:$4 sm:$0xff]  }
  0x42   :  { %5939 = vmatpush1.bf16.msra.mxu0 %v9251_v14  ;;  %v9291_v41 = vld [vmem:[#allocation5 + $0x914] ss:$40 sps:$4 sm:$0xff]   ;;  %v9293_v42 = vld [vmem:[#allocation5 + $0x410] ss:$40 sps:$4 sm:$0xff]   ;;  %v9295_v44 = vld [vmem:[#allocation5 + $0x3c4] ss:$40 sps:$4 sm:$0xff]  }
  0x43   :  { %5980 = vmatpush1.bf16.msra.mxu1 %v9252_v15  ;;  %5940 = vmatprep.subr.bf16.mxu0 %v9253_v16  ;;  %v9294_v43 = vld [vmem:[#allocation5 + $0x910] ss:$40 sps:$4 sm:$0xff]   ;;  %v9297_v45 = vld [vmem:[#allocation5 + $0x8c4] ss:$40 sps:$4 sm:$0xff]   ;;  %v9299_v49 = vld [vmem:[#allocation5 + $0x3c0] ss:$40 sps:$4 sm:$0xff]  }
  0x44   :  { %5981 = vmatprep.subr.bf16.mxu1 %v9255_v17  ;;  %v70_v46 = vld [vmem:[#allocation2] sm:$0xff]  ;;  %v71_v48 = vld [vmem:[#allocation2 + $0x8] sm:$0xff]  ;;  %v9300_v50 = vld [vmem:[#allocation5 + $0x8c0] ss:$40 sps:$4 sm:$0xff]   ;;  %s10881_s2 = smov [#allocation10]  }
  0x45   :  { %v10919_v47 = vcombine.high %v70_v46, %v70_v46  ;;  %v10921_v51 = vcombine.high %v71_v48, %v71_v48  ;;  %v9301_v52 = vld [vmem:[#allocation5 + $0x374] ss:$40 sps:$4 sm:$0xff]   ;;  %v9305_v54 = vld [vmem:[#allocation5 + $0x370] ss:$40 sps:$4 sm:$0xff]   ;;  %v9307_v56 = vld [vmem:[#allocation5 + $0x324] ss:$40 sps:$4 sm:$0xff]   ;;  %v10925_v6 = vcombine.low %v70_v46, %v70_v46  ;;  %v10927_v7 = vcombine.low %v71_v48, %v71_v48 }
  0x46   :  { %5941 = vmatpush1.bf16.msra.mxu0 %v9257_v18  ;;  %v9303_v53 = vld [vmem:[#allocation5 + $0x874] ss:$40 sps:$4 sm:$0xff]   ;;  %v9306_v55 = vld [vmem:[#allocation5 + $0x870] ss:$40 sps:$4 sm:$0xff]   ;;  %v9309_v57 = vld [vmem:[#allocation5 + $0x824] ss:$40 sps:$4 sm:$0xff]  }
  0x47   :  { %5982 = vmatpush1.bf16.msra.mxu1 %v9258_v19  ;;  %5942 = vmatprep.subr.bf16.mxu0 %v9259_v20  ;;  %v9311_v58 = vld [vmem:[#allocation5 + $0x320] ss:$40 sps:$4 sm:$0xff]   ;;  %v9313_v60 = vld [vmem:[#allocation5 + $0x2d4] ss:$40 sps:$4 sm:$0xff]   ;;  %v9317_v62 = vld [vmem:[#allocation5 + $0x2d0] ss:$40 sps:$4 sm:$0xff]  }
  0x48   :  { %5983 = vmatprep.subr.bf16.mxu1 %v9261_v21  ;;  %5964 = vmatprep.mubr.bf16.mxu0 %v10919_v47  ;;  %v9312_v59 = vld [vmem:[#allocation5 + $0x820] ss:$40 sps:$4 sm:$0xff]   ;;  %v9315_v61 = vld [vmem:[#allocation5 + $0x7d4] ss:$40 sps:$4 sm:$0xff]   ;;  %v9318_v63 = vld [vmem:[#allocation5 + $0x7d0] ss:$40 sps:$4 sm:$0xff]  }
  0x49   :  { %6005 = vmatprep.mubr.bf16.mxu1 %v10921_v51  ;;  %v9319_v0 = vld [vmem:[#allocation5 + $0x284] ss:$40 sps:$4 sm:$0xff]   ;;  %v9323_v2 = vld [vmem:[#allocation5 + $0x280] ss:$40 sps:$4 sm:$0xff]   ;;  %v9331_v4 = vld [vmem:[#allocation5 + $0xc34] ss:$40 sps:$4 sm:$0xff]  }
  0x4a   :  { %5943 = vmatpush1.bf16.msra.mxu0 %v9263_v22  ;;  %v9321_v1 = vld [vmem:[#allocation5 + $0x784] ss:$40 sps:$4 sm:$0xff]   ;;  %v9324_v3 = vld [vmem:[#allocation5 + $0x780] ss:$40 sps:$4 sm:$0xff]   ;;  %v9334_v5 = vld [vmem:[#allocation5 + $0x1134] ss:$40 sps:$4 sm:$0xff]  }
  0x4b   :  { %5984 = vmatpush1.bf16.msra.mxu1 %v9264_v23  ;;  %5944 = vmatprep.subr.bf16.mxu0 %v9265_v24  ;;  %v9329_v8 = vld [vmem:[#allocation5 + $0xc30] ss:$40 sps:$4 sm:$0xff]   ;;  %v9337_v10 = vld [vmem:[#allocation5 + $0xbe4] ss:$40 sps:$4 sm:$0xff]   ;;  %v9335_v12 = vld [vmem:[#allocation5 + $0xbe0] ss:$40 sps:$4 sm:$0xff]  }
  0x4c   :  { %5985 = vmatprep.subr.bf16.mxu1 %v9267_v25  ;;  %v9332_v9 = vld [vmem:[#allocation5 + $0x1130] ss:$40 sps:$4 sm:$0xff]   ;;  %v9340_v11 = vld [vmem:[#allocation5 + $0x10e4] ss:$40 sps:$4 sm:$0xff]   ;;  %v9338_v13 = vld [vmem:[#allocation5 + $0x10e0] ss:$40 sps:$4 sm:$0xff]  }
  0x4d   :  { %v9343_v14 = vld [vmem:[#allocation5 + $0xb94] ss:$40 sps:$4 sm:$0xff]   ;;  %v9341_v16 = vld [vmem:[#allocation5 + $0xb90] ss:$40 sps:$4 sm:$0xff]   ;;  %v9349_v18 = vld [vmem:[#allocation5 + $0xb44] ss:$40 sps:$4 sm:$0xff]  }
  0x4e   :  { %5945 = vmatpush1.bf16.msra.mxu0 %v9269_v26  ;;  %v9346_v15 = vld [vmem:[#allocation5 + $0x1094] ss:$40 sps:$4 sm:$0xff]   ;;  %v9344_v17 = vld [vmem:[#allocation5 + $0x1090] ss:$40 sps:$4 sm:$0xff]   ;;  %v9352_v19 = vld [vmem:[#allocation5 + $0x1044] ss:$40 sps:$4 sm:$0xff]  }
  0x4f   :  { %5986 = vmatpush1.bf16.msra.mxu1 %v9270_v27  ;;  %5946 = vmatprep.subr.bf16.mxu0 %v9271_v28  ;;  %v9347_v20 = vld [vmem:[#allocation5 + $0xb40] ss:$40 sps:$4 sm:$0xff]   ;;  %v9355_v22 = vld [vmem:[#allocation5 + $0xaf4] ss:$40 sps:$4 sm:$0xff]   ;;  %v9353_v24 = vld [vmem:[#allocation5 + $0xaf0] ss:$40 sps:$4 sm:$0xff]  }
  0x50   :  { %5987 = vmatprep.subr.bf16.mxu1 %v9273_v29  ;;  %v9350_v21 = vld [vmem:[#allocation5 + $0x1040] ss:$40 sps:$4 sm:$0xff]   ;;  %v9358_v23 = vld [vmem:[#allocation5 + $0xff4] ss:$40 sps:$4 sm:$0xff]   ;;  %v9356_v25 = vld [vmem:[#allocation5 + $0xff0] ss:$40 sps:$4 sm:$0xff]  }
  0x51   :  { %v9361_v26 = vld [vmem:[#allocation5 + $0xaa4] ss:$40 sps:$4 sm:$0xff]   ;;  %v9359_v28 = vld [vmem:[#allocation5 + $0xaa0] ss:$40 sps:$4 sm:$0xff]   ;;  %s8046_s3 = sshll.u32 %s10881_s2, 4  ;;  %s8047_s3 = int_to_ptr.vmem [resolvable:$true] %s8046_s3 }
  0x52   :  { %5947 = vmatpush1.bf16.msra.mxu0 %v9275_v30  ;;  %v9364_v27 = vld [vmem:[#allocation5 + $0xfa4] ss:$40 sps:$4 sm:$0xff]   ;;  %v9362_v29 = vld [vmem:[#allocation5 + $0xfa0] ss:$40 sps:$4 sm:$0xff]   ;;  %v9367_v30 = vld [vmem:[#allocation5 + $0xa54] ss:$40 sps:$4 sm:$0xff]   ;;  %p10850_p7 = scmp.lt.s32.totalorder %s8047_s3, %s8047_s3 }
  0x53   :  { %5988 = vmatpush1.bf16.msra.mxu1 %v9276_v31  ;;  %5948 = vmatprep.subr.bf16.mxu0 %v9277_v32  ;;  %v9370_v31 = vld [vmem:[#allocation5 + $0xf54] ss:$40 sps:$4 sm:$0xff]   ;;  %v10931_v32 = vld [vmem:[#allocation2 + $0x10] sm:$0xff]  ;;  %s10845_s11 = scalar_lea.vmem %s8047_s3, 128 }
  0x54   :  { %5989 = vmatprep.subr.bf16.mxu1 %v9279_v33  ;;  %v10933_v33 = vld [vmem:[#allocation2 + $0x18] sm:$0xff]  ;;  %p10846_p6 = scmp.ne.s32.totalorder %s8047_s3, %s10845_s11  ;;  %p10851_p8 = scmp.lt.s32.totalorder %s10845_s11, %s10845_s11 }
  0x55   :  { %v9385_v46 = vld [vmem:[#allocation5 + $0xe64] ss:$40 sps:$4 sm:$0xff]  }
  0x56   :  { %5949 = vmatpush2.bf16.msra.mxu0 %v9281_v34  ;;  %v9365_v34 = vld [vmem:[#allocation5 + $0xa50] ss:$40 sps:$4 sm:$0xff]   ;;  %v9388_v48 = vld [vmem:[#allocation5 + $0x1364] ss:$40 sps:$4 sm:$0xff]   ;;  %p10852_p9 = por %p10851_p8, %p10850_p7 }
  0x57   :  { %5990 = vmatpush2.bf16.msra.mxu1 %v9282_v35  ;;  %5950 = vmatprep.subr.bf16.mxu0 %v9283_v36  ;;  %v9368_v35 = vld [vmem:[#allocation5 + $0xf50] ss:$40 sps:$4 sm:$0xff]   ;;  %v10937_v36 = vcombine.high %v10931_v32, %v10931_v32 }
  0x58   :  { %5991 = vmatprep.subr.bf16.mxu1 %v9285_v37  ;;  %v10941_v37 = vcombine.high %v10933_v33, %v10933_v33  ;;  %p10853_p10 = pnand %p10852_p9, %p10846_p6 }
  0x5a   :  { %5951 = vmatpush2.bf16.msra.mxu0 %v9287_v38  ;;  %v9373_v38 = vld [vmem:[#allocation5 + $0xa04] ss:$40 sps:$4 sm:$0xff]  }
  0x5b   :  { %5992 = vmatpush2.bf16.msra.mxu1 %v9288_v39  ;;  %5952 = vmatprep.subr.bf16.mxu0 %v9289_v40  ;;  %v9376_v39 = vld [vmem:[#allocation5 + $0xf04] ss:$40 sps:$4 sm:$0xff]   ;;  %v9371_v40 = vld [vmem:[#allocation5 + $0xa00] ss:$40 sps:$4 sm:$0xff]  }
  0x5c   :  { %5993 = vmatprep.subr.bf16.mxu1 %v9291_v41  ;;  %v9374_v41 = vld [vmem:[#allocation5 + $0xf00] ss:$40 sps:$4 sm:$0xff]  }
  0x5e   :  { %5953 = vmatpush2.bf16.msra.mxu0 %v9293_v42  ;;  %v9379_v42 = vld [vmem:[#allocation5 + $0xeb4] ss:$40 sps:$4 sm:$0xff]  }
  0x5f   :  { %5994 = vmatpush2.bf16.msra.mxu1 %v9294_v43  ;;  %5954 = vmatprep.subr.bf16.mxu0 %v9295_v44  ;;  %v9382_v43 = vld [vmem:[#allocation5 + $0x13b4] ss:$40 sps:$4 sm:$0xff]   ;;  %v9377_v44 = vld [vmem:[#allocation5 + $0xeb0] ss:$40 sps:$4 sm:$0xff]  }
  0x60   :  { %5995 = vmatprep.subr.bf16.mxu1 %v9297_v45  ;;  %v9380_v45 = vld [vmem:[#allocation5 + $0x13b0] ss:$40 sps:$4 sm:$0xff]  }
  0x62   :  { %5955 = vmatpush2.bf16.msra.mxu0 %v9299_v49  ;;  %v9383_v49 = vld [vmem:[#allocation5 + $0xe60] ss:$40 sps:$4 sm:$0xff]  }
  0x63   :  { %5996 = vmatpush2.bf16.msra.mxu1 %v9300_v50  ;;  %5956 = vmatprep.subr.bf16.mxu0 %v9301_v52  ;;  %v9386_v50 = vld [vmem:[#allocation5 + $0x1360] ss:$40 sps:$4 sm:$0xff]   ;;  %v9391_v52 = vld [vmem:[#allocation5 + $0xe14] ss:$40 sps:$4 sm:$0xff]  }
  0x64   :  { %5997 = vmatprep.subr.bf16.mxu1 %v9303_v53  ;;  %v9394_v53 = vld [vmem:[#allocation5 + $0x1314] ss:$40 sps:$4 sm:$0xff]  }
  0x66   :  { %5957 = vmatpush2.bf16.msra.mxu0 %v9305_v54  ;;  %v9389_v54 = vld [vmem:[#allocation5 + $0xe10] ss:$40 sps:$4 sm:$0xff]  }
  0x67   :  { %5998 = vmatpush2.bf16.msra.mxu1 %v9306_v55  ;;  %5958 = vmatprep.subr.bf16.mxu0 %v9307_v56  ;;  %v9392_v55 = vld [vmem:[#allocation5 + $0x1310] ss:$40 sps:$4 sm:$0xff]   ;;  %v9397_v56 = vld [vmem:[#allocation5 + $0xdc4] ss:$40 sps:$4 sm:$0xff]  }
  0x68   :  { %5999 = vmatprep.subr.bf16.mxu1 %v9309_v57  ;;  %v9400_v57 = vld [vmem:[#allocation5 + $0x12c4] ss:$40 sps:$4 sm:$0xff]  }
  0x6a   :  { %5959 = vmatpush2.bf16.msra.mxu0 %v9311_v58  ;;  %v9395_v58 = vld [vmem:[#allocation5 + $0xdc0] ss:$40 sps:$4 sm:$0xff]  }
  0x6b   :  { %6000 = vmatpush2.bf16.msra.mxu1 %v9312_v59  ;;  %5960 = vmatprep.subr.bf16.mxu0 %v9313_v60  ;;  %v9398_v59 = vld [vmem:[#allocation5 + $0x12c0] ss:$40 sps:$4 sm:$0xff]   ;;  %v9403_v60 = vld [vmem:[#allocation5 + $0xd74] ss:$40 sps:$4 sm:$0xff]  }
  0x6c   :  { %6001 = vmatprep.subr.bf16.mxu1 %v9315_v61  ;;  %v9406_v61 = vld [vmem:[#allocation5 + $0x1274] ss:$40 sps:$4 sm:$0xff]  }
  0x6e   :  { %5961 = vmatpush2.bf16.msra.mxu0 %v9317_v62  ;;  %v9401_v62 = vld [vmem:[#allocation5 + $0xd70] ss:$40 sps:$4 sm:$0xff]  }
  0x6f   :  { %6002 = vmatpush2.bf16.msra.mxu1 %v9318_v63  ;;  %5962 = vmatprep.subr.bf16.mxu0 %v9319_v0  ;;  %v9404_v63 = vld [vmem:[#allocation5 + $0x1270] ss:$40 sps:$4 sm:$0xff]   ;;  %v9409_v0 = vld [vmem:[#allocation5 + $0xd24] ss:$40 sps:$4 sm:$0xff]  }
  0x70   :  { %6003 = vmatprep.subr.bf16.mxu1 %v9321_v1  ;;  %v9412_v1 = vld [vmem:[#allocation5 + $0x1224] ss:$40 sps:$4 sm:$0xff]  }
  0x72   :  { %5963 = vmatpush2.bf16.msra.mxu0 %v9323_v2  ;;  %v9407_v2 = vld [vmem:[#allocation5 + $0xd20] ss:$40 sps:$4 sm:$0xff]  }
  0x73   :  { %6004 = vmatpush2.bf16.msra.mxu1 %v9324_v3  ;;  %6014 = vmatprep.subr.bf16.mxu0 %v9331_v4  ;;  %v9410_v3 = vld [vmem:[#allocation5 + $0x1220] ss:$40 sps:$4 sm:$0xff]   ;;  %v9415_v4 = vld [vmem:[#allocation5 + $0xcd4] ss:$40 sps:$4 sm:$0xff]  }
  0x74   :  { %6055 = vmatprep.subr.bf16.mxu1 %v9334_v5  ;;  %v9418_v5 = vld [vmem:[#allocation5 + $0x11d4] ss:$40 sps:$4 sm:$0xff]  }
  0x75   :  { %5965 = vmatmul.mubr.bf16.vlgmr.msra.gmra.mxu0 %v10925_v6 }
  0x76   :  { %6006 = vmatmul.mubr.bf16.vlgmr.msra.gmra.mxu1 %v10927_v7  ;;  %6015 = vmatpush1.bf16.msra.mxu0 %v9329_v8  ;;  %v9413_v8 = vld [vmem:[#allocation5 + $0xcd0] ss:$40 sps:$4 sm:$0xff]  }
  0x77   :  { %6056 = vmatpush1.bf16.msra.mxu1 %v9332_v9  ;;  %6016 = vmatprep.subr.bf16.mxu0 %v9337_v10  ;;  %v9416_v9 = vld [vmem:[#allocation5 + $0x11d0] ss:$40 sps:$4 sm:$0xff]   ;;  %v9421_v10 = vld [vmem:[#allocation5 + $0xc84] ss:$40 sps:$4 sm:$0xff]  }
  0x78   :  { %6057 = vmatprep.subr.bf16.mxu1 %v9340_v11  ;;  %6046 = vmatprep.mubr.bf16.mxu0 %v10937_v36  ;;  %v9424_v11 = vld [vmem:[#allocation5 + $0x1184] ss:$40 sps:$4 sm:$0xff]  }
  0x79   :  { %6087 = vmatprep.mubr.bf16.mxu1 %v10941_v37 }
  0x7a   :  { %6017 = vmatpush1.bf16.msra.mxu0 %v9335_v12  ;;  %v9419_v12 = vld [vmem:[#allocation5 + $0xc80] ss:$40 sps:$4 sm:$0xff]  }
  0x7b   :  { %6058 = vmatpush1.bf16.msra.mxu1 %v9338_v13  ;;  %6018 = vmatprep.subr.bf16.mxu0 %v9343_v14  ;;  %v9422_v13 = vld [vmem:[#allocation5 + $0x1180] ss:$40 sps:$4 sm:$0xff]   ;;  %v9431_v14 = vld [vmem:[#allocation5 + $0x1634] ss:$40 sps:$4 sm:$0xff]  }
  0x7c   :  { %6059 = vmatprep.subr.bf16.mxu1 %v9346_v15  ;;  %v9434_v15 = vld [vmem:[#allocation5 + $0x1b34] ss:$40 sps:$4 sm:$0xff]  }
  0x7e   :  { %6019 = vmatpush1.bf16.msra.mxu0 %v9341_v16  ;;  %v10947_v16 = vcombine.low %v10931_v32, %v10931_v32  ;;  %v9449_v32 = vld [vmem:[#allocation5 + $0x1544] ss:$40 sps:$4 sm:$0xff]  }
  0x7f   :  { %6060 = vmatpush1.bf16.msra.mxu1 %v9344_v17  ;;  %6020 = vmatprep.subr.bf16.mxu0 %v9349_v18  ;;  %v10951_v17 = vcombine.low %v10933_v33, %v10933_v33  ;;  %v9429_v18 = vld [vmem:[#allocation5 + $0x1630] ss:$40 sps:$4 sm:$0xff]   ;;  %v9452_v33 = vld [vmem:[#allocation5 + $0x1a44] ss:$40 sps:$4 sm:$0xff]  }
  0x80   :  { %6061 = vmatprep.subr.bf16.mxu1 %v9352_v19  ;;  %v9432_v19 = vld [vmem:[#allocation5 + $0x1b30] ss:$40 sps:$4 sm:$0xff]  }
  0x82   :  { %6021 = vmatpush1.bf16.msra.mxu0 %v9347_v20  ;;  %v9437_v20 = vld [vmem:[#allocation5 + $0x15e4] ss:$40 sps:$4 sm:$0xff]  }
  0x83   :  { %6062 = vmatpush1.bf16.msra.mxu1 %v9350_v21  ;;  %6022 = vmatprep.subr.bf16.mxu0 %v9355_v22  ;;  %v9440_v21 = vld [vmem:[#allocation5 + $0x1ae4] ss:$40 sps:$4 sm:$0xff]   ;;  %v10953_v22 = vld [vmem:[#allocation2 + $0x20] sm:$0xff] }
  0x84   :  { %6063 = vmatprep.subr.bf16.mxu1 %v9358_v23  ;;  %v10955_v23 = vld [vmem:[#allocation2 + $0x28] sm:$0xff] }
  0x86   :  { %6023 = vmatpush1.bf16.msra.mxu0 %v9353_v24  ;;  %v10959_v24 = vcombine.high %v10953_v22, %v10953_v22 }
  0x87   :  { %6064 = vmatpush1.bf16.msra.mxu1 %v9356_v25  ;;  %6024 = vmatprep.subr.bf16.mxu0 %v9361_v26  ;;  %v10963_v25 = vcombine.high %v10955_v23, %v10955_v23  ;;  %v9435_v26 = vld [vmem:[#allocation5 + $0x15e0] ss:$40 sps:$4 sm:$0xff]  }
  0x88   :  { %6065 = vmatprep.subr.bf16.mxu1 %v9364_v27  ;;  %v9438_v27 = vld [vmem:[#allocation5 + $0x1ae0] ss:$40 sps:$4 sm:$0xff]  }
  0x8a   :  { %6025 = vmatpush1.bf16.msra.mxu0 %v9359_v28  ;;  %v9443_v28 = vld [vmem:[#allocation5 + $0x1594] ss:$40 sps:$4 sm:$0xff]  }
  0x8b   :  { %6066 = vmatpush1.bf16.msra.mxu1 %v9362_v29  ;;  %6026 = vmatprep.subr.bf16.mxu0 %v9367_v30  ;;  %v9446_v29 = vld [vmem:[#allocation5 + $0x1a94] ss:$40 sps:$4 sm:$0xff]   ;;  %v9441_v30 = vld [vmem:[#allocation5 + $0x1590] ss:$40 sps:$4 sm:$0xff]  }
  0x8c   :  { %6067 = vmatprep.subr.bf16.mxu1 %v9370_v31  ;;  %v9444_v31 = vld [vmem:[#allocation5 + $0x1a90] ss:$40 sps:$4 sm:$0xff]  }
  0x8e   :  { %6027 = vmatpush1.bf16.msra.mxu0 %v9365_v34  ;;  %v9447_v34 = vld [vmem:[#allocation5 + $0x1540] ss:$40 sps:$4 sm:$0xff]  }
  0x8f   :  { %6068 = vmatpush1.bf16.msra.mxu1 %v9368_v35  ;;  %6028 = vmatprep.subr.bf16.mxu0 %v9373_v38  ;;  %v9450_v35 = vld [vmem:[#allocation5 + $0x1a40] ss:$40 sps:$4 sm:$0xff]   ;;  %v9455_v38 = vld [vmem:[#allocation5 + $0x14f4] ss:$40 sps:$4 sm:$0xff]  }
  0x90   :  { %6069 = vmatprep.subr.bf16.mxu1 %v9376_v39  ;;  %v9458_v39 = vld [vmem:[#allocation5 + $0x19f4] ss:$40 sps:$4 sm:$0xff]  }
  0x92   :  { %6029 = vmatpush1.bf16.msra.mxu0 %v9371_v40  ;;  %v9453_v40 = vld [vmem:[#allocation5 + $0x14f0] ss:$40 sps:$4 sm:$0xff]  }
  0x93   :  { %6070 = vmatpush1.bf16.msra.mxu1 %v9374_v41  ;;  %6030 = vmatprep.subr.bf16.mxu0 %v9379_v42  ;;  %v9456_v41 = vld [vmem:[#allocation5 + $0x19f0] ss:$40 sps:$4 sm:$0xff]   ;;  %v9461_v42 = vld [vmem:[#allocation5 + $0x14a4] ss:$40 sps:$4 sm:$0xff]  }
  0x94   :  { %6071 = vmatprep.subr.bf16.mxu1 %v9382_v43  ;;  %v9464_v43 = vld [vmem:[#allocation5 + $0x19a4] ss:$40 sps:$4 sm:$0xff]  }
  0x96   :  { %6031 = vmatpush2.bf16.msra.mxu0 %v9377_v44  ;;  %v9459_v44 = vld [vmem:[#allocation5 + $0x14a0] ss:$40 sps:$4 sm:$0xff]  }
  0x97   :  { %6072 = vmatpush2.bf16.msra.mxu1 %v9380_v45  ;;  %6032 = vmatprep.subr.bf16.mxu0 %v9385_v46  ;;  %v9462_v45 = vld [vmem:[#allocation5 + $0x19a0] ss:$40 sps:$4 sm:$0xff]   ;;  %v9467_v46 = vld [vmem:[#allocation5 + $0x1454] ss:$40 sps:$4 sm:$0xff]  }
  0x98   :  { %6073 = vmatprep.subr.bf16.mxu1 %v9388_v48  ;;  %v9470_v48 = vld [vmem:[#allocation5 + $0x1954] ss:$40 sps:$4 sm:$0xff]  }
  0x9a   :  { %6033 = vmatpush2.bf16.msra.mxu0 %v9383_v49  ;;  %v9465_v49 = vld [vmem:[#allocation5 + $0x1450] ss:$40 sps:$4 sm:$0xff]  }
  0x9b   :  { %6074 = vmatpush2.bf16.msra.mxu1 %v9386_v50  ;;  %6034 = vmatprep.subr.bf16.mxu0 %v9391_v52  ;;  %v9468_v50 = vld [vmem:[#allocation5 + $0x1950] ss:$40 sps:$4 sm:$0xff]   ;;  %v9473_v52 = vld [vmem:[#allocation5 + $0x1404] ss:$40 sps:$4 sm:$0xff]  }
  0x9c   :  { %6075 = vmatprep.subr.bf16.mxu1 %v9394_v53  ;;  %v9476_v53 = vld [vmem:[#allocation5 + $0x1904] ss:$40 sps:$4 sm:$0xff]  }
  0x9e   :  { %6035 = vmatpush2.bf16.msra.mxu0 %v9389_v54  ;;  %v9471_v54 = vld [vmem:[#allocation5 + $0x1400] ss:$40 sps:$4 sm:$0xff]  }
  0x9f   :  { %6076 = vmatpush2.bf16.msra.mxu1 %v9392_v55  ;;  %6036 = vmatprep.subr.bf16.mxu0 %v9397_v56  ;;  %v9474_v55 = vld [vmem:[#allocation5 + $0x1900] ss:$40 sps:$4 sm:$0xff]   ;;  %v9479_v56 = vld [vmem:[#allocation5 + $0x18b4] ss:$40 sps:$4 sm:$0xff]  }
  0xa0   :  { %6077 = vmatprep.subr.bf16.mxu1 %v9400_v57  ;;  %v9482_v57 = vld [vmem:[#allocation5 + $0x1db4] ss:$40 sps:$4 sm:$0xff]  }
  0xa2   :  { %6037 = vmatpush2.bf16.msra.mxu0 %v9395_v58  ;;  %v9477_v58 = vld [vmem:[#allocation5 + $0x18b0] ss:$40 sps:$4 sm:$0xff]  }
  0xa3   :  { %6078 = vmatpush2.bf16.msra.mxu1 %v9398_v59  ;;  %6038 = vmatprep.subr.bf16.mxu0 %v9403_v60  ;;  %v9480_v59 = vld [vmem:[#allocation5 + $0x1db0] ss:$40 sps:$4 sm:$0xff]   ;;  %v9485_v60 = vld [vmem:[#allocation5 + $0x1864] ss:$40 sps:$4 sm:$0xff]  }
  0xa4   :  { %6079 = vmatprep.subr.bf16.mxu1 %v9406_v61  ;;  %v9488_v61 = vld [vmem:[#allocation5 + $0x1d64] ss:$40 sps:$4 sm:$0xff]  }
  0xa6   :  { %6039 = vmatpush2.bf16.msra.mxu0 %v9401_v62  ;;  %v9483_v62 = vld [vmem:[#allocation5 + $0x1860] ss:$40 sps:$4 sm:$0xff]  }
  0xa7   :  { %6080 = vmatpush2.bf16.msra.mxu1 %v9404_v63  ;;  %6040 = vmatprep.subr.bf16.mxu0 %v9409_v0  ;;  %v9486_v63 = vld [vmem:[#allocation5 + $0x1d60] ss:$40 sps:$4 sm:$0xff]   ;;  %v9491_v0 = vld [vmem:[#allocation5 + $0x1814] ss:$40 sps:$4 sm:$0xff]  }
  0xa8   :  { %6081 = vmatprep.subr.bf16.mxu1 %v9412_v1  ;;  %v9494_v1 = vld [vmem:[#allocation5 + $0x1d14] ss:$40 sps:$4 sm:$0xff]  }
  0xaa   :  { %6041 = vmatpush2.bf16.msra.mxu0 %v9407_v2  ;;  %v9489_v2 = vld [vmem:[#allocation5 + $0x1810] ss:$40 sps:$4 sm:$0xff]  }
  0xab   :  { %6082 = vmatpush2.bf16.msra.mxu1 %v9410_v3  ;;  %6042 = vmatprep.subr.bf16.mxu0 %v9415_v4  ;;  %v9492_v3 = vld [vmem:[#allocation5 + $0x1d10] ss:$40 sps:$4 sm:$0xff]   ;;  %v9497_v4 = vld [vmem:[#allocation5 + $0x17c4] ss:$40 sps:$4 sm:$0xff]  }
  0xac   :  { %6083 = vmatprep.subr.bf16.mxu1 %v9418_v5  ;;  %v9500_v5 = vld [vmem:[#allocation5 + $0x1cc4] ss:$40 sps:$4 sm:$0xff]  }
  0xae   :  { %6043 = vmatpush2.bf16.msra.mxu0 %v9413_v8  ;;  %v9495_v8 = vld [vmem:[#allocation5 + $0x17c0] ss:$40 sps:$4 sm:$0xff]  }
  0xaf   :  { %6084 = vmatpush2.bf16.msra.mxu1 %v9416_v9  ;;  %6044 = vmatprep.subr.bf16.mxu0 %v9421_v10  ;;  %v9498_v9 = vld [vmem:[#allocation5 + $0x1cc0] ss:$40 sps:$4 sm:$0xff]   ;;  %v9503_v10 = vld [vmem:[#allocation5 + $0x1774] ss:$40 sps:$4 sm:$0xff]  }
  0xb0   :  { %6085 = vmatprep.subr.bf16.mxu1 %v9424_v11  ;;  %v9506_v11 = vld [vmem:[#allocation5 + $0x1c74] ss:$40 sps:$4 sm:$0xff]  }
  0xb2   :  { %6045 = vmatpush2.bf16.msra.mxu0 %v9419_v12  ;;  %v9501_v12 = vld [vmem:[#allocation5 + $0x1770] ss:$40 sps:$4 sm:$0xff]  }
  0xb3   :  { %6086 = vmatpush2.bf16.msra.mxu1 %v9422_v13  ;;  %6096 = vmatprep.subr.bf16.mxu0 %v9431_v14  ;;  %v9504_v13 = vld [vmem:[#allocation5 + $0x1c70] ss:$40 sps:$4 sm:$0xff]   ;;  %v9509_v14 = vld [vmem:[#allocation5 + $0x1724] ss:$40 sps:$4 sm:$0xff]  }
  0xb4   :  { %6137 = vmatprep.subr.bf16.mxu1 %v9434_v15  ;;  %v9512_v15 = vld [vmem:[#allocation5 + $0x1c24] ss:$40 sps:$4 sm:$0xff]  }
  0xb5   :  { %6047 = vmatmul.mubr.bf16.vlgmr.msra.gmra.mxu0 %v10947_v16 }
  0xb6   :  { %6088 = vmatmul.mubr.bf16.vlgmr.msra.gmra.mxu1 %v10951_v17  ;;  %6097 = vmatpush1.bf16.msra.mxu0 %v9429_v18  ;;  %v9507_v18 = vld [vmem:[#allocation5 + $0x1720] ss:$40 sps:$4 sm:$0xff]  }
  0xb7   :  { %6138 = vmatpush1.bf16.msra.mxu1 %v9432_v19  ;;  %6098 = vmatprep.subr.bf16.mxu0 %v9437_v20  ;;  %v9510_v19 = vld [vmem:[#allocation5 + $0x1c20] ss:$40 sps:$4 sm:$0xff]   ;;  %v9515_v20 = vld [vmem:[#allocation5 + $0x16d4] ss:$40 sps:$4 sm:$0xff]  }
  0xb8   :  { %6139 = vmatprep.subr.bf16.mxu1 %v9440_v21  ;;  %6128 = vmatprep.mubr.bf16.mxu0 %v10959_v24  ;;  %v9518_v21 = vld [vmem:[#allocation5 + $0x1bd4] ss:$40 sps:$4 sm:$0xff]  }
  0xb9   :  { %6169 = vmatprep.mubr.bf16.mxu1 %v10963_v25 }
  0xba   :  { %6099 = vmatpush1.bf16.msra.mxu0 %v9435_v26  ;;  %v9513_v26 = vld [vmem:[#allocation5 + $0x16d0] ss:$40 sps:$4 sm:$0xff]  }
  0xbb   :  { %6140 = vmatpush1.bf16.msra.mxu1 %v9438_v27  ;;  %6100 = vmatprep.subr.bf16.mxu0 %v9443_v28  ;;  %v9516_v27 = vld [vmem:[#allocation5 + $0x1bd0] ss:$40 sps:$4 sm:$0xff]   ;;  %v9521_v28 = vld [vmem:[#allocation5 + $0x1684] ss:$40 sps:$4 sm:$0xff]  }
  0xbc   :  { %6141 = vmatprep.subr.bf16.mxu1 %v9446_v29  ;;  %v9524_v29 = vld [vmem:[#allocation5 + $0x1b84] ss:$40 sps:$4 sm:$0xff]  }
  0xbe   :  { %6101 = vmatpush1.bf16.msra.mxu0 %v9441_v30  ;;  %v9519_v30 = vld [vmem:[#allocation5 + $0x1680] ss:$40 sps:$4 sm:$0xff]  }
  0xbf   :  { %6142 = vmatpush1.bf16.msra.mxu1 %v9444_v31  ;;  %6102 = vmatprep.subr.bf16.mxu0 %v9449_v32  ;;  %v9522_v31 = vld [vmem:[#allocation5 + $0x1b80] ss:$40 sps:$4 sm:$0xff]   ;;  %v9531_v32 = vld [vmem:[#allocation5 + $0x23c] ss:$40 sps:$4 sm:$0xff]  }
  0xc0   :  { %6143 = vmatprep.subr.bf16.mxu1 %v9452_v33  ;;  %v9534_v33 = vld [vmem:[#allocation5 + $0x73c] ss:$40 sps:$4 sm:$0xff]  }
  0xc2   :  { %6103 = vmatpush1.bf16.msra.mxu0 %v9447_v34  ;;  %v10971_v34 = vcombine.low %v10953_v22, %v10953_v22  ;;  %v9538_v22 = vld [vmem:[#allocation5 + $0x6e8] ss:$40 sps:$4 sm:$0xff]  }
  0xc3   :  { %6144 = vmatpush1.bf16.msra.mxu1 %v9450_v35  ;;  %6104 = vmatprep.subr.bf16.mxu0 %v9455_v38  ;;  %v10975_v35 = vcombine.low %v10955_v23, %v10955_v23  ;;  %v9529_v38 = vld [vmem:[#allocation5 + $0x238] ss:$40 sps:$4 sm:$0xff]   ;;  %v9546_v23 = vld [vmem:[#allocation5 + $0x69c] ss:$40 sps:$4 sm:$0xff]  }
  0xc4   :  { %6145 = vmatprep.subr.bf16.mxu1 %v9458_v39  ;;  %v9532_v39 = vld [vmem:[#allocation5 + $0x738] ss:$40 sps:$4 sm:$0xff]  }
  0xc6   :  { %6105 = vmatpush1.bf16.msra.mxu0 %v9453_v40  ;;  %v9537_v40 = vld [vmem:[#allocation5 + $0x1ec] ss:$40 sps:$4 sm:$0xff]  }
  0xc7   :  { %6146 = vmatpush1.bf16.msra.mxu1 %v9456_v41  ;;  %6106 = vmatprep.subr.bf16.mxu0 %v9461_v42  ;;  %v9540_v41 = vld [vmem:[#allocation5 + $0x6ec] ss:$40 sps:$4 sm:$0xff]   ;;  %v9535_v42 = vld [vmem:[#allocation5 + $0x1e8] ss:$40 sps:$4 sm:$0xff]  }
  0xc8   :  { %6147 = vmatprep.subr.bf16.mxu1 %v9464_v43  ;;  %v9543_v43 = vld [vmem:[#allocation5 + $0x19c] ss:$40 sps:$4 sm:$0xff]  }
  0xca   :  { %6107 = vmatpush1.bf16.msra.mxu0 %v9459_v44  ;;  %v9541_v44 = vld [vmem:[#allocation5 + $0x198] ss:$40 sps:$4 sm:$0xff]  }
  0xcb   :  { %6148 = vmatpush1.bf16.msra.mxu1 %v9462_v45  ;;  %6108 = vmatprep.subr.bf16.mxu0 %v9467_v46  ;;  %v9544_v45 = vld [vmem:[#allocation5 + $0x698] ss:$40 sps:$4 sm:$0xff]   ;;  %v9549_v46 = vld [vmem:[#allocation5 + $0x14c] ss:$40 sps:$4 sm:$0xff]  }
  0xcc   :  { %6149 = vmatprep.subr.bf16.mxu1 %v9470_v48  ;;  %v9552_v48 = vld [vmem:[#allocation5 + $0x64c] ss:$40 sps:$4 sm:$0xff]  }
  0xce   :  { %6109 = vmatpush1.bf16.msra.mxu0 %v9465_v49  ;;  %v9547_v49 = vld [vmem:[#allocation5 + $0x148] ss:$40 sps:$4 sm:$0xff]  }
  0xcf   :  { %6150 = vmatpush1.bf16.msra.mxu1 %v9468_v50  ;;  %6110 = vmatprep.subr.bf16.mxu0 %v9473_v52  ;;  %v9550_v50 = vld [vmem:[#allocation5 + $0x648] ss:$40 sps:$4 sm:$0xff]   ;;  %v9555_v52 = vld [vmem:[#allocation5 + $0xfc] ss:$40 sps:$4 sm:$0xff]  }
  0xd0   :  { %6151 = vmatprep.subr.bf16.mxu1 %v9476_v53  ;;  %v9558_v53 = vld [vmem:[#allocation5 + $0x5fc] ss:$40 sps:$4 sm:$0xff]  }
  0xd2   :  { %6111 = vmatpush1.bf16.msra.mxu0 %v9471_v54  ;;  %v9553_v54 = vld [vmem:[#allocation5 + $0xf8] ss:$40 sps:$4 sm:$0xff]  }
  0xd3   :  { %6152 = vmatpush1.bf16.msra.mxu1 %v9474_v55  ;;  %6112 = vmatprep.subr.bf16.mxu0 %v9479_v56  ;;  %v9556_v55 = vld [vmem:[#allocation5 + $0x5f8] ss:$40 sps:$4 sm:$0xff]   ;;  %v9561_v56 = vld [vmem:[#allocation5 + $0xac] ss:$40 sps:$4 sm:$0xff]  }
  0xd4   :  { %6153 = vmatprep.subr.bf16.mxu1 %v9482_v57  ;;  %v9564_v57 = vld [vmem:[#allocation5 + $0x5ac] ss:$40 sps:$4 sm:$0xff]  }
  0xd6   :  { %6113 = vmatpush2.bf16.msra.mxu0 %v9477_v58  ;;  %v9559_v58 = vld [vmem:[#allocation5 + $0xa8] ss:$40 sps:$4 sm:$0xff]  }
  0xd7   :  { %6154 = vmatpush2.bf16.msra.mxu1 %v9480_v59  ;;  %6114 = vmatprep.subr.bf16.mxu0 %v9485_v60  ;;  %v9562_v59 = vld [vmem:[#allocation5 + $0x5a8] ss:$40 sps:$4 sm:$0xff]   ;;  %v9567_v60 = vld [vmem:[#allocation5 + $0x5c] ss:$40 sps:$4 sm:$0xff]  }
  0xd8   :  { %6155 = vmatprep.subr.bf16.mxu1 %v9488_v61  ;;  %v9570_v61 = vld [vmem:[#allocation5 + $0x55c] ss:$40 sps:$4 sm:$0xff]  }
  0xda   :  { %6115 = vmatpush2.bf16.msra.mxu0 %v9483_v62  ;;  %v9565_v62 = vld [vmem:[#allocation5 + $0x58] ss:$40 sps:$4 sm:$0xff]  }
  0xdb   :  { %6156 = vmatpush2.bf16.msra.mxu1 %v9486_v63  ;;  %6116 = vmatprep.subr.bf16.mxu0 %v9491_v0  ;;  %v9568_v63 = vld [vmem:[#allocation5 + $0x558] ss:$40 sps:$4 sm:$0xff]   ;;  %v9573_v0 = vld [vmem:[#allocation5 + $0xc] ss:$40 sps:$4 sm:$0xff]  }
  0xdc   :  { %6157 = vmatprep.subr.bf16.mxu1 %v9494_v1  ;;  %v9576_v1 = vld [vmem:[#allocation5 + $0x50c] ss:$40 sps:$4 sm:$0xff]  }
  0xde   :  { %6117 = vmatpush2.bf16.msra.mxu0 %v9489_v2  ;;  %v9571_v2 = vld [vmem:[#allocation5 + $0x8] ss:$40 sps:$4 sm:$0xff]  }
  0xdf   :  { %6158 = vmatpush2.bf16.msra.mxu1 %v9492_v3  ;;  %6118 = vmatprep.subr.bf16.mxu0 %v9497_v4  ;;  %v9574_v3 = vld [vmem:[#allocation5 + $0x508] ss:$40 sps:$4 sm:$0xff]   ;;  %v9579_v4 = vld [vmem:[#allocation5 + $0x4bc] ss:$40 sps:$4 sm:$0xff]  }
  0xe0   :  { %6159 = vmatprep.subr.bf16.mxu1 %v9500_v5  ;;  %v9582_v5 = vld [vmem:[#allocation5 + $0x9bc] ss:$40 sps:$4 sm:$0xff]  }
  0xe2   :  { %6119 = vmatpush2.bf16.msra.mxu0 %v9495_v8  ;;  %v9577_v8 = vld [vmem:[#allocation5 + $0x4b8] ss:$40 sps:$4 sm:$0xff]  }
  0xe3   :  { %6160 = vmatpush2.bf16.msra.mxu1 %v9498_v9  ;;  %6120 = vmatprep.subr.bf16.mxu0 %v9503_v10  ;;  %v9580_v9 = vld [vmem:[#allocation5 + $0x9b8] ss:$40 sps:$4 sm:$0xff]   ;;  %v9585_v10 = vld [vmem:[#allocation5 + $0x46c] ss:$40 sps:$4 sm:$0xff]  }
  0xe4   :  { %6161 = vmatprep.subr.bf16.mxu1 %v9506_v11  ;;  %v9588_v11 = vld [vmem:[#allocation5 + $0x96c] ss:$40 sps:$4 sm:$0xff]  }
  0xe6   :  { %6121 = vmatpush2.bf16.msra.mxu0 %v9501_v12  ;;  %v9583_v12 = vld [vmem:[#allocation5 + $0x468] ss:$40 sps:$4 sm:$0xff]  }
  0xe7   :  { %6162 = vmatpush2.bf16.msra.mxu1 %v9504_v13  ;;  %6122 = vmatprep.subr.bf16.mxu0 %v9509_v14  ;;  %v9586_v13 = vld [vmem:[#allocation5 + $0x968] ss:$40 sps:$4 sm:$0xff]   ;;  %v9591_v14 = vld [vmem:[#allocation5 + $0x41c] ss:$40 sps:$4 sm:$0xff]  }
  0xe8   :  { %6163 = vmatprep.subr.bf16.mxu1 %v9512_v15  ;;  %v9594_v15 = vld [vmem:[#allocation5 + $0x91c] ss:$40 sps:$4 sm:$0xff]  }
  0xea   :  { %6123 = vmatpush2.bf16.msra.mxu0 %v9507_v18  ;;  %v9589_v18 = vld [vmem:[#allocation5 + $0x418] ss:$40 sps:$4 sm:$0xff]  }
  0xeb   :  { %6164 = vmatpush2.bf16.msra.mxu1 %v9510_v19  ;;  %6124 = vmatprep.subr.bf16.mxu0 %v9515_v20  ;;  %v9592_v19 = vld [vmem:[#allocation5 + $0x918] ss:$40 sps:$4 sm:$0xff]   ;;  %v9597_v20 = vld [vmem:[#allocation5 + $0x3cc] ss:$40 sps:$4 sm:$0xff]  }
  0xec   :  { %6165 = vmatprep.subr.bf16.mxu1 %v9518_v21  ;;  %v9600_v21 = vld [vmem:[#allocation5 + $0x8cc] ss:$40 sps:$4 sm:$0xff]  }
  0xee   :  { %6125 = vmatpush2.bf16.msra.mxu0 %v9513_v26  ;;  %v9595_v26 = vld [vmem:[#allocation5 + $0x3c8] ss:$40 sps:$4 sm:$0xff]  }
  0xef   :  { %6166 = vmatpush2.bf16.msra.mxu1 %v9516_v27  ;;  %6126 = vmatprep.subr.bf16.mxu0 %v9521_v28  ;;  %v9598_v27 = vld [vmem:[#allocation5 + $0x8c8] ss:$40 sps:$4 sm:$0xff]   ;;  %v9603_v28 = vld [vmem:[#allocation5 + $0x37c] ss:$40 sps:$4 sm:$0xff]  }
  0xf0   :  { %6167 = vmatprep.subr.bf16.mxu1 %v9524_v29  ;;  %v9606_v29 = vld [vmem:[#allocation5 + $0x87c] ss:$40 sps:$4 sm:$0xff]  }
  0xf2   :  { %6127 = vmatpush2.bf16.msra.mxu0 %v9519_v30  ;;  %v9601_v30 = vld [vmem:[#allocation5 + $0x378] ss:$40 sps:$4 sm:$0xff]  }
  0xf3   :  { %6168 = vmatpush2.bf16.msra.mxu1 %v9522_v31  ;;  %6178 = vmatprep.subr.bf16.mxu0 %v9531_v32  ;;  %v9604_v31 = vld [vmem:[#allocation5 + $0x878] ss:$40 sps:$4 sm:$0xff]   ;;  %v9609_v32 = vld [vmem:[#allocation5 + $0x32c] ss:$40 sps:$4 sm:$0xff]  }
  0xf4   :  { %6219 = vmatprep.subr.bf16.mxu1 %v9534_v33  ;;  %v9612_v33 = vld [vmem:[#allocation5 + $0x82c] ss:$40 sps:$4 sm:$0xff]  }
  0xf5   :  { %6129 = vmatmul.mubr.bf16.vlgmr.msra.gmra.mxu0 %v10971_v34 }
  0xf6   :  { %6170 = vmatmul.mubr.bf16.vlgmr.msra.gmra.mxu1 %v10975_v35  ;;  %6179 = vmatpush1.bf16.msra.mxu0 %v9529_v38  ;;  %v9607_v38 = vld [vmem:[#allocation5 + $0x328] ss:$40 sps:$4 sm:$0xff]  }
  0xf7   :  { %6220 = vmatpush1.bf16.msra.mxu1 %v9532_v39  ;;  %6180 = vmatprep.subr.bf16.mxu0 %v9537_v40  ;;  %v9610_v39 = vld [vmem:[#allocation5 + $0x828] ss:$40 sps:$4 sm:$0xff]   ;;  %v9615_v40 = vld [vmem:[#allocation5 + $0x2dc] ss:$40 sps:$4 sm:$0xff]  }
  0xf8   :  { %6221 = vmatprep.subr.bf16.mxu1 %v9540_v41  ;;  %6210 = vmatprep.mubr.bf16.mxu0 %v10919_v47  ;;  %v1040_v41 = vlaneseq }
  0xf9   :  { %6251 = vmatprep.mubr.bf16.mxu1 %v10921_v51 }
  0xfa   :  { %6181 = vmatpush1.bf16.msra.mxu0 %v9535_v42  ;;  %v9618_v42 = vld [vmem:[#allocation5 + $0x7dc] ss:$40 sps:$4 sm:$0xff]  }
  0xfb   :  { %6222 = vmatpush1.bf16.msra.mxu1 %v9538_v22  ;;  %6182 = vmatprep.subr.bf16.mxu0 %v9543_v43  ;;  %v9613_v22 = vld [vmem:[#allocation5 + $0x2d8] ss:$40 sps:$4 sm:$0xff]  }
  0xfc   :  { %6223 = vmatprep.subr.bf16.mxu1 %v9546_v23  ;;  %v9616_v43 = vld [vmem:[#allocation5 + $0x7d8] ss:$40 sps:$4 sm:$0xff]   ;;  %v9621_v23 = vld [vmem:[#allocation5 + $0x28c] ss:$40 sps:$4 sm:$0xff]  }
  0xfe   :  { %6183 = vmatpush1.bf16.msra.mxu0 %v9541_v44  ;;  %v10981_v44 = vshrl.u32 %v1040_v41, 7  ;;  %v9661_v41 = vld [vmem:[#allocation5 + $0xa58] ss:$40 sps:$4 sm:$0xff]  }
  0xff   :  { %6224 = vmatpush1.bf16.msra.mxu1 %v9544_v45  ;;  %6184 = vmatprep.subr.bf16.mxu0 %v9549_v46  ;;  %v9624_v45 = vld [vmem:[#allocation5 + $0x78c] ss:$40 sps:$4 sm:$0xff]   ;;  %v9619_v46 = vld [vmem:[#allocation5 + $0x288] ss:$40 sps:$4 sm:$0xff]  }
 0x100   :  { %6225 = vmatprep.subr.bf16.mxu1 %v9552_v48  ;;  %v9622_v48 = vld [vmem:[#allocation5 + $0x788] ss:$40 sps:$4 sm:$0xff]  }
 0x102   :  { %6185 = vmatpush1.bf16.msra.mxu0 %v9547_v49  ;;  %v1036_v49 = vld [vmem:[#allocation7] sm:$0xff] }
 0x103   :  { %6226 = vmatpush1.bf16.msra.mxu1 %v9550_v50  ;;  %6186 = vmatprep.subr.bf16.mxu0 %v9555_v52  ;;  %v1042_v50 = vsub.s32 0, %v10981_v44  ;;  %v9627_v52 = vld [vmem:[#allocation5 + $0xc3c] ss:$40 sps:$4 sm:$0xff]  }
 0x104   :  { %6227 = vmatprep.subr.bf16.mxu1 %v9558_v53  ;;  %v9630_v53 = vld [vmem:[#allocation5 + $0x113c] ss:$40 sps:$4 sm:$0xff]  }
 0x106   :  { %6187 = vmatpush1.bf16.msra.mxu0 %v9553_v54  ;;  %v1046_v54 = vsub.s32 1, %v10981_v44 }
 0x107   :  { %6228 = vmatpush1.bf16.msra.mxu1 %v9556_v55  ;;  %6188 = vmatprep.subr.bf16.mxu0 %v9561_v56  ;;  %v9625_v55 = vld [vmem:[#allocation5 + $0xc38] ss:$40 sps:$4 sm:$0xff]   ;;  %v1043_v56 = vrot.slane %v1036_v49, %v1042_v50 }
 0x108   :  { %6229 = vmatprep.subr.bf16.mxu1 %v9564_v57  ;;  %v9628_v57 = vld [vmem:[#allocation5 + $0x1138] ss:$40 sps:$4 sm:$0xff]  }
 0x10a   :  { %6189 = vmatpush1.bf16.msra.mxu0 %v9559_v58  ;;  %v9633_v58 = vld [vmem:[#allocation5 + $0xbec] ss:$40 sps:$4 sm:$0xff]  }
 0x10b   :  { %6230 = vmatpush1.bf16.msra.mxu1 %v9562_v59  ;;  %6190 = vmatprep.subr.bf16.mxu0 %v9567_v60  ;;  %v9636_v59 = vld [vmem:[#allocation5 + $0x10ec] ss:$40 sps:$4 sm:$0xff]   ;;  %v1047_v60 = vrot.slane %v1036_v49, %v1046_v54  ;;  %v9673_v49 = vld [vmem:[#allocation5 + $0xeb8] ss:$40 sps:$4 sm:$0xff]  }
 0x10c   :  { %6231 = vmatprep.subr.bf16.mxu1 %v9570_v61 }
 0x10e   :  { %6191 = vmatpush1.bf16.msra.mxu0 %v9565_v62 }
 0x10f   :  { %6232 = vmatpush1.bf16.msra.mxu1 %v9568_v63  ;;  %6192 = vmatprep.subr.bf16.mxu0 %v9573_v0  ;;  %v9631_v63 = vld [vmem:[#allocation5 + $0xbe8] ss:$40 sps:$4 sm:$0xff]  }
 0x110   :  { %6233 = vmatprep.subr.bf16.mxu1 %v9576_v1  ;;  %v9634_v1 = vld [vmem:[#allocation5 + $0x10e8] ss:$40 sps:$4 sm:$0xff]  }
 0x112   :  { %6193 = vmatpush1.bf16.msra.mxu0 %v9571_v2  ;;  %v9639_v2 = vld [vmem:[#allocation5 + $0xb9c] ss:$40 sps:$4 sm:$0xff]  }
 0x113   :  { %6234 = vmatpush1.bf16.msra.mxu1 %v9574_v3  ;;  %6194 = vmatprep.subr.bf16.mxu0 %v9579_v4 }
 0x114   :  { %6235 = vmatprep.subr.bf16.mxu1 %v9582_v5  ;;  %v9642_v5 = vld [vmem:[#allocation5 + $0x109c] ss:$40 sps:$4 sm:$0xff]  }
 0x116   :  { %6195 = vmatpush2.bf16.msra.mxu0 %v9577_v8 }
 0x117   :  { %6236 = vmatpush2.bf16.msra.mxu1 %v9580_v9  ;;  %6196 = vmatprep.subr.bf16.mxu0 %v9585_v10 }
 0x118   :  { %6237 = vmatprep.subr.bf16.mxu1 %v9588_v11 }
 0x11a   :  { %6197 = vmatpush2.bf16.msra.mxu0 %v9583_v12  ;;  %v9637_v12 = vld [vmem:[#allocation5 + $0xb98] ss:$40 sps:$4 sm:$0xff]  }
 0x11b   :  { %6238 = vmatpush2.bf16.msra.mxu1 %v9586_v13  ;;  %6198 = vmatprep.subr.bf16.mxu0 %v9591_v14  ;;  %v9640_v13 = vld [vmem:[#allocation5 + $0x1098] ss:$40 sps:$4 sm:$0xff]  }
 0x11c   :  { %6239 = vmatprep.subr.bf16.mxu1 %v9594_v15 }
 0x11e   :  { %6199 = vmatpush2.bf16.msra.mxu0 %v9589_v18 }
 0x11f   :  { %6240 = vmatpush2.bf16.msra.mxu1 %v9592_v19  ;;  %6200 = vmatprep.subr.bf16.mxu0 %v9597_v20  ;;  %v9645_v19 = vld [vmem:[#allocation5 + $0xb4c] ss:$40 sps:$4 sm:$0xff]  }
 0x120   :  { %6241 = vmatprep.subr.bf16.mxu1 %v9600_v21  ;;  %v9648_v20 = vld [vmem:[#allocation5 + $0x104c] ss:$40 sps:$4 sm:$0xff]   ;;  %v9643_v21 = vld [vmem:[#allocation5 + $0xb48] ss:$40 sps:$4 sm:$0xff]  }
 0x122   :  { %6201 = vmatpush2.bf16.msra.mxu0 %v9595_v26  ;;  %v9646_v26 = vld [vmem:[#allocation5 + $0x1048] ss:$40 sps:$4 sm:$0xff]  }
 0x123   :  { %6242 = vmatpush2.bf16.msra.mxu1 %v9598_v27  ;;  %6202 = vmatprep.subr.bf16.mxu0 %v9603_v28  ;;  %v9651_v27 = vld [vmem:[#allocation5 + $0xafc] ss:$40 sps:$4 sm:$0xff]  }
 0x124   :  { %6243 = vmatprep.subr.bf16.mxu1 %v9606_v29  ;;  %v9654_v28 = vld [vmem:[#allocation5 + $0xffc] ss:$40 sps:$4 sm:$0xff]   ;;  %v9649_v29 = vld [vmem:[#allocation5 + $0xaf8] ss:$40 sps:$4 sm:$0xff]  }
 0x126   :  { %6203 = vmatpush2.bf16.msra.mxu0 %v9601_v30  ;;  %v9652_v30 = vld [vmem:[#allocation5 + $0xff8] ss:$40 sps:$4 sm:$0xff]  }
 0x127   :  { %6244 = vmatpush2.bf16.msra.mxu1 %v9604_v31  ;;  %6204 = vmatprep.subr.bf16.mxu0 %v9609_v32  ;;  %v9657_v31 = vld [vmem:[#allocation5 + $0xaac] ss:$40 sps:$4 sm:$0xff]  }
 0x128   :  { %6245 = vmatprep.subr.bf16.mxu1 %v9612_v33  ;;  %v9660_v32 = vld [vmem:[#allocation5 + $0xfac] ss:$40 sps:$4 sm:$0xff]   ;;  %v9655_v33 = vld [vmem:[#allocation5 + $0xaa8] ss:$40 sps:$4 sm:$0xff]  }
 0x12a   :  { %6205 = vmatpush2.bf16.msra.mxu0 %v9607_v38  ;;  %v9658_v38 = vld [vmem:[#allocation5 + $0xfa8] ss:$40 sps:$4 sm:$0xff]  }
 0x12b   :  { %6246 = vmatpush2.bf16.msra.mxu1 %v9610_v39  ;;  %6206 = vmatprep.subr.bf16.mxu0 %v9615_v40  ;;  %v9663_v39 = vld [vmem:[#allocation5 + $0xa5c] ss:$40 sps:$4 sm:$0xff]  }
 0x12c   :  { %6247 = vmatprep.subr.bf16.mxu1 %v9618_v42  ;;  %v9666_v40 = vld [vmem:[#allocation5 + $0xf5c] ss:$40 sps:$4 sm:$0xff]   ;;  %v9664_v42 = vld [vmem:[#allocation5 + $0xf58] ss:$40 sps:$4 sm:$0xff]  }
 0x12e   :  { %6207 = vmatpush2.bf16.msra.mxu0 %v9613_v22  ;;  %v9669_v22 = vld [vmem:[#allocation5 + $0xa0c] ss:$40 sps:$4 sm:$0xff]  }
 0x12f   :  { %6248 = vmatpush2.bf16.msra.mxu1 %v9616_v43  ;;  %6208 = vmatprep.subr.bf16.mxu0 %v9621_v23  ;;  %v9672_v43 = vld [vmem:[#allocation5 + $0xf0c] ss:$40 sps:$4 sm:$0xff]   ;;  %v9667_v23 = vld [vmem:[#allocation5 + $0xa08] ss:$40 sps:$4 sm:$0xff]  }
 0x130   :  { %6249 = vmatprep.subr.bf16.mxu1 %v9624_v45  ;;  %v9670_v45 = vld [vmem:[#allocation5 + $0xf08] ss:$40 sps:$4 sm:$0xff]  }
 0x132   :  { %6209 = vmatpush2.bf16.msra.mxu0 %v9619_v46  ;;  %v9675_v46 = vld [vmem:[#allocation5 + $0xebc] ss:$40 sps:$4 sm:$0xff]  }
 0x133   :  { %6250 = vmatpush2.bf16.msra.mxu1 %v9622_v48  ;;  %6260 = vmatprep.subr.bf16.mxu0 %v9627_v52  ;;  %v9678_v48 = vld [vmem:[#allocation5 + $0x13bc] ss:$40 sps:$4 sm:$0xff]   ;;  %v9676_v52 = vld [vmem:[#allocation5 + $0x13b8] ss:$40 sps:$4 sm:$0xff]  }
 0x134   :  { %6301 = vmatprep.subr.bf16.mxu1 %v9630_v53  ;;  %v9681_v53 = vld [vmem:[#allocation5 + $0xe6c] ss:$40 sps:$4 sm:$0xff]  }
 0x135   :  { %v5966_v61 = vpop.f32.mrf.mxu0  ;;  %6211 = vmatmul.mubr.bf16.vlgmr.msra.gmra.mxu0 %v10925_v6 }
 0x136   :  { %v6007_v62 = vpop.f32.mrf.mxu1  ;;  %6252 = vmatmul.mubr.bf16.vlgmr.msra.gmra.mxu1 %v10927_v7  ;;  %v5967_v0 = vadd.f32 %v5966_v61, %v1043_v56  ;;  %6261 = vmatpush1.bf16.msra.mxu0 %v9625_v55  ;;  %v9684_v55 = vld [vmem:[#allocation5 + $0x136c] ss:$40 sps:$4 sm:$0xff]   ;;  %v9679_v56 = vld [vmem:[#allocation5 + $0xe68] ss:$40 sps:$4 sm:$0xff]   ;;  %v9688_v61 = vld [vmem:[#allocation5 + $0x1318] ss:$40 sps:$4 sm:$0xff]  }
 0x137   :  { %6302 = vmatpush1.bf16.msra.mxu1 %v9628_v57  ;;  %v5968_v3 = vpop.f32.mrf.mxu0  ;;  %6262 = vmatprep.subr.bf16.mxu0 %v9633_v58  ;;  %v9682_v57 = vld [vmem:[#allocation5 + $0x1368] ss:$40 sps:$4 sm:$0xff]   ;;  %v9687_v58 = vld [vmem:[#allocation5 + $0xe1c] ss:$40 sps:$4 sm:$0xff]  }
 0x138   :  { %v6009_v4 = vpop.f32.mrf.mxu1  ;;  %6303 = vmatprep.subr.bf16.mxu1 %v9636_v59  ;;  %v10991_v8 = vadd.f32 %v6007_v62, %v5967_v0  ;;  %v5969_v9 = vadd.f32 %v5968_v3, %v1047_v60  ;;  %6292 = vmatprep.mubr.bf16.mxu0 %v10937_v36  ;;  %v9690_v59 = vld [vmem:[#allocation5 + $0x131c] ss:$40 sps:$4 sm:$0xff]   ;;  %v9685_v60 = vld [vmem:[#allocation5 + $0xe18] ss:$40 sps:$4 sm:$0xff]   ;;  %v9693_v62 = vld [vmem:[#allocation5 + $0xdcc] ss:$40 sps:$4 sm:$0xff]  }
 0x139   :  { %6333 = vmatprep.mubr.bf16.mxu1 %v10941_v37  ;;  %v5970_v10 = vpop.f32.mrf.mxu0  ;;  %v9691_v0 = vld [vmem:[#allocation5 + $0xdc8] ss:$40 sps:$4 sm:$0xff]   ;;  %v9702_v3 = vld [vmem:[#allocation5 + $0x127c] ss:$40 sps:$4 sm:$0xff]  }
 0x13a   :  { %v6011_v11 = vpop.f32.mrf.mxu1  ;;  %v10995_v14 = vadd.f32 %v6009_v4, %v5969_v9  ;;  %6263 = vmatpush1.bf16.msra.mxu0 %v9631_v63  ;;  %v9696_v63 = vld [vmem:[#allocation5 + $0x12cc] ss:$40 sps:$4 sm:$0xff]   ;;  %v9697_v4 = vld [vmem:[#allocation5 + $0xd78] ss:$40 sps:$4 sm:$0xff]  }
 0x13b   :  { %6304 = vmatpush1.bf16.msra.mxu1 %v9634_v1  ;;  %v5971_v15 = vpop.f32.mrf.mxu0  ;;  %6264 = vmatprep.subr.bf16.mxu0 %v9639_v2  ;;  %v9694_v1 = vld [vmem:[#allocation5 + $0x12c8] ss:$40 sps:$4 sm:$0xff]   ;;  %v9699_v2 = vld [vmem:[#allocation5 + $0xd7c] ss:$40 sps:$4 sm:$0xff]   ;;  %v9705_v9 = vld [vmem:[#allocation5 + $0xd2c] ss:$40 sps:$4 sm:$0xff]  }
 0x13c   :  { %v6012_v18 = vpop.f32.mrf.mxu1  ;;  %6305 = vmatprep.subr.bf16.mxu1 %v9642_v5  ;;  %v9700_v5 = vld [vmem:[#allocation5 + $0x1278] ss:$40 sps:$4 sm:$0xff]   ;;  %v9708_v10 = vld [vmem:[#allocation5 + $0x122c] ss:$40 sps:$4 sm:$0xff]   ;;  %v9703_v11 = vld [vmem:[#allocation5 + $0xd28] ss:$40 sps:$4 sm:$0xff]  }
 0x13d   :  { %v9714_v15 = vld [vmem:[#allocation5 + $0x11dc] ss:$40 sps:$4 sm:$0xff]   ;;  %v9709_v18 = vld [vmem:[#allocation5 + $0xcd8] ss:$40 sps:$4 sm:$0xff]  }
 0x13e   :  { %6265 = vmatpush1.bf16.msra.mxu0 %v9637_v12  ;;  %v9706_v12 = vld [vmem:[#allocation5 + $0x1228] ss:$40 sps:$4 sm:$0xff]  }
 0x13f   :  { %6306 = vmatpush1.bf16.msra.mxu1 %v9640_v13  ;;  %6266 = vmatprep.subr.bf16.mxu0 %v9645_v19  ;;  %v9711_v13 = vld [vmem:[#allocation5 + $0xcdc] ss:$40 sps:$4 sm:$0xff]   ;;  %v9712_v19 = vld [vmem:[#allocation5 + $0x11d8] ss:$40 sps:$4 sm:$0xff]  }
 0x140   :  { %6307 = vmatprep.subr.bf16.mxu1 %v9648_v20  ;;  %v9717_v20 = vld [vmem:[#allocation5 + $0xc8c] ss:$40 sps:$4 sm:$0xff]  }
 0x142   :  { %6267 = vmatpush1.bf16.msra.mxu0 %v9643_v21  ;;  %v9720_v21 = vld [vmem:[#allocation5 + $0x118c] ss:$40 sps:$4 sm:$0xff]  }
 0x143   :  { %6308 = vmatpush1.bf16.msra.mxu1 %v9646_v26  ;;  %6268 = vmatprep.subr.bf16.mxu0 %v9651_v27  ;;  %v9715_v26 = vld [vmem:[#allocation5 + $0xc88] ss:$40 sps:$4 sm:$0xff]  }
 0x144   :  { %6309 = vmatprep.subr.bf16.mxu1 %v9654_v28  ;;  %v9718_v27 = vld [vmem:[#allocation5 + $0x1188] ss:$40 sps:$4 sm:$0xff]   ;;  %v9723_v28 = vld [vmem:[#allocation5 + $0x163c] ss:$40 sps:$4 sm:$0xff]  }
 0x146   :  { %6269 = vmatpush1.bf16.msra.mxu0 %v9649_v29  ;;  %v9726_v29 = vld [vmem:[#allocation5 + $0x1b3c] ss:$40 sps:$4 sm:$0xff]  }
 0x147   :  { %6310 = vmatpush1.bf16.msra.mxu1 %v9652_v30  ;;  %6270 = vmatprep.subr.bf16.mxu0 %v9657_v31  ;;  %v9721_v30 = vld [vmem:[#allocation5 + $0x1638] ss:$40 sps:$4 sm:$0xff]  }
 0x148   :  { %6311 = vmatprep.subr.bf16.mxu1 %v9660_v32  ;;  %v9724_v31 = vld [vmem:[#allocation5 + $0x1b38] ss:$40 sps:$4 sm:$0xff]   ;;  %v9729_v32 = vld [vmem:[#allocation5 + $0x15ec] ss:$40 sps:$4 sm:$0xff]  }
 0x14a   :  { %6271 = vmatpush1.bf16.msra.mxu0 %v9655_v33  ;;  %v9732_v33 = vld [vmem:[#allocation5 + $0x1aec] ss:$40 sps:$4 sm:$0xff]  }
 0x14b   :  { %6312 = vmatpush1.bf16.msra.mxu1 %v9658_v38  ;;  %6272 = vmatprep.subr.bf16.mxu0 %v9663_v39  ;;  %v9727_v38 = vld [vmem:[#allocation5 + $0x15e8] ss:$40 sps:$4 sm:$0xff]  }
 0x14c   :  { %6313 = vmatprep.subr.bf16.mxu1 %v9666_v40  ;;  %v9730_v39 = vld [vmem:[#allocation5 + $0x1ae8] ss:$40 sps:$4 sm:$0xff]  }
 0x14e   :  { %6273 = vmatpush1.bf16.msra.mxu0 %v9661_v41 }
 0x14f   :  { %6314 = vmatpush1.bf16.msra.mxu1 %v9664_v42  ;;  %6274 = vmatprep.subr.bf16.mxu0 %v9669_v22 }
 0x150   :  { %6315 = vmatprep.subr.bf16.mxu1 %v9672_v43 }
 0x152   :  { %6275 = vmatpush1.bf16.msra.mxu0 %v9667_v23  ;;  %v9735_v23 = vld [vmem:[#allocation5 + $0x159c] ss:$40 sps:$4 sm:$0xff]  }
 0x153   :  { %6316 = vmatpush1.bf16.msra.mxu1 %v9670_v45  ;;  %6276 = vmatprep.subr.bf16.mxu0 %v9675_v46  ;;  %v9738_v45 = vld [vmem:[#allocation5 + $0x1a9c] ss:$40 sps:$4 sm:$0xff]  }
 0x154   :  { %6317 = vmatprep.subr.bf16.mxu1 %v9678_v48 }
 0x156   :  { %6277 = vmatpush2.bf16.msra.mxu0 %v9673_v49  ;;  %v9733_v49 = vld [vmem:[#allocation5 + $0x1598] ss:$40 sps:$4 sm:$0xff]  }
 0x157   :  { %6318 = vmatpush2.bf16.msra.mxu1 %v9676_v52  ;;  %6278 = vmatprep.subr.bf16.mxu0 %v9681_v53  ;;  %v9736_v52 = vld [vmem:[#allocation5 + $0x1a98] ss:$40 sps:$4 sm:$0xff]  }
 0x158   :  { %6319 = vmatprep.subr.bf16.mxu1 %v9684_v55 }
 0x15a   :  { %6279 = vmatpush2.bf16.msra.mxu0 %v9679_v56 }
 0x15b   :  { %6320 = vmatpush2.bf16.msra.mxu1 %v9682_v57  ;;  %6280 = vmatprep.subr.bf16.mxu0 %v9687_v58  ;;  %v9741_v58 = vld [vmem:[#allocation5 + $0x154c] ss:$40 sps:$4 sm:$0xff]  }
 0x15c   :  { %6321 = vmatprep.subr.bf16.mxu1 %v9690_v59  ;;  %v9744_v59 = vld [vmem:[#allocation5 + $0x1a4c] ss:$40 sps:$4 sm:$0xff]  }
 0x15e   :  { %6281 = vmatpush2.bf16.msra.mxu0 %v9685_v60  ;;  %v9742_v60 = vld [vmem:[#allocation5 + $0x1a48] ss:$40 sps:$4 sm:$0xff]  }
 0x15f   :  { %6322 = vmatpush2.bf16.msra.mxu1 %v9688_v61  ;;  %6282 = vmatprep.subr.bf16.mxu0 %v9693_v62  ;;  %v9747_v61 = vld [vmem:[#allocation5 + $0x14fc] ss:$40 sps:$4 sm:$0xff]  }
 0x160   :  { %6323 = vmatprep.subr.bf16.mxu1 %v9696_v63  ;;  %v9750_v62 = vld [vmem:[#allocation5 + $0x19fc] ss:$40 sps:$4 sm:$0xff]   ;;  %v9745_v63 = vld [vmem:[#allocation5 + $0x14f8] ss:$40 sps:$4 sm:$0xff]  }
 0x162   :  { %6283 = vmatpush2.bf16.msra.mxu0 %v9691_v0  ;;  %v9748_v0 = vld [vmem:[#allocation5 + $0x19f8] ss:$40 sps:$4 sm:$0xff]  }
 0x163   :  { %6324 = vmatpush2.bf16.msra.mxu1 %v9694_v1  ;;  %6284 = vmatprep.subr.bf16.mxu0 %v9699_v2  ;;  %v9753_v1 = vld [vmem:[#allocation5 + $0x14ac] ss:$40 sps:$4 sm:$0xff]  }
 0x164   :  { %6325 = vmatprep.subr.bf16.mxu1 %v9702_v3  ;;  %v9756_v2 = vld [vmem:[#allocation5 + $0x19ac] ss:$40 sps:$4 sm:$0xff]   ;;  %v9751_v3 = vld [vmem:[#allocation5 + $0x14a8] ss:$40 sps:$4 sm:$0xff]  }
 0x166   :  { %6285 = vmatpush2.bf16.msra.mxu0 %v9697_v4  ;;  %v9754_v4 = vld [vmem:[#allocation5 + $0x19a8] ss:$40 sps:$4 sm:$0xff]  }
 0x167   :  { %6326 = vmatpush2.bf16.msra.mxu1 %v9700_v5  ;;  %6286 = vmatprep.subr.bf16.mxu0 %v9705_v9  ;;  %v9759_v5 = vld [vmem:[#allocation5 + $0x145c] ss:$40 sps:$4 sm:$0xff]  }
 0x168   :  { %6327 = vmatprep.subr.bf16.mxu1 %v9708_v10  ;;  %v9762_v9 = vld [vmem:[#allocation5 + $0x195c] ss:$40 sps:$4 sm:$0xff]   ;;  %v9757_v10 = vld [vmem:[#allocation5 + $0x1458] ss:$40 sps:$4 sm:$0xff]  }
 0x16a   :  { %6287 = vmatpush2.bf16.msra.mxu0 %v9703_v11  ;;  %v9760_v11 = vld [vmem:[#allocation5 + $0x1958] ss:$40 sps:$4 sm:$0xff]  }
 0x16b   :  { %6328 = vmatpush2.bf16.msra.mxu1 %v9706_v12  ;;  %6288 = vmatprep.subr.bf16.mxu0 %v9711_v13  ;;  %v9765_v12 = vld [vmem:[#allocation5 + $0x140c] ss:$40 sps:$4 sm:$0xff]  }
 0x16c   :  { %6329 = vmatprep.subr.bf16.mxu1 %v9714_v15  ;;  %v9768_v13 = vld [vmem:[#allocation5 + $0x190c] ss:$40 sps:$4 sm:$0xff]   ;;  %v9763_v15 = vld [vmem:[#allocation5 + $0x1408] ss:$40 sps:$4 sm:$0xff]  }
 0x16e   :  { %6289 = vmatpush2.bf16.msra.mxu0 %v9709_v18  ;;  %v9766_v18 = vld [vmem:[#allocation5 + $0x1908] ss:$40 sps:$4 sm:$0xff]  }
 0x16f   :  { %6330 = vmatpush2.bf16.msra.mxu1 %v9712_v19  ;;  %6290 = vmatprep.subr.bf16.mxu0 %v9717_v20  ;;  %v9771_v19 = vld [vmem:[#allocation5 + $0x18bc] ss:$40 sps:$4 sm:$0xff]  }
 0x170   :  { %6331 = vmatprep.subr.bf16.mxu1 %v9720_v21  ;;  %v9774_v20 = vld [vmem:[#allocation5 + $0x1dbc] ss:$40 sps:$4 sm:$0xff]   ;;  %v9769_v21 = vld [vmem:[#allocation5 + $0x18b8] ss:$40 sps:$4 sm:$0xff]  }
 0x172   :  { %6291 = vmatpush2.bf16.msra.mxu0 %v9715_v26  ;;  %v9772_v26 = vld [vmem:[#allocation5 + $0x1db8] ss:$40 sps:$4 sm:$0xff]  }
 0x173   :  { %6332 = vmatpush2.bf16.msra.mxu1 %v9718_v27  ;;  %6342 = vmatprep.subr.bf16.mxu0 %v9723_v28  ;;  %v9777_v27 = vld [vmem:[#allocation5 + $0x186c] ss:$40 sps:$4 sm:$0xff]  }
 0x174   :  { %6383 = vmatprep.subr.bf16.mxu1 %v9726_v29  ;;  %v9780_v28 = vld [vmem:[#allocation5 + $0x1d6c] ss:$40 sps:$4 sm:$0xff]   ;;  %v9775_v29 = vld [vmem:[#allocation5 + $0x1868] ss:$40 sps:$4 sm:$0xff]  }
 0x175   :  { %v6048_v40 = vpop.f32.mrf.mxu0  ;;  %6293 = vmatmul.mubr.bf16.vlgmr.msra.gmra.mxu0 %v10947_v16 }
 0x176   :  { %v6089_v41 = vpop.f32.mrf.mxu1  ;;  %6334 = vmatmul.mubr.bf16.vlgmr.msra.gmra.mxu1 %v10951_v17  ;;  %v6049_v42 = vadd.f32 %v6048_v40, %v10991_v8  ;;  %6343 = vmatpush1.bf16.msra.mxu0 %v9721_v30  ;;  %v9778_v30 = vld [vmem:[#allocation5 + $0x1d68] ss:$40 sps:$4 sm:$0xff]   ;;  %v9792_v40 = vld [vmem:[#allocation5 + $0x1ccc] ss:$40 sps:$4 sm:$0xff]  }
 0x177   :  { %6384 = vmatpush1.bf16.msra.mxu1 %v9724_v31  ;;  %v6050_v22 = vpop.f32.mrf.mxu0  ;;  %6344 = vmatprep.subr.bf16.mxu0 %v9729_v32  ;;  %v9783_v31 = vld [vmem:[#allocation5 + $0x181c] ss:$40 sps:$4 sm:$0xff]  }
 0x178   :  { %v6091_v43 = vpop.f32.mrf.mxu1  ;;  %6385 = vmatprep.subr.bf16.mxu1 %v9732_v33  ;;  %v11000_v46 = vadd.f32 %v6089_v41, %v6049_v42  ;;  %v6051_v48 = vadd.f32 %v6050_v22, %v10995_v14  ;;  %6374 = vmatprep.mubr.bf16.mxu0 %v10959_v24  ;;  %v9739_v14 = vld [vmem:[#allocation5 + $0x1548] ss:$40 sps:$4 sm:$0xff]   ;;  %v9786_v32 = vld [vmem:[#allocation5 + $0x1d1c] ss:$40 sps:$4 sm:$0xff]   ;;  %v9781_v33 = vld [vmem:[#allocation5 + $0x1818] ss:$40 sps:$4 sm:$0xff]  }
 0x179   :  { %6415 = vmatprep.mubr.bf16.mxu1 %v10963_v25  ;;  %v6052_v53 = vpop.f32.mrf.mxu0  ;;  %v9787_v41 = vld [vmem:[#allocation5 + $0x17c8] ss:$40 sps:$4 sm:$0xff]   ;;  %v9795_v22 = vld [vmem:[#allocation5 + $0x177c] ss:$40 sps:$4 sm:$0xff]  }
 0x17a   :  { %v6093_v8 = vpop.f32.mrf.mxu1  ;;  %v11005_v55 = vadd.f32 %v6091_v43, %v6051_v48  ;;  %6345 = vmatpush1.bf16.msra.mxu0 %v9727_v38  ;;  %v9784_v38 = vld [vmem:[#allocation5 + $0x1d18] ss:$40 sps:$4 sm:$0xff]   ;;  %v9790_v42 = vld [vmem:[#allocation5 + $0x1cc8] ss:$40 sps:$4 sm:$0xff]   ;;  %v9798_v43 = vld [vmem:[#allocation5 + $0x1c7c] ss:$40 sps:$4 sm:$0xff]  }
 0x17b   :  { %6386 = vmatpush1.bf16.msra.mxu1 %v9730_v39  ;;  %v6053_v56 = vpop.f32.mrf.mxu0  ;;  %6346 = vmatprep.subr.bf16.mxu0 %v9735_v23  ;;  %v9789_v39 = vld [vmem:[#allocation5 + $0x17cc] ss:$40 sps:$4 sm:$0xff]   ;;  %v9793_v23 = vld [vmem:[#allocation5 + $0x1778] ss:$40 sps:$4 sm:$0xff]   ;;  %v9802_v53 = vld [vmem:[#allocation5 + $0x1c28] ss:$40 sps:$4 sm:$0xff]  }
 0x17c   :  { %v6094_v57 = vpop.f32.mrf.mxu1  ;;  %6387 = vmatprep.subr.bf16.mxu1 %v9738_v45  ;;  %v9796_v45 = vld [vmem:[#allocation5 + $0x1c78] ss:$40 sps:$4 sm:$0xff]   ;;  %v9801_v48 = vld [vmem:[#allocation5 + $0x172c] ss:$40 sps:$4 sm:$0xff]   ;;  %v9807_v8 = vld [vmem:[#allocation5 + $0x16dc] ss:$40 sps:$4 sm:$0xff]  }
 0x17d   :  { %v9810_v56 = vld [vmem:[#allocation5 + $0x1bdc] ss:$40 sps:$4 sm:$0xff]   ;;  %v9805_v57 = vld [vmem:[#allocation5 + $0x16d8] ss:$40 sps:$4 sm:$0xff]  }
 0x17e   :  { %6347 = vmatpush1.bf16.msra.mxu0 %v9733_v49  ;;  %v9804_v49 = vld [vmem:[#allocation5 + $0x1c2c] ss:$40 sps:$4 sm:$0xff]  }
 0x17f   :  { %6388 = vmatpush1.bf16.msra.mxu1 %v9736_v52  ;;  %6348 = vmatprep.subr.bf16.mxu0 %v9741_v58  ;;  %v9799_v52 = vld [vmem:[#allocation5 + $0x1728] ss:$40 sps:$4 sm:$0xff]   ;;  %v9808_v58 = vld [vmem:[#allocation5 + $0x1bd8] ss:$40 sps:$4 sm:$0xff]  }
 0x180   :  { %6389 = vmatprep.subr.bf16.mxu1 %v9744_v59  ;;  %v9813_v59 = vld [vmem:[#allocation5 + $0x168c] ss:$40 sps:$4 sm:$0xff]  }
 0x182   :  { %6349 = vmatpush1.bf16.msra.mxu0 %v9739_v14  ;;  %v9816_v14 = vld [vmem:[#allocation5 + $0x1b8c] ss:$40 sps:$4 sm:$0xff]  }
 0x183   :  { %6390 = vmatpush1.bf16.msra.mxu1 %v9742_v60  ;;  %6350 = vmatprep.subr.bf16.mxu0 %v9747_v61  ;;  %v9811_v60 = vld [vmem:[#allocation5 + $0x1688] ss:$40 sps:$4 sm:$0xff]  }
 0x184   :  { %6391 = vmatprep.subr.bf16.mxu1 %v9750_v62  ;;  %v9814_v61 = vld [vmem:[#allocation5 + $0x1b88] ss:$40 sps:$4 sm:$0xff]   ;;  %v9819_v62 = vld [vmem:[#allocation5 + $0x244] ss:$40 sps:$4 sm:$0xff]  }
 0x186   :  { %6351 = vmatpush1.bf16.msra.mxu0 %v9745_v63  ;;  %v9822_v63 = vld [vmem:[#allocation5 + $0x744] ss:$40 sps:$4 sm:$0xff]  }
 0x187   :  { %6392 = vmatpush1.bf16.msra.mxu1 %v9748_v0  ;;  %6352 = vmatprep.subr.bf16.mxu0 %v9753_v1  ;;  %v9817_v0 = vld [vmem:[#allocation5 + $0x240] ss:$40 sps:$4 sm:$0xff]  }
 0x188   :  { %6393 = vmatprep.subr.bf16.mxu1 %v9756_v2  ;;  %v9820_v1 = vld [vmem:[#allocation5 + $0x740] ss:$40 sps:$4 sm:$0xff]   ;;  %v9825_v2 = vld [vmem:[#allocation5 + $0x1f4] ss:$40 sps:$4 sm:$0xff]  }
 0x18a   :  { %6353 = vmatpush1.bf16.msra.mxu0 %v9751_v3  ;;  %v9828_v3 = vld [vmem:[#allocation5 + $0x6f4] ss:$40 sps:$4 sm:$0xff]  }
 0x18b   :  { %6394 = vmatpush1.bf16.msra.mxu1 %v9754_v4  ;;  %6354 = vmatprep.subr.bf16.mxu0 %v9759_v5  ;;  %v9823_v4 = vld [vmem:[#allocation5 + $0x1f0] ss:$40 sps:$4 sm:$0xff]  }
 0x18c   :  { %6395 = vmatprep.subr.bf16.mxu1 %v9762_v9  ;;  %v9826_v5 = vld [vmem:[#allocation5 + $0x6f0] ss:$40 sps:$4 sm:$0xff]  }
 0x18e   :  { %6355 = vmatpush1.bf16.msra.mxu0 %v9757_v10 }
 0x18f   :  { %6396 = vmatpush1.bf16.msra.mxu1 %v9760_v11  ;;  %6356 = vmatprep.subr.bf16.mxu0 %v9765_v12 }
 0x190   :  { %6397 = vmatprep.subr.bf16.mxu1 %v9768_v13 }
 0x192   :  { %6357 = vmatpush1.bf16.msra.mxu0 %v9763_v15  ;;  %v9831_v15 = vld [vmem:[#allocation5 + $0x1a4] ss:$40 sps:$4 sm:$0xff]  }
 0x193   :  { %6398 = vmatpush1.bf16.msra.mxu1 %v9766_v18  ;;  %6358 = vmatprep.subr.bf16.mxu0 %v9771_v19  ;;  %v9834_v18 = vld [vmem:[#allocation5 + $0x6a4] ss:$40 sps:$4 sm:$0xff]  }
 0x194   :  { %6399 = vmatprep.subr.bf16.mxu1 %v9774_v20 }
 0x196   :  { %6359 = vmatpush2.bf16.msra.mxu0 %v9769_v21  ;;  %v9829_v21 = vld [vmem:[#allocation5 + $0x1a0] ss:$40 sps:$4 sm:$0xff]  }
 0x197   :  { %6400 = vmatpush2.bf16.msra.mxu1 %v9772_v26  ;;  %6360 = vmatprep.subr.bf16.mxu0 %v9777_v27  ;;  %v9832_v26 = vld [vmem:[#allocation5 + $0x6a0] ss:$40 sps:$4 sm:$0xff]  }
 0x198   :  { %6401 = vmatprep.subr.bf16.mxu1 %v9780_v28 }
 0x19a   :  { %6361 = vmatpush2.bf16.msra.mxu0 %v9775_v29 }
 0x19b   :  { %6402 = vmatpush2.bf16.msra.mxu1 %v9778_v30  ;;  %6362 = vmatprep.subr.bf16.mxu0 %v9783_v31  ;;  %v9837_v31 = vld [vmem:[#allocation5 + $0x154] ss:$40 sps:$4 sm:$0xff]  }
 0x19c   :  { %6403 = vmatprep.subr.bf16.mxu1 %v9786_v32  ;;  %v9840_v32 = vld [vmem:[#allocation5 + $0x654] ss:$40 sps:$4 sm:$0xff]  }
 0x19e   :  { %6363 = vmatpush2.bf16.msra.mxu0 %v9781_v33 }
 0x19f   :  { %6404 = vmatpush2.bf16.msra.mxu1 %v9784_v38  ;;  %6364 = vmatprep.subr.bf16.mxu0 %v9789_v39  ;;  %v9835_v39 = vld [vmem:[#allocation5 + $0x150] ss:$40 sps:$4 sm:$0xff]  }
 0x1a0   :  { %6405 = vmatprep.subr.bf16.mxu1 %v9792_v40  ;;  %v9838_v40 = vld [vmem:[#allocation5 + $0x650] ss:$40 sps:$4 sm:$0xff]  }
 0x1a2   :  { %6365 = vmatpush2.bf16.msra.mxu0 %v9787_v41  ;;  %v9843_v41 = vld [vmem:[#allocation5 + $0x104] ss:$40 sps:$4 sm:$0xff]  }
 0x1a3   :  { %6406 = vmatpush2.bf16.msra.mxu1 %v9790_v42  ;;  %6366 = vmatprep.subr.bf16.mxu0 %v9795_v22  ;;  %v9846_v42 = vld [vmem:[#allocation5 + $0x604] ss:$40 sps:$4 sm:$0xff]   ;;  %v9841_v22 = vld [vmem:[#allocation5 + $0x100] ss:$40 sps:$4 sm:$0xff]  }
 0x1a4   :  { %6407 = vmatprep.subr.bf16.mxu1 %v9798_v43  ;;  %v9844_v43 = vld [vmem:[#allocation5 + $0x600] ss:$40 sps:$4 sm:$0xff]  }
 0x1a6   :  { %6367 = vmatpush2.bf16.msra.mxu0 %v9793_v23  ;;  %v9849_v23 = vld [vmem:[#allocation5 + $0xb4] ss:$40 sps:$4 sm:$0xff]  }
 0x1a7   :  { %6408 = vmatpush2.bf16.msra.mxu1 %v9796_v45  ;;  %6368 = vmatprep.subr.bf16.mxu0 %v9801_v48  ;;  %v9852_v45 = vld [vmem:[#allocation5 + $0x5b4] ss:$40 sps:$4 sm:$0xff]   ;;  %v9847_v48 = vld [vmem:[#allocation5 + $0xb0] ss:$40 sps:$4 sm:$0xff]  }
 0x1a8   :  { %6409 = vmatprep.subr.bf16.mxu1 %v9804_v49  ;;  %v9850_v49 = vld [vmem:[#allocation5 + $0x5b0] ss:$40 sps:$4 sm:$0xff]  }
 0x1aa   :  { %6369 = vmatpush2.bf16.msra.mxu0 %v9799_v52  ;;  %v9855_v52 = vld [vmem:[#allocation5 + $0x64] ss:$40 sps:$4 sm:$0xff]  }
 0x1ab   :  { %6410 = vmatpush2.bf16.msra.mxu1 %v9802_v53  ;;  %6370 = vmatprep.subr.bf16.mxu0 %v9807_v8  ;;  %v9858_v53 = vld [vmem:[#allocation5 + $0x564] ss:$40 sps:$4 sm:$0xff]   ;;  %v9853_v8 = vld [vmem:[#allocation5 + $0x60] ss:$40 sps:$4 sm:$0xff]  }
 0x1ac   :  { %6411 = vmatprep.subr.bf16.mxu1 %v9810_v56  ;;  %v9856_v56 = vld [vmem:[#allocation5 + $0x560] ss:$40 sps:$4 sm:$0xff]  }
 0x1ae   :  { %6371 = vmatpush2.bf16.msra.mxu0 %v9805_v57  ;;  %v9861_v57 = vld [vmem:[#allocation5 + $0x14] ss:$40 sps:$4 sm:$0xff]  }
 0x1af   :  { %6412 = vmatpush2.bf16.msra.mxu1 %v9808_v58  ;;  %6372 = vmatprep.subr.bf16.mxu0 %v9813_v59  ;;  %v9864_v58 = vld [vmem:[#allocation5 + $0x514] ss:$40 sps:$4 sm:$0xff]   ;;  %v9859_v59 = vld [vmem:[#allocation5 + $0x10] ss:$40 sps:$4 sm:$0xff]  }
 0x1b0   :  { %6413 = vmatprep.subr.bf16.mxu1 %v9816_v14  ;;  %v9862_v14 = vld [vmem:[#allocation5 + $0x510] ss:$40 sps:$4 sm:$0xff]  }
 0x1b2   :  { %6373 = vmatpush2.bf16.msra.mxu0 %v9811_v60  ;;  %v9867_v60 = vld [vmem:[#allocation5 + $0x4c4] ss:$40 sps:$4 sm:$0xff]  }
 0x1b3   :  { %6414 = vmatpush2.bf16.msra.mxu1 %v9814_v61  ;;  %6424 = vmatprep.subr.bf16.mxu0 %v9819_v62  ;;  %v9870_v61 = vld [vmem:[#allocation5 + $0x9c4] ss:$40 sps:$4 sm:$0xff]   ;;  %v9865_v62 = vld [vmem:[#allocation5 + $0x4c0] ss:$40 sps:$4 sm:$0xff]  }
 0x1b4   :  { %6465 = vmatprep.subr.bf16.mxu1 %v9822_v63  ;;  %v9868_v63 = vld [vmem:[#allocation5 + $0x9c0] ss:$40 sps:$4 sm:$0xff]  }
 0x1b5   :  { %v6130_v9 = vpop.f32.mrf.mxu0  ;;  %6375 = vmatmul.mubr.bf16.vlgmr.msra.gmra.mxu0 %v10971_v34 }
 0x1b6   :  { %v6171_v10 = vpop.f32.mrf.mxu1  ;;  %6416 = vmatmul.mubr.bf16.vlgmr.msra.gmra.mxu1 %v10975_v35  ;;  %v6131_v11 = vadd.f32 %v6130_v9, %v11000_v46  ;;  %6425 = vmatpush1.bf16.msra.mxu0 %v9817_v0  ;;  %v9873_v0 = vld [vmem:[#allocation5 + $0x474] ss:$40 sps:$4 sm:$0xff]   ;;  %v9877_v9 = vld [vmem:[#allocation5 + $0x420] ss:$40 sps:$4 sm:$0xff]  }
 0x1b7   :  { %6466 = vmatpush1.bf16.msra.mxu1 %v9820_v1  ;;  %v6132_v12 = vpop.f32.mrf.mxu0  ;;  %6426 = vmatprep.subr.bf16.mxu0 %v9825_v2  ;;  %v9876_v1 = vld [vmem:[#allocation5 + $0x974] ss:$40 sps:$4 sm:$0xff]   ;;  %v9871_v2 = vld [vmem:[#allocation5 + $0x470] ss:$40 sps:$4 sm:$0xff]  }
 0x1b8   :  { %v6173_v13 = vpop.f32.mrf.mxu1  ;;  %6467 = vmatprep.subr.bf16.mxu1 %v9828_v3  ;;  %v11010_v19 = vadd.f32 %v6171_v10, %v6131_v11  ;;  %v6133_v20 = vadd.f32 %v6132_v12, %v11005_v55  ;;  %6456 = vmatprep.mubr.bf16.mxu0 %v10919_v47  ;;  %v9874_v3 = vld [vmem:[#allocation5 + $0x970] ss:$40 sps:$4 sm:$0xff]   ;;  %v9880_v10 = vld [vmem:[#allocation5 + $0x920] ss:$40 sps:$4 sm:$0xff]   ;;  %v9885_v11 = vld [vmem:[#allocation5 + $0x3d4] ss:$40 sps:$4 sm:$0xff]  }
 0x1b9   :  { %6497 = vmatprep.mubr.bf16.mxu1 %v10921_v51  ;;  %v6134_v27 = vpop.f32.mrf.mxu0  ;;  %v9888_v12 = vld [vmem:[#allocation5 + $0x8d4] ss:$40 sps:$4 sm:$0xff]  }
 0x1ba   :  { %v6175_v46 = vpop.f32.mrf.mxu1  ;;  %v11015_v28 = vadd.f32 %v6173_v13, %v6133_v20  ;;  %6427 = vmatpush1.bf16.msra.mxu0 %v9823_v4  ;;  %v7162_v55 = vmul.f32 %v11010_v19, %v11010_v19  ;;  %v9879_v4 = vld [vmem:[#allocation5 + $0x424] ss:$40 sps:$4 sm:$0xff]   ;;  %v9883_v13 = vld [vmem:[#allocation5 + $0x3d0] ss:$40 sps:$4 sm:$0xff]   ;;  %v9897_v27 = vld [vmem:[#allocation5 + $0x334] ss:$40 sps:$4 sm:$0xff]  }
 0x1bb   :  { %6468 = vmatpush1.bf16.msra.mxu1 %v9826_v5  ;;  %v6135_v29 = vpop.f32.mrf.mxu0  ;;  %6428 = vmatprep.subr.bf16.mxu0 %v9831_v15  ;;  %v9882_v5 = vld [vmem:[#allocation5 + $0x924] ss:$40 sps:$4 sm:$0xff]   ;;  %v9886_v15 = vld [vmem:[#allocation5 + $0x8d0] ss:$40 sps:$4 sm:$0xff]   ;;  %v9900_v46 = vld [vmem:[#allocation5 + $0x834] ss:$40 sps:$4 sm:$0xff]  }
 0x1bc   :  { %v6176_v30 = vpop.f32.mrf.mxu1  ;;  %6469 = vmatprep.subr.bf16.mxu1 %v9834_v18  ;;  %v7163_v33 = vmul.f32 %v11015_v28, %v11015_v28  ;;  %v9891_v18 = vld [vmem:[#allocation5 + $0x384] ss:$40 sps:$4 sm:$0xff]   ;;  %v9895_v29 = vld [vmem:[#allocation5 + $0x330] ss:$40 sps:$4 sm:$0xff]  }
 0x1bd   :  { %v9894_v20 = vld [vmem:[#allocation5 + $0x884] ss:$40 sps:$4 sm:$0xff]   ;;  %v9898_v30 = vld [vmem:[#allocation5 + $0x830] ss:$40 sps:$4 sm:$0xff]  }
 0x1be   :  { %v11021_v38 = vadd.f32 %v7163_v33, %v7162_v55  ;;  %6429 = vmatpush1.bf16.msra.mxu0 %v9829_v21  ;;  %v9889_v21 = vld [vmem:[#allocation5 + $0x380] ss:$40 sps:$4 sm:$0xff]  }
 0x1bf   :  { %6470 = vmatpush1.bf16.msra.mxu1 %v9832_v26  ;;  %6430 = vmatprep.subr.bf16.mxu0 %v9837_v31  ;;  %v9892_v26 = vld [vmem:[#allocation5 + $0x880] ss:$40 sps:$4 sm:$0xff]   ;;  %v9903_v31 = vld [vmem:[#allocation5 + $0x2e4] ss:$40 sps:$4 sm:$0xff]  }
 0x1c0   :  { %6471 = vmatprep.subr.bf16.mxu1 %v9840_v32  ;;  %v9906_v32 = vld [vmem:[#allocation5 + $0x7e4] ss:$40 sps:$4 sm:$0xff]   ;;  %v9901_v55 = vld [vmem:[#allocation5 + $0x2e0] ss:$40 sps:$4 sm:$0xff]  }
 0x1c1   :  { %v9904_v33 = vld [vmem:[#allocation5 + $0x7e0] ss:$40 sps:$4 sm:$0xff]  }
 0x1c2   :  { %6431 = vmatpush1.bf16.msra.mxu0 %v9835_v39  ;;  %v9909_v39 = vld [vmem:[#allocation5 + $0x294] ss:$40 sps:$4 sm:$0xff]  }
 0x1c3   :  { %6472 = vmatpush1.bf16.msra.mxu1 %v9838_v40  ;;  %6432 = vmatprep.subr.bf16.mxu0 %v9843_v41  ;;  %v9912_v40 = vld [vmem:[#allocation5 + $0x794] ss:$40 sps:$4 sm:$0xff]   ;;  %v9907_v41 = vld [vmem:[#allocation5 + $0x290] ss:$40 sps:$4 sm:$0xff]  }
 0x1c4   :  { %6473 = vmatprep.subr.bf16.mxu1 %v9846_v42  ;;  %v9910_v42 = vld [vmem:[#allocation5 + $0x790] ss:$40 sps:$4 sm:$0xff]  }
 0x1c6   :  { %6433 = vmatpush1.bf16.msra.mxu0 %v9841_v22  ;;  %v1050_v22 = vsub.s32 2, %v10981_v44 }
 0x1c7   :  { %6474 = vmatpush1.bf16.msra.mxu1 %v9844_v43  ;;  %6434 = vmatprep.subr.bf16.mxu0 %v9849_v23  ;;  %v9915_v43 = vld [vmem:[#allocation5 + $0xc44] ss:$40 sps:$4 sm:$0xff]  }
 0x1c8   :  { %6475 = vmatprep.subr.bf16.mxu1 %v9852_v45  ;;  %v9918_v23 = vld [vmem:[#allocation5 + $0x1144] ss:$40 sps:$4 sm:$0xff]   ;;  %v9913_v45 = vld [vmem:[#allocation5 + $0xc40] ss:$40 sps:$4 sm:$0xff]  }
 0x1ca   :  { %6435 = vmatpush1.bf16.msra.mxu0 %v9847_v48  ;;  %v9916_v48 = vld [vmem:[#allocation5 + $0x1140] ss:$40 sps:$4 sm:$0xff]  }
 0x1cb   :  { %6476 = vmatpush1.bf16.msra.mxu1 %v9850_v49  ;;  %6436 = vmatprep.subr.bf16.mxu0 %v9855_v52  ;;  %v1054_v49 = vsub.s32 3, %v10981_v44  ;;  %v10763_v52 = vld [vmem:[#allocation7] sm:$0xff] }
 0x1cc   :  { %6477 = vmatprep.subr.bf16.mxu1 %v9858_v53  ;;  %v1051_v53 = vrot.slane %v10763_v52, %v1050_v22  ;;  %v9960_v22 = vld [vmem:[#allocation5 + $0xf14] ss:$40 sps:$4 sm:$0xff]  }
 0x1ce   :  { %6437 = vmatpush1.bf16.msra.mxu0 %v9853_v8  ;;  %v9921_v8 = vld [vmem:[#allocation5 + $0xbf4] ss:$40 sps:$4 sm:$0xff]  }
 0x1cf   :  { %6478 = vmatpush1.bf16.msra.mxu1 %v9856_v56  ;;  %6438 = vmatprep.subr.bf16.mxu0 %v9861_v57  ;;  %v9924_v56 = vld [vmem:[#allocation5 + $0x10f4] ss:$40 sps:$4 sm:$0xff]   ;;  %v1055_v57 = vrot.slane %v10763_v52, %v1054_v49  ;;  %v9961_v49 = vld [vmem:[#allocation5 + $0xec0] ss:$40 sps:$4 sm:$0xff]  }
 0x1d0   :  { %6479 = vmatprep.subr.bf16.mxu1 %v9864_v58  ;;  %v9919_v58 = vld [vmem:[#allocation5 + $0xbf0] ss:$40 sps:$4 sm:$0xff]   ;;  %v9964_v52 = vld [vmem:[#allocation5 + $0x13c0] ss:$40 sps:$4 sm:$0xff]  }
 0x1d2   :  { %6439 = vmatpush1.bf16.msra.mxu0 %v9859_v59  ;;  %v9922_v59 = vld [vmem:[#allocation5 + $0x10f0] ss:$40 sps:$4 sm:$0xff]  }
 0x1d3   :  { %6480 = vmatpush1.bf16.msra.mxu1 %v9862_v14  ;;  %6440 = vmatprep.subr.bf16.mxu0 %v9867_v60 }
 0x1d4   :  { %6481 = vmatprep.subr.bf16.mxu1 %v9870_v61 }
 0x1d6   :  { %6441 = vmatpush2.bf16.msra.mxu0 %v9865_v62 }
 0x1d7   :  { %6482 = vmatpush2.bf16.msra.mxu1 %v9868_v63  ;;  %6442 = vmatprep.subr.bf16.mxu0 %v9873_v0  ;;  %v9927_v0 = vld [vmem:[#allocation5 + $0xba4] ss:$40 sps:$4 sm:$0xff]  }
 0x1d8   :  { %6483 = vmatprep.subr.bf16.mxu1 %v9876_v1  ;;  %v9930_v1 = vld [vmem:[#allocation5 + $0x10a4] ss:$40 sps:$4 sm:$0xff]  }
 0x1da   :  { %6443 = vmatpush2.bf16.msra.mxu0 %v9871_v2 }
 0x1db   :  { %6484 = vmatpush2.bf16.msra.mxu1 %v9874_v3  ;;  %6444 = vmatprep.subr.bf16.mxu0 %v9879_v4  ;;  %v9925_v4 = vld [vmem:[#allocation5 + $0xba0] ss:$40 sps:$4 sm:$0xff]  }
 0x1dc   :  { %6485 = vmatprep.subr.bf16.mxu1 %v9882_v5  ;;  %v9928_v5 = vld [vmem:[#allocation5 + $0x10a0] ss:$40 sps:$4 sm:$0xff]  }
 0x1de   :  { %6445 = vmatpush2.bf16.msra.mxu0 %v9877_v9 }
 0x1df   :  { %6486 = vmatpush2.bf16.msra.mxu1 %v9880_v10  ;;  %6446 = vmatprep.subr.bf16.mxu0 %v9885_v11 }
 0x1e0   :  { %6487 = vmatprep.subr.bf16.mxu1 %v9888_v12 }
 0x1e2   :  { %6447 = vmatpush2.bf16.msra.mxu0 %v9883_v13 }
 0x1e3   :  { %6488 = vmatpush2.bf16.msra.mxu1 %v9886_v15  ;;  %6448 = vmatprep.subr.bf16.mxu0 %v9891_v18  ;;  %v9933_v15 = vld [vmem:[#allocation5 + $0xb54] ss:$40 sps:$4 sm:$0xff]  }
 0x1e4   :  { %6489 = vmatprep.subr.bf16.mxu1 %v9894_v20  ;;  %v9936_v18 = vld [vmem:[#allocation5 + $0x1054] ss:$40 sps:$4 sm:$0xff]   ;;  %v9931_v20 = vld [vmem:[#allocation5 + $0xb50] ss:$40 sps:$4 sm:$0xff]  }
 0x1e6   :  { %6449 = vmatpush2.bf16.msra.mxu0 %v9889_v21  ;;  %v9934_v21 = vld [vmem:[#allocation5 + $0x1050] ss:$40 sps:$4 sm:$0xff]  }
 0x1e7   :  { %6490 = vmatpush2.bf16.msra.mxu1 %v9892_v26  ;;  %6450 = vmatprep.subr.bf16.mxu0 %v9897_v27  ;;  %v9939_v26 = vld [vmem:[#allocation5 + $0xb04] ss:$40 sps:$4 sm:$0xff]  }
 0x1e8   :  { %6491 = vmatprep.subr.bf16.mxu1 %v9900_v46  ;;  %v9942_v27 = vld [vmem:[#allocation5 + $0x1004] ss:$40 sps:$4 sm:$0xff]   ;;  %v9937_v46 = vld [vmem:[#allocation5 + $0xb00] ss:$40 sps:$4 sm:$0xff]  }
 0x1ea   :  { %6451 = vmatpush2.bf16.msra.mxu0 %v9895_v29  ;;  %v9940_v29 = vld [vmem:[#allocation5 + $0x1000] ss:$40 sps:$4 sm:$0xff]  }
 0x1eb   :  { %6492 = vmatpush2.bf16.msra.mxu1 %v9898_v30  ;;  %6452 = vmatprep.subr.bf16.mxu0 %v9903_v31  ;;  %v9945_v30 = vld [vmem:[#allocation5 + $0xab4] ss:$40 sps:$4 sm:$0xff]  }
 0x1ec   :  { %6493 = vmatprep.subr.bf16.mxu1 %v9906_v32  ;;  %v9948_v31 = vld [vmem:[#allocation5 + $0xfb4] ss:$40 sps:$4 sm:$0xff]   ;;  %v9943_v32 = vld [vmem:[#allocation5 + $0xab0] ss:$40 sps:$4 sm:$0xff]  }
 0x1ee   :  { %6453 = vmatpush2.bf16.msra.mxu0 %v9901_v55  ;;  %v9946_v55 = vld [vmem:[#allocation5 + $0xfb0] ss:$40 sps:$4 sm:$0xff]  }
 0x1ef   :  { %6494 = vmatpush2.bf16.msra.mxu1 %v9904_v33  ;;  %6454 = vmatprep.subr.bf16.mxu0 %v9909_v39  ;;  %v9951_v33 = vld [vmem:[#allocation5 + $0xa64] ss:$40 sps:$4 sm:$0xff]  }
 0x1f0   :  { %6495 = vmatprep.subr.bf16.mxu1 %v9912_v40  ;;  %v9954_v39 = vld [vmem:[#allocation5 + $0xf64] ss:$40 sps:$4 sm:$0xff]   ;;  %v9949_v40 = vld [vmem:[#allocation5 + $0xa60] ss:$40 sps:$4 sm:$0xff]  }
 0x1f2   :  { %6455 = vmatpush2.bf16.msra.mxu0 %v9907_v41  ;;  %v9952_v41 = vld [vmem:[#allocation5 + $0xf60] ss:$40 sps:$4 sm:$0xff]  }
 0x1f3   :  { %6496 = vmatpush2.bf16.msra.mxu1 %v9910_v42  ;;  %6506 = vmatprep.subr.bf16.mxu0 %v9915_v43  ;;  %v9957_v42 = vld [vmem:[#allocation5 + $0xa14] ss:$40 sps:$4 sm:$0xff]   ;;  %v9955_v43 = vld [vmem:[#allocation5 + $0xa10] ss:$40 sps:$4 sm:$0xff]  }
 0x1f4   :  { %6547 = vmatprep.subr.bf16.mxu1 %v9918_v23  ;;  %v9958_v23 = vld [vmem:[#allocation5 + $0xf10] ss:$40 sps:$4 sm:$0xff]  }
 0x1f5   :  { %v6212_v14 = vpop.f32.mrf.mxu0  ;;  %6457 = vmatmul.mubr.bf16.vlgmr.msra.gmra.mxu0 %v10925_v6 }
 0x1f6   :  { %v6253_v60 = vpop.f32.mrf.mxu1  ;;  %6498 = vmatmul.mubr.bf16.vlgmr.msra.gmra.mxu1 %v10927_v7  ;;  %v6213_v61 = vadd.f32 %v6212_v14, %v1051_v53  ;;  %6507 = vmatpush1.bf16.msra.mxu0 %v9913_v45  ;;  %v9963_v45 = vld [vmem:[#allocation5 + $0xec4] ss:$40 sps:$4 sm:$0xff]   ;;  %v9969_v53 = vld [vmem:[#allocation5 + $0xe74] ss:$40 sps:$4 sm:$0xff]   ;;  %v9973_v14 = vld [vmem:[#allocation5 + $0xe20] ss:$40 sps:$4 sm:$0xff]  }
 0x1f7   :  { %6548 = vmatpush1.bf16.msra.mxu1 %v9916_v48  ;;  %v6214_v62 = vpop.f32.mrf.mxu0  ;;  %6508 = vmatprep.subr.bf16.mxu0 %v9921_v8  ;;  %v9966_v48 = vld [vmem:[#allocation5 + $0x13c4] ss:$40 sps:$4 sm:$0xff]   ;;  %v9972_v8 = vld [vmem:[#allocation5 + $0x1374] ss:$40 sps:$4 sm:$0xff]  }
 0x1f8   :  { %v6255_v63 = vpop.f32.mrf.mxu1  ;;  %6549 = vmatprep.subr.bf16.mxu1 %v9924_v56  ;;  %v11027_v2 = vadd.f32 %v6253_v60, %v6213_v61  ;;  %v6215_v3 = vadd.f32 %v6214_v62, %v1055_v57  ;;  %6538 = vmatprep.mubr.bf16.mxu0 %v10937_v36  ;;  %v9967_v56 = vld [vmem:[#allocation5 + $0xe70] ss:$40 sps:$4 sm:$0xff]   ;;  %v9976_v60 = vld [vmem:[#allocation5 + $0x1320] ss:$40 sps:$4 sm:$0xff]   ;;  %v9981_v61 = vld [vmem:[#allocation5 + $0xdd4] ss:$40 sps:$4 sm:$0xff]  }
 0x1f9   :  { %6579 = vmatprep.mubr.bf16.mxu1 %v10941_v37  ;;  %v6216_v9 = vpop.f32.mrf.mxu0  ;;  %v9970_v57 = vld [vmem:[#allocation5 + $0x1370] ss:$40 sps:$4 sm:$0xff]   ;;  %v9984_v62 = vld [vmem:[#allocation5 + $0x12d4] ss:$40 sps:$4 sm:$0xff]  }
 0x1fa   :  { %v6257_v10 = vpop.f32.mrf.mxu1  ;;  %v11031_v11 = vadd.f32 %v6255_v63, %v6215_v3  ;;  %6509 = vmatpush1.bf16.msra.mxu0 %v9919_v58  ;;  %v9975_v58 = vld [vmem:[#allocation5 + $0xe24] ss:$40 sps:$4 sm:$0xff]   ;;  %v9979_v63 = vld [vmem:[#allocation5 + $0xdd0] ss:$40 sps:$4 sm:$0xff]   ;;  %v9993_v9 = vld [vmem:[#allocation5 + $0xd34] ss:$40 sps:$4 sm:$0xff]  }
 0x1fb   :  { %6550 = vmatpush1.bf16.msra.mxu1 %v9922_v59  ;;  %v6217_v12 = vpop.f32.mrf.mxu0  ;;  %6510 = vmatprep.subr.bf16.mxu0 %v9927_v0  ;;  %v9978_v59 = vld [vmem:[#allocation5 + $0x1324] ss:$40 sps:$4 sm:$0xff]   ;;  %v9982_v0 = vld [vmem:[#allocation5 + $0x12d0] ss:$40 sps:$4 sm:$0xff]   ;;  %v9996_v10 = vld [vmem:[#allocation5 + $0x1234] ss:$40 sps:$4 sm:$0xff]  }
 0x1fc   :  { %v6258_v13 = vpop.f32.mrf.mxu1  ;;  %6551 = vmatprep.subr.bf16.mxu1 %v9930_v1  ;;  %v9987_v1 = vld [vmem:[#allocation5 + $0xd84] ss:$40 sps:$4 sm:$0xff]   ;;  %v9991_v12 = vld [vmem:[#allocation5 + $0xd30] ss:$40 sps:$4 sm:$0xff]  }
 0x1fd   :  { %v9990_v3 = vld [vmem:[#allocation5 + $0x1284] ss:$40 sps:$4 sm:$0xff]   ;;  %v9994_v13 = vld [vmem:[#allocation5 + $0x1230] ss:$40 sps:$4 sm:$0xff]  }
 0x1fe   :  { %6511 = vmatpush1.bf16.msra.mxu0 %v9925_v4  ;;  %v9985_v4 = vld [vmem:[#allocation5 + $0xd80] ss:$40 sps:$4 sm:$0xff]  }
 0x1ff   :  { %6552 = vmatpush1.bf16.msra.mxu1 %v9928_v5  ;;  %6512 = vmatprep.subr.bf16.mxu0 %v9933_v15  ;;  %v9988_v5 = vld [vmem:[#allocation5 + $0x1280] ss:$40 sps:$4 sm:$0xff]   ;;  %v9999_v15 = vld [vmem:[#allocation5 + $0xce4] ss:$40 sps:$4 sm:$0xff]  }
 0x200   :  { %6553 = vmatprep.subr.bf16.mxu1 %v9936_v18  ;;  %v10002_v18 = vld [vmem:[#allocation5 + $0x11e4] ss:$40 sps:$4 sm:$0xff]  }
 0x202   :  { %6513 = vmatpush1.bf16.msra.mxu0 %v9931_v20  ;;  %v9997_v20 = vld [vmem:[#allocation5 + $0xce0] ss:$40 sps:$4 sm:$0xff]  }
 0x203   :  { %6554 = vmatpush1.bf16.msra.mxu1 %v9934_v21  ;;  %6514 = vmatprep.subr.bf16.mxu0 %v9939_v26  ;;  %v10000_v21 = vld [vmem:[#allocation5 + $0x11e0] ss:$40 sps:$4 sm:$0xff]   ;;  %v10005_v26 = vld [vmem:[#allocation5 + $0xc94] ss:$40 sps:$4 sm:$0xff]  }
 0x204   :  { %6555 = vmatprep.subr.bf16.mxu1 %v9942_v27  ;;  %v10008_v27 = vld [vmem:[#allocation5 + $0x1194] ss:$40 sps:$4 sm:$0xff]  }
 0x206   :  { %6515 = vmatpush1.bf16.msra.mxu0 %v9937_v46  ;;  %v10003_v46 = vld [vmem:[#allocation5 + $0xc90] ss:$40 sps:$4 sm:$0xff]  }
 0x207   :  { %6556 = vmatpush1.bf16.msra.mxu1 %v9940_v29  ;;  %6516 = vmatprep.subr.bf16.mxu0 %v9945_v30  ;;  %v10006_v29 = vld [vmem:[#allocation5 + $0x1190] ss:$40 sps:$4 sm:$0xff]   ;;  %v10011_v30 = vld [vmem:[#allocation5 + $0x1644] ss:$40 sps:$4 sm:$0xff]  }
 0x208   :  { %6557 = vmatprep.subr.bf16.mxu1 %v9948_v31  ;;  %v10014_v31 = vld [vmem:[#allocation5 + $0x1b44] ss:$40 sps:$4 sm:$0xff]  }
 0x20a   :  { %6517 = vmatpush1.bf16.msra.mxu0 %v9943_v32  ;;  %v10009_v32 = vld [vmem:[#allocation5 + $0x1640] ss:$40 sps:$4 sm:$0xff]  }
 0x20b   :  { %6558 = vmatpush1.bf16.msra.mxu1 %v9946_v55  ;;  %6518 = vmatprep.subr.bf16.mxu0 %v9951_v33  ;;  %v10012_v55 = vld [vmem:[#allocation5 + $0x1b40] ss:$40 sps:$4 sm:$0xff]   ;;  %v10017_v33 = vld [vmem:[#allocation5 + $0x15f4] ss:$40 sps:$4 sm:$0xff]  }
 0x20c   :  { %6559 = vmatprep.subr.bf16.mxu1 %v9954_v39  ;;  %v10020_v39 = vld [vmem:[#allocation5 + $0x1af4] ss:$40 sps:$4 sm:$0xff]  }
 0x20e   :  { %6519 = vmatpush1.bf16.msra.mxu0 %v9949_v40  ;;  %v10015_v40 = vld [vmem:[#allocation5 + $0x15f0] ss:$40 sps:$4 sm:$0xff]  }
 0x20f   :  { %6560 = vmatpush1.bf16.msra.mxu1 %v9952_v41  ;;  %6520 = vmatprep.subr.bf16.mxu0 %v9957_v42  ;;  %v10018_v41 = vld [vmem:[#allocation5 + $0x1af0] ss:$40 sps:$4 sm:$0xff]  }
 0x210   :  { %6561 = vmatprep.subr.bf16.mxu1 %v9960_v22 }
 0x212   :  { %6521 = vmatpush1.bf16.msra.mxu0 %v9955_v43 }
 0x213   :  { %6562 = vmatpush1.bf16.msra.mxu1 %v9958_v23  ;;  %6522 = vmatprep.subr.bf16.mxu0 %v9963_v45 }
 0x214   :  { %6563 = vmatprep.subr.bf16.mxu1 %v9966_v48  ;;  %v10023_v48 = vld [vmem:[#allocation5 + $0x15a4] ss:$40 sps:$4 sm:$0xff]  }
 0x216   :  { %6523 = vmatpush2.bf16.msra.mxu0 %v9961_v49  ;;  %v10026_v49 = vld [vmem:[#allocation5 + $0x1aa4] ss:$40 sps:$4 sm:$0xff]  }
 0x217   :  { %6564 = vmatpush2.bf16.msra.mxu1 %v9964_v52  ;;  %6524 = vmatprep.subr.bf16.mxu0 %v9969_v53 }
 0x218   :  { %6565 = vmatprep.subr.bf16.mxu1 %v9972_v8  ;;  %v10021_v8 = vld [vmem:[#allocation5 + $0x15a0] ss:$40 sps:$4 sm:$0xff]  }
 0x21a   :  { %6525 = vmatpush2.bf16.msra.mxu0 %v9967_v56  ;;  %v10024_v56 = vld [vmem:[#allocation5 + $0x1aa0] ss:$40 sps:$4 sm:$0xff]  }
 0x21b   :  { %6566 = vmatpush2.bf16.msra.mxu1 %v9970_v57  ;;  %6526 = vmatprep.subr.bf16.mxu0 %v9975_v58 }
 0x21c   :  { %6567 = vmatprep.subr.bf16.mxu1 %v9978_v59 }
 0x21e   :  { %6527 = vmatpush2.bf16.msra.mxu0 %v9973_v14 }
 0x21f   :  { %6568 = vmatpush2.bf16.msra.mxu1 %v9976_v60  ;;  %6528 = vmatprep.subr.bf16.mxu0 %v9981_v61  ;;  %v10029_v60 = vld [vmem:[#allocation5 + $0x1554] ss:$40 sps:$4 sm:$0xff]  }
 0x220   :  { %6569 = vmatprep.subr.bf16.mxu1 %v9984_v62  ;;  %v10032_v61 = vld [vmem:[#allocation5 + $0x1a54] ss:$40 sps:$4 sm:$0xff]   ;;  %v10030_v62 = vld [vmem:[#allocation5 + $0x1a50] ss:$40 sps:$4 sm:$0xff]  }
 0x222   :  { %6529 = vmatpush2.bf16.msra.mxu0 %v9979_v63  ;;  %v10035_v63 = vld [vmem:[#allocation5 + $0x1504] ss:$40 sps:$4 sm:$0xff]  }
 0x223   :  { %6570 = vmatpush2.bf16.msra.mxu1 %v9982_v0  ;;  %6530 = vmatprep.subr.bf16.mxu0 %v9987_v1  ;;  %v10038_v0 = vld [vmem:[#allocation5 + $0x1a04] ss:$40 sps:$4 sm:$0xff]   ;;  %v10033_v1 = vld [vmem:[#allocation5 + $0x1500] ss:$40 sps:$4 sm:$0xff]  }
 0x224   :  { %6571 = vmatprep.subr.bf16.mxu1 %v9990_v3  ;;  %v10036_v3 = vld [vmem:[#allocation5 + $0x1a00] ss:$40 sps:$4 sm:$0xff]  }
 0x226   :  { %6531 = vmatpush2.bf16.msra.mxu0 %v9985_v4  ;;  %v10041_v4 = vld [vmem:[#allocation5 + $0x14b4] ss:$40 sps:$4 sm:$0xff]  }
 0x227   :  { %6572 = vmatpush2.bf16.msra.mxu1 %v9988_v5  ;;  %6532 = vmatprep.subr.bf16.mxu0 %v9993_v9  ;;  %v10044_v5 = vld [vmem:[#allocation5 + $0x19b4] ss:$40 sps:$4 sm:$0xff]   ;;  %v10039_v9 = vld [vmem:[#allocation5 + $0x14b0] ss:$40 sps:$4 sm:$0xff]  }
 0x228   :  { %6573 = vmatprep.subr.bf16.mxu1 %v9996_v10  ;;  %v10042_v10 = vld [vmem:[#allocation5 + $0x19b0] ss:$40 sps:$4 sm:$0xff]  }
 0x22a   :  { %6533 = vmatpush2.bf16.msra.mxu0 %v9991_v12  ;;  %v10047_v12 = vld [vmem:[#allocation5 + $0x1464] ss:$40 sps:$4 sm:$0xff]  }
 0x22b   :  { %6574 = vmatpush2.bf16.msra.mxu1 %v9994_v13  ;;  %6534 = vmatprep.subr.bf16.mxu0 %v9999_v15  ;;  %v10050_v13 = vld [vmem:[#allocation5 + $0x1964] ss:$40 sps:$4 sm:$0xff]   ;;  %v10045_v15 = vld [vmem:[#allocation5 + $0x1460] ss:$40 sps:$4 sm:$0xff]  }
 0x22c   :  { %6575 = vmatprep.subr.bf16.mxu1 %v10002_v18  ;;  %v10048_v18 = vld [vmem:[#allocation5 + $0x1960] ss:$40 sps:$4 sm:$0xff]  }
 0x22e   :  { %6535 = vmatpush2.bf16.msra.mxu0 %v9997_v20  ;;  %v10053_v20 = vld [vmem:[#allocation5 + $0x1414] ss:$40 sps:$4 sm:$0xff]  }
 0x22f   :  { %6576 = vmatpush2.bf16.msra.mxu1 %v10000_v21  ;;  %6536 = vmatprep.subr.bf16.mxu0 %v10005_v26  ;;  %v10056_v21 = vld [vmem:[#allocation5 + $0x1914] ss:$40 sps:$4 sm:$0xff]   ;;  %v10051_v26 = vld [vmem:[#allocation5 + $0x1410] ss:$40 sps:$4 sm:$0xff]  }
 0x230   :  { %6577 = vmatprep.subr.bf16.mxu1 %v10008_v27  ;;  %v10054_v27 = vld [vmem:[#allocation5 + $0x1910] ss:$40 sps:$4 sm:$0xff]  }
 0x232   :  { %6537 = vmatpush2.bf16.msra.mxu0 %v10003_v46  ;;  %v10059_v46 = vld [vmem:[#allocation5 + $0x18c4] ss:$40 sps:$4 sm:$0xff]  }
 0x233   :  { %6578 = vmatpush2.bf16.msra.mxu1 %v10006_v29  ;;  %6588 = vmatprep.subr.bf16.mxu0 %v10011_v30  ;;  %v10062_v29 = vld [vmem:[#allocation5 + $0x1dc4] ss:$40 sps:$4 sm:$0xff]   ;;  %v10057_v30 = vld [vmem:[#allocation5 + $0x18c0] ss:$40 sps:$4 sm:$0xff]  }
 0x234   :  { %6629 = vmatprep.subr.bf16.mxu1 %v10014_v31  ;;  %v10060_v31 = vld [vmem:[#allocation5 + $0x1dc0] ss:$40 sps:$4 sm:$0xff]  }
 0x235   :  { %v6294_v42 = vpop.f32.mrf.mxu0  ;;  %6539 = vmatmul.mubr.bf16.vlgmr.msra.gmra.mxu0 %v10947_v16 }
 0x236   :  { %v6335_v22 = vpop.f32.mrf.mxu1  ;;  %6580 = vmatmul.mubr.bf16.vlgmr.msra.gmra.mxu1 %v10951_v17  ;;  %v6295_v43 = vadd.f32 %v6294_v42, %v11027_v2  ;;  %6589 = vmatpush1.bf16.msra.mxu0 %v10009_v32  ;;  %v10065_v32 = vld [vmem:[#allocation5 + $0x1874] ss:$40 sps:$4 sm:$0xff]   ;;  %v10069_v42 = vld [vmem:[#allocation5 + $0x1820] ss:$40 sps:$4 sm:$0xff]  }
 0x237   :  { %6630 = vmatpush1.bf16.msra.mxu1 %v10012_v55  ;;  %v6296_v23 = vpop.f32.mrf.mxu0  ;;  %6590 = vmatprep.subr.bf16.mxu0 %v10017_v33  ;;  %v10068_v55 = vld [vmem:[#allocation5 + $0x1d74] ss:$40 sps:$4 sm:$0xff]   ;;  %v10063_v33 = vld [vmem:[#allocation5 + $0x1870] ss:$40 sps:$4 sm:$0xff]  }
 0x238   :  { %v6337_v45 = vpop.f32.mrf.mxu1  ;;  %6631 = vmatprep.subr.bf16.mxu1 %v10020_v39  ;;  %v11036_v52 = vadd.f32 %v6335_v22, %v6295_v43  ;;  %v6297_v53 = vadd.f32 %v6296_v23, %v11031_v11  ;;  %6620 = vmatprep.mubr.bf16.mxu0 %v10959_v24  ;;  %v10027_v11 = vld [vmem:[#allocation5 + $0x1550] ss:$40 sps:$4 sm:$0xff]   ;;  %v10072_v22 = vld [vmem:[#allocation5 + $0x1d20] ss:$40 sps:$4 sm:$0xff]   ;;  %v10077_v43 = vld [vmem:[#allocation5 + $0x17d4] ss:$40 sps:$4 sm:$0xff]  }
 0x239   :  { %6661 = vmatprep.mubr.bf16.mxu1 %v10963_v25  ;;  %v6298_v57 = vpop.f32.mrf.mxu0  ;;  %v10066_v39 = vld [vmem:[#allocation5 + $0x1d70] ss:$40 sps:$4 sm:$0xff]   ;;  %v10080_v23 = vld [vmem:[#allocation5 + $0x1cd4] ss:$40 sps:$4 sm:$0xff]  }
 0x23a   :  { %v6339_v2 = vpop.f32.mrf.mxu1  ;;  %v11041_v58 = vadd.f32 %v6337_v45, %v6297_v53  ;;  %6591 = vmatpush1.bf16.msra.mxu0 %v10015_v40  ;;  %v10071_v40 = vld [vmem:[#allocation5 + $0x1824] ss:$40 sps:$4 sm:$0xff]   ;;  %v10075_v45 = vld [vmem:[#allocation5 + $0x17d0] ss:$40 sps:$4 sm:$0xff]   ;;  %v10089_v57 = vld [vmem:[#allocation5 + $0x1734] ss:$40 sps:$4 sm:$0xff]  }
 0x23b   :  { %6632 = vmatpush1.bf16.msra.mxu1 %v10018_v41  ;;  %v6299_v59 = vpop.f32.mrf.mxu0  ;;  %6592 = vmatprep.subr.bf16.mxu0 %v10023_v48  ;;  %v10074_v41 = vld [vmem:[#allocation5 + $0x1d24] ss:$40 sps:$4 sm:$0xff]   ;;  %v10078_v48 = vld [vmem:[#allocation5 + $0x1cd0] ss:$40 sps:$4 sm:$0xff]   ;;  %v10092_v2 = vld [vmem:[#allocation5 + $0x1c34] ss:$40 sps:$4 sm:$0xff]  }
 0x23c   :  { %v6340_v14 = vpop.f32.mrf.mxu1  ;;  %6633 = vmatprep.subr.bf16.mxu1 %v10026_v49  ;;  %v10083_v49 = vld [vmem:[#allocation5 + $0x1784] ss:$40 sps:$4 sm:$0xff]   ;;  %v10087_v59 = vld [vmem:[#allocation5 + $0x1730] ss:$40 sps:$4 sm:$0xff]  }
 0x23d   :  { %v10086_v53 = vld [vmem:[#allocation5 + $0x1c84] ss:$40 sps:$4 sm:$0xff]   ;;  %v10090_v14 = vld [vmem:[#allocation5 + $0x1c30] ss:$40 sps:$4 sm:$0xff]  }
 0x23e   :  { %6593 = vmatpush1.bf16.msra.mxu0 %v10021_v8  ;;  %v10081_v8 = vld [vmem:[#allocation5 + $0x1780] ss:$40 sps:$4 sm:$0xff]  }
 0x23f   :  { %6634 = vmatpush1.bf16.msra.mxu1 %v10024_v56  ;;  %6594 = vmatprep.subr.bf16.mxu0 %v10029_v60  ;;  %v10084_v56 = vld [vmem:[#allocation5 + $0x1c80] ss:$40 sps:$4 sm:$0xff]   ;;  %v10095_v60 = vld [vmem:[#allocation5 + $0x16e4] ss:$40 sps:$4 sm:$0xff]  }
 0x240   :  { %6635 = vmatprep.subr.bf16.mxu1 %v10032_v61  ;;  %v10098_v61 = vld [vmem:[#allocation5 + $0x1be4] ss:$40 sps:$4 sm:$0xff]  }
 0x242   :  { %6595 = vmatpush1.bf16.msra.mxu0 %v10027_v11  ;;  %v10093_v11 = vld [vmem:[#allocation5 + $0x16e0] ss:$40 sps:$4 sm:$0xff]  }
 0x243   :  { %6636 = vmatpush1.bf16.msra.mxu1 %v10030_v62  ;;  %6596 = vmatprep.subr.bf16.mxu0 %v10035_v63  ;;  %v10096_v62 = vld [vmem:[#allocation5 + $0x1be0] ss:$40 sps:$4 sm:$0xff]   ;;  %v10101_v63 = vld [vmem:[#allocation5 + $0x1694] ss:$40 sps:$4 sm:$0xff]  }
 0x244   :  { %6637 = vmatprep.subr.bf16.mxu1 %v10038_v0  ;;  %v10104_v0 = vld [vmem:[#allocation5 + $0x1b94] ss:$40 sps:$4 sm:$0xff]  }
 0x246   :  { %6597 = vmatpush1.bf16.msra.mxu0 %v10033_v1  ;;  %v10099_v1 = vld [vmem:[#allocation5 + $0x1690] ss:$40 sps:$4 sm:$0xff]  }
 0x247   :  { %6638 = vmatpush1.bf16.msra.mxu1 %v10036_v3  ;;  %6598 = vmatprep.subr.bf16.mxu0 %v10041_v4  ;;  %v10102_v3 = vld [vmem:[#allocation5 + $0x1b90] ss:$40 sps:$4 sm:$0xff]   ;;  %v10107_v4 = vld [vmem:[#allocation5 + $0x24c] ss:$40 sps:$4 sm:$0xff]  }
 0x248   :  { %6639 = vmatprep.subr.bf16.mxu1 %v10044_v5  ;;  %v10110_v5 = vld [vmem:[#allocation5 + $0x74c] ss:$40 sps:$4 sm:$0xff]  }
 0x24a   :  { %6599 = vmatpush1.bf16.msra.mxu0 %v10039_v9  ;;  %v10105_v9 = vld [vmem:[#allocation5 + $0x248] ss:$40 sps:$4 sm:$0xff]  }
 0x24b   :  { %6640 = vmatpush1.bf16.msra.mxu1 %v10042_v10  ;;  %6600 = vmatprep.subr.bf16.mxu0 %v10047_v12  ;;  %v10108_v10 = vld [vmem:[#allocation5 + $0x748] ss:$40 sps:$4 sm:$0xff]   ;;  %v10113_v12 = vld [vmem:[#allocation5 + $0x1fc] ss:$40 sps:$4 sm:$0xff]  }
 0x24c   :  { %6641 = vmatprep.subr.bf16.mxu1 %v10050_v13  ;;  %v10116_v13 = vld [vmem:[#allocation5 + $0x6fc] ss:$40 sps:$4 sm:$0xff]  }
 0x24e   :  { %6601 = vmatpush1.bf16.msra.mxu0 %v10045_v15  ;;  %v10111_v15 = vld [vmem:[#allocation5 + $0x1f8] ss:$40 sps:$4 sm:$0xff]  }
 0x24f   :  { %6642 = vmatpush1.bf16.msra.mxu1 %v10048_v18  ;;  %6602 = vmatprep.subr.bf16.mxu0 %v10053_v20  ;;  %v10114_v18 = vld [vmem:[#allocation5 + $0x6f8] ss:$40 sps:$4 sm:$0xff]  }
 0x250   :  { %6643 = vmatprep.subr.bf16.mxu1 %v10056_v21 }
 0x252   :  { %6603 = vmatpush1.bf16.msra.mxu0 %v10051_v26 }
 0x253   :  { %6644 = vmatpush1.bf16.msra.mxu1 %v10054_v27  ;;  %6604 = vmatprep.subr.bf16.mxu0 %v10059_v46 }
 0x254   :  { %6645 = vmatprep.subr.bf16.mxu1 %v10062_v29  ;;  %v10119_v29 = vld [vmem:[#allocation5 + $0x1ac] ss:$40 sps:$4 sm:$0xff]  }
 0x256   :  { %6605 = vmatpush2.bf16.msra.mxu0 %v10057_v30  ;;  %v10122_v30 = vld [vmem:[#allocation5 + $0x6ac] ss:$40 sps:$4 sm:$0xff]  }
 0x257   :  { %6646 = vmatpush2.bf16.msra.mxu1 %v10060_v31  ;;  %6606 = vmatprep.subr.bf16.mxu0 %v10065_v32 }
 0x258   :  { %6647 = vmatprep.subr.bf16.mxu1 %v10068_v55  ;;  %v10117_v55 = vld [vmem:[#allocation5 + $0x1a8] ss:$40 sps:$4 sm:$0xff]  }
 0x25a   :  { %6607 = vmatpush2.bf16.msra.mxu0 %v10063_v33  ;;  %v10120_v33 = vld [vmem:[#allocation5 + $0x6a8] ss:$40 sps:$4 sm:$0xff]  }
 0x25b   :  { %6648 = vmatpush2.bf16.msra.mxu1 %v10066_v39  ;;  %6608 = vmatprep.subr.bf16.mxu0 %v10071_v40 }
 0x25c   :  { %6649 = vmatprep.subr.bf16.mxu1 %v10074_v41 }
 0x25e   :  { %6609 = vmatpush2.bf16.msra.mxu0 %v10069_v42 }
 0x25f   :  { %6650 = vmatpush2.bf16.msra.mxu1 %v10072_v22  ;;  %6610 = vmatprep.subr.bf16.mxu0 %v10077_v43  ;;  %v10128_v43 = vld [vmem:[#allocation5 + $0x65c] ss:$40 sps:$4 sm:$0xff]  }
 0x260   :  { %6651 = vmatprep.subr.bf16.mxu1 %v10080_v23 }
 0x262   :  { %6611 = vmatpush2.bf16.msra.mxu0 %v10075_v45 }
 0x263   :  { %6652 = vmatpush2.bf16.msra.mxu1 %v10078_v48  ;;  %6612 = vmatprep.subr.bf16.mxu0 %v10083_v49  ;;  %v10123_v49 = vld [vmem:[#allocation5 + $0x158] ss:$40 sps:$4 sm:$0xff]  }
 0x264   :  { %6653 = vmatprep.subr.bf16.mxu1 %v10086_v53  ;;  %v10126_v53 = vld [vmem:[#allocation5 + $0x658] ss:$40 sps:$4 sm:$0xff]  }
 0x266   :  { %6613 = vmatpush2.bf16.msra.mxu0 %v10081_v8  ;;  %v10131_v8 = vld [vmem:[#allocation5 + $0x10c] ss:$40 sps:$4 sm:$0xff]  }
 0x267   :  { %6654 = vmatpush2.bf16.msra.mxu1 %v10084_v56  ;;  %6614 = vmatprep.subr.bf16.mxu0 %v10089_v57  ;;  %v10134_v56 = vld [vmem:[#allocation5 + $0x60c] ss:$40 sps:$4 sm:$0xff]   ;;  %v10129_v57 = vld [vmem:[#allocation5 + $0x108] ss:$40 sps:$4 sm:$0xff]  }
 0x268   :  { %6655 = vmatprep.subr.bf16.mxu1 %v10092_v2  ;;  %v10132_v2 = vld [vmem:[#allocation5 + $0x608] ss:$40 sps:$4 sm:$0xff]  }
 0x26a   :  { %6615 = vmatpush2.bf16.msra.mxu0 %v10087_v59  ;;  %v10140_v59 = vld [vmem:[#allocation5 + $0x5bc] ss:$40 sps:$4 sm:$0xff]  }
 0x26b   :  { %6656 = vmatpush2.bf16.msra.mxu1 %v10090_v14  ;;  %6616 = vmatprep.subr.bf16.mxu0 %v10095_v60  ;;  %v10135_v14 = vld [vmem:[#allocation5 + $0xb8] ss:$40 sps:$4 sm:$0xff]  }
 0x26c   :  { %6657 = vmatprep.subr.bf16.mxu1 %v10098_v61  ;;  %v10138_v60 = vld [vmem:[#allocation5 + $0x5b8] ss:$40 sps:$4 sm:$0xff]   ;;  %v10143_v61 = vld [vmem:[#allocation5 + $0x6c] ss:$40 sps:$4 sm:$0xff]  }
 0x26e   :  { %6617 = vmatpush2.bf16.msra.mxu0 %v10093_v11  ;;  %v10146_v11 = vld [vmem:[#allocation5 + $0x56c] ss:$40 sps:$4 sm:$0xff]  }
 0x26f   :  { %6658 = vmatpush2.bf16.msra.mxu1 %v10096_v62  ;;  %6618 = vmatprep.subr.bf16.mxu0 %v10101_v63  ;;  %v10141_v62 = vld [vmem:[#allocation5 + $0x68] ss:$40 sps:$4 sm:$0xff]  }
 0x270   :  { %6659 = vmatprep.subr.bf16.mxu1 %v10104_v0  ;;  %v10144_v63 = vld [vmem:[#allocation5 + $0x568] ss:$40 sps:$4 sm:$0xff]   ;;  %v10149_v0 = vld [vmem:[#allocation5 + $0x1c] ss:$40 sps:$4 sm:$0xff]  }
 0x272   :  { %6619 = vmatpush2.bf16.msra.mxu0 %v10099_v1  ;;  %v10152_v1 = vld [vmem:[#allocation5 + $0x51c] ss:$40 sps:$4 sm:$0xff]  }
 0x273   :  { %6660 = vmatpush2.bf16.msra.mxu1 %v10102_v3  ;;  %6670 = vmatprep.subr.bf16.mxu0 %v10107_v4  ;;  %v10147_v3 = vld [vmem:[#allocation5 + $0x18] ss:$40 sps:$4 sm:$0xff]  }
 0x274   :  { %6711 = vmatprep.subr.bf16.mxu1 %v10110_v5  ;;  %v10150_v4 = vld [vmem:[#allocation5 + $0x518] ss:$40 sps:$4 sm:$0xff]   ;;  %v10155_v5 = vld [vmem:[#allocation5 + $0x4cc] ss:$40 sps:$4 sm:$0xff]  }
 0x275   :  { %v6376_v20 = vpop.f32.mrf.mxu0  ;;  %6621 = vmatmul.mubr.bf16.vlgmr.msra.gmra.mxu0 %v10971_v34 }
 0x276   :  { %v6417_v21 = vpop.f32.mrf.mxu1  ;;  %6662 = vmatmul.mubr.bf16.vlgmr.msra.gmra.mxu1 %v10975_v35  ;;  %v6377_v26 = vadd.f32 %v6376_v20, %v11036_v52  ;;  %6671 = vmatpush1.bf16.msra.mxu0 %v10105_v9  ;;  %v10158_v9 = vld [vmem:[#allocation5 + $0x9cc] ss:$40 sps:$4 sm:$0xff]   ;;  %v10162_v20 = vld [vmem:[#allocation5 + $0x978] ss:$40 sps:$4 sm:$0xff]  }
 0x277   :  { %6712 = vmatpush1.bf16.msra.mxu1 %v10108_v10  ;;  %v6378_v27 = vpop.f32.mrf.mxu0  ;;  %6672 = vmatprep.subr.bf16.mxu0 %v10113_v12  ;;  %v10153_v10 = vld [vmem:[#allocation5 + $0x4c8] ss:$40 sps:$4 sm:$0xff]  }
 0x278   :  { %v6419_v46 = vpop.f32.mrf.mxu1  ;;  %6713 = vmatprep.subr.bf16.mxu1 %v10116_v13  ;;  %v11046_v31 = vadd.f32 %v6417_v21, %v6377_v26  ;;  %v6379_v32 = vadd.f32 %v6378_v27, %v11041_v58  ;;  %6702 = vmatprep.mubr.bf16.mxu0 %v10919_v47  ;;  %v10125_v58 = vld [vmem:[#allocation5 + $0x15c] ss:$40 sps:$4 sm:$0xff]   ;;  %v10156_v12 = vld [vmem:[#allocation5 + $0x9c8] ss:$40 sps:$4 sm:$0xff]   ;;  %v10167_v21 = vld [vmem:[#allocation5 + $0x42c] ss:$40 sps:$4 sm:$0xff]  }
 0x279   :  { %6743 = vmatprep.mubr.bf16.mxu1 %v10921_v51  ;;  %v6380_v39 = vpop.f32.mrf.mxu0  ;;  %v10161_v13 = vld [vmem:[#allocation5 + $0x47c] ss:$40 sps:$4 sm:$0xff]   ;;  %v10170_v26 = vld [vmem:[#allocation5 + $0x92c] ss:$40 sps:$4 sm:$0xff]   ;;  %v10165_v27 = vld [vmem:[#allocation5 + $0x428] ss:$40 sps:$4 sm:$0xff]  }
 0x27a   :  { %v6421_v52 = vpop.f32.mrf.mxu1  ;;  %v7164_v40 = vmul.f32 %v11046_v31, %v11046_v31  ;;  %v11053_v41 = vadd.f32 %v6419_v46, %v6379_v32  ;;  %6673 = vmatpush1.bf16.msra.mxu0 %v10111_v15  ;;  %v10164_v15 = vld [vmem:[#allocation5 + $0x97c] ss:$40 sps:$4 sm:$0xff]   ;;  %v10168_v46 = vld [vmem:[#allocation5 + $0x928] ss:$40 sps:$4 sm:$0xff]   ;;  %v10171_v32 = vld [vmem:[#allocation5 + $0x3d8] ss:$40 sps:$4 sm:$0xff]  }
 0x27b   :  { %6714 = vmatpush1.bf16.msra.mxu1 %v10114_v18  ;;  %v6381_v42 = vpop.f32.mrf.mxu0  ;;  %6674 = vmatprep.subr.bf16.mxu0 %v10119_v29  ;;  %v10159_v18 = vld [vmem:[#allocation5 + $0x478] ss:$40 sps:$4 sm:$0xff]   ;;  %v10173_v29 = vld [vmem:[#allocation5 + $0x3dc] ss:$40 sps:$4 sm:$0xff]   ;;  %v10182_v39 = vld [vmem:[#allocation5 + $0x88c] ss:$40 sps:$4 sm:$0xff]  }
 0x27c   :  { %v6422_v22 = vpop.f32.mrf.mxu1  ;;  %6715 = vmatprep.subr.bf16.mxu1 %v10122_v30  ;;  %v7173_v23 = vadd.f32 %v11021_v38, %v7164_v40  ;;  %v7165_v45 = vmul.f32 %v11053_v41, %v11053_v41  ;;  %v10137_v38 = vld [vmem:[#allocation5 + $0xbc] ss:$40 sps:$4 sm:$0xff]   ;;  %v10177_v52 = vld [vmem:[#allocation5 + $0x388] ss:$40 sps:$4 sm:$0xff]  }
 0x27d   :  { %v10176_v30 = vld [vmem:[#allocation5 + $0x8dc] ss:$40 sps:$4 sm:$0xff]   ;;  %v10180_v40 = vld [vmem:[#allocation5 + $0x888] ss:$40 sps:$4 sm:$0xff]  }
 0x27e   :  { %v11058_v48 = vadd.f32 %v7173_v23, %v7165_v45  ;;  %6675 = vmatpush1.bf16.msra.mxu0 %v10117_v55  ;;  %v10174_v55 = vld [vmem:[#allocation5 + $0x8d8] ss:$40 sps:$4 sm:$0xff]   ;;  %v10185_v42 = vld [vmem:[#allocation5 + $0x33c] ss:$40 sps:$4 sm:$0xff]   ;;  %v10191_v23 = vld [vmem:[#allocation5 + $0x2ec] ss:$40 sps:$4 sm:$0xff]  }
 0x27f   :  { %6716 = vmatpush1.bf16.msra.mxu1 %v10120_v33  ;;  %6676 = vmatprep.subr.bf16.mxu0 %v10125_v58  ;;  %v10179_v33 = vld [vmem:[#allocation5 + $0x38c] ss:$40 sps:$4 sm:$0xff]   ;;  %v10188_v22 = vld [vmem:[#allocation5 + $0x83c] ss:$40 sps:$4 sm:$0xff]   ;;  %v10183_v58 = vld [vmem:[#allocation5 + $0x338] ss:$40 sps:$4 sm:$0xff]  }
 0x280   :  { %6717 = vmatprep.subr.bf16.mxu1 %v10128_v43  ;;  %v10186_v43 = vld [vmem:[#allocation5 + $0x838] ss:$40 sps:$4 sm:$0xff]   ;;  %v10194_v45 = vld [vmem:[#allocation5 + $0x7ec] ss:$40 sps:$4 sm:$0xff]  }
 0x282   :  { %6677 = vmatpush1.bf16.msra.mxu0 %v10123_v49  ;;  %v10189_v49 = vld [vmem:[#allocation5 + $0x2e8] ss:$40 sps:$4 sm:$0xff]  }
 0x283   :  { %6718 = vmatpush1.bf16.msra.mxu1 %v10126_v53  ;;  %6678 = vmatprep.subr.bf16.mxu0 %v10131_v8  ;;  %v10192_v53 = vld [vmem:[#allocation5 + $0x7e8] ss:$40 sps:$4 sm:$0xff]   ;;  %v10197_v8 = vld [vmem:[#allocation5 + $0x29c] ss:$40 sps:$4 sm:$0xff]  }
 0x284   :  { %6719 = vmatprep.subr.bf16.mxu1 %v10134_v56  ;;  %v10200_v56 = vld [vmem:[#allocation5 + $0x79c] ss:$40 sps:$4 sm:$0xff]  }
 0x286   :  { %6679 = vmatpush1.bf16.msra.mxu0 %v10129_v57  ;;  %v10195_v57 = vld [vmem:[#allocation5 + $0x298] ss:$40 sps:$4 sm:$0xff]  }
 0x287   :  { %6720 = vmatpush1.bf16.msra.mxu1 %v10132_v2  ;;  %6680 = vmatprep.subr.bf16.mxu0 %v10137_v38  ;;  %v10198_v2 = vld [vmem:[#allocation5 + $0x798] ss:$40 sps:$4 sm:$0xff]   ;;  %v1058_v38 = vsub.s32 4, %v10981_v44 }
 0x288   :  { %6721 = vmatprep.subr.bf16.mxu1 %v10140_v59  ;;  %v10203_v59 = vld [vmem:[#allocation5 + $0xc4c] ss:$40 sps:$4 sm:$0xff]  }
 0x28a   :  { %6681 = vmatpush1.bf16.msra.mxu0 %v10135_v14  ;;  %v10206_v14 = vld [vmem:[#allocation5 + $0x114c] ss:$40 sps:$4 sm:$0xff]  }
 0x28b   :  { %6722 = vmatpush1.bf16.msra.mxu1 %v10138_v60  ;;  %6682 = vmatprep.subr.bf16.mxu0 %v10143_v61  ;;  %v1062_v60 = vsub.s32 5, %v10981_v44  ;;  %v11062_v61 = vld [vmem:[#allocation7] sm:$0xff] }
 0x28c   :  { %6723 = vmatprep.subr.bf16.mxu1 %v10146_v11  ;;  %v1059_v11 = vrot.slane %v11062_v61, %v1058_v38  ;;  %v10240_v38 = vld [vmem:[#allocation5 + $0xf68] ss:$40 sps:$4 sm:$0xff]  }
 0x28e   :  { %6683 = vmatpush1.bf16.msra.mxu0 %v10141_v62  ;;  %v10201_v62 = vld [vmem:[#allocation5 + $0xc48] ss:$40 sps:$4 sm:$0xff]  }
 0x28f   :  { %6724 = vmatpush1.bf16.msra.mxu1 %v10144_v63  ;;  %6684 = vmatprep.subr.bf16.mxu0 %v10149_v0  ;;  %v10204_v63 = vld [vmem:[#allocation5 + $0x1148] ss:$40 sps:$4 sm:$0xff]   ;;  %v10209_v0 = vld [vmem:[#allocation5 + $0xbfc] ss:$40 sps:$4 sm:$0xff]  }
 0x290   :  { %6725 = vmatprep.subr.bf16.mxu1 %v10152_v1  ;;  %v10212_v1 = vld [vmem:[#allocation5 + $0x10fc] ss:$40 sps:$4 sm:$0xff]  }
 0x292   :  { %6685 = vmatpush1.bf16.msra.mxu0 %v10147_v3  ;;  %v1063_v3 = vrot.slane %v11062_v61, %v1062_v60  ;;  %v10243_v60 = vld [vmem:[#allocation5 + $0xa18] ss:$40 sps:$4 sm:$0xff]  }
 0x293   :  { %6726 = vmatpush1.bf16.msra.mxu1 %v10150_v4  ;;  %6686 = vmatprep.subr.bf16.mxu0 %v10155_v5 }
 0x294   :  { %6727 = vmatprep.subr.bf16.mxu1 %v10158_v9 }
 0x296   :  { %6687 = vmatpush2.bf16.msra.mxu0 %v10153_v10  ;;  %v10207_v10 = vld [vmem:[#allocation5 + $0xbf8] ss:$40 sps:$4 sm:$0xff]  }
 0x297   :  { %6728 = vmatpush2.bf16.msra.mxu1 %v10156_v12  ;;  %6688 = vmatprep.subr.bf16.mxu0 %v10161_v13  ;;  %v10210_v12 = vld [vmem:[#allocation5 + $0x10f8] ss:$40 sps:$4 sm:$0xff]  }
 0x298   :  { %6729 = vmatprep.subr.bf16.mxu1 %v10164_v15 }
 0x29a   :  { %6689 = vmatpush2.bf16.msra.mxu0 %v10159_v18  ;;  %v10215_v18 = vld [vmem:[#allocation5 + $0xbac] ss:$40 sps:$4 sm:$0xff]  }
 0x29b   :  { %6730 = vmatpush2.bf16.msra.mxu1 %v10162_v20  ;;  %6690 = vmatprep.subr.bf16.mxu0 %v10167_v21  ;;  %v10218_v20 = vld [vmem:[#allocation5 + $0x10ac] ss:$40 sps:$4 sm:$0xff]  }
 0x29c   :  { %6731 = vmatprep.subr.bf16.mxu1 %v10170_v26 }
 0x29e   :  { %6691 = vmatpush2.bf16.msra.mxu0 %v10165_v27 }
 0x29f   :  { %6732 = vmatpush2.bf16.msra.mxu1 %v10168_v46  ;;  %6692 = vmatprep.subr.bf16.mxu0 %v10173_v29 }
 0x2a0   :  { %6733 = vmatprep.subr.bf16.mxu1 %v10176_v30  ;;  %v10213_v30 = vld [vmem:[#allocation5 + $0xba8] ss:$40 sps:$4 sm:$0xff]  }
 0x2a2   :  { %6693 = vmatpush2.bf16.msra.mxu0 %v10171_v32  ;;  %v10216_v32 = vld [vmem:[#allocation5 + $0x10a8] ss:$40 sps:$4 sm:$0xff]  }
 0x2a3   :  { %6734 = vmatpush2.bf16.msra.mxu1 %v10174_v55  ;;  %6694 = vmatprep.subr.bf16.mxu0 %v10179_v33 }
 0x2a4   :  { %6735 = vmatprep.subr.bf16.mxu1 %v10182_v39  ;;  %v10221_v39 = vld [vmem:[#allocation5 + $0xb5c] ss:$40 sps:$4 sm:$0xff]  }
 0x2a6   :  { %6695 = vmatpush2.bf16.msra.mxu0 %v10177_v52  ;;  %v10224_v52 = vld [vmem:[#allocation5 + $0x105c] ss:$40 sps:$4 sm:$0xff]  }
 0x2a7   :  { %6736 = vmatpush2.bf16.msra.mxu1 %v10180_v40  ;;  %6696 = vmatprep.subr.bf16.mxu0 %v10185_v42  ;;  %v10219_v40 = vld [vmem:[#allocation5 + $0xb58] ss:$40 sps:$4 sm:$0xff]  }
 0x2a8   :  { %6737 = vmatprep.subr.bf16.mxu1 %v10188_v22  ;;  %v10222_v42 = vld [vmem:[#allocation5 + $0x1058] ss:$40 sps:$4 sm:$0xff]   ;;  %v10227_v22 = vld [vmem:[#allocation5 + $0xb0c] ss:$40 sps:$4 sm:$0xff]  }
 0x2aa   :  { %6697 = vmatpush2.bf16.msra.mxu0 %v10183_v58  ;;  %v10230_v58 = vld [vmem:[#allocation5 + $0x100c] ss:$40 sps:$4 sm:$0xff]  }
 0x2ab   :  { %6738 = vmatpush2.bf16.msra.mxu1 %v10186_v43  ;;  %6698 = vmatprep.subr.bf16.mxu0 %v10191_v23  ;;  %v10225_v43 = vld [vmem:[#allocation5 + $0xb08] ss:$40 sps:$4 sm:$0xff]  }
 0x2ac   :  { %6739 = vmatprep.subr.bf16.mxu1 %v10194_v45  ;;  %v10228_v23 = vld [vmem:[#allocation5 + $0x1008] ss:$40 sps:$4 sm:$0xff]   ;;  %v10233_v45 = vld [vmem:[#allocation5 + $0xabc] ss:$40 sps:$4 sm:$0xff]  }
 0x2ae   :  { %6699 = vmatpush2.bf16.msra.mxu0 %v10189_v49  ;;  %v10236_v49 = vld [vmem:[#allocation5 + $0xfbc] ss:$40 sps:$4 sm:$0xff]  }
 0x2af   :  { %6740 = vmatpush2.bf16.msra.mxu1 %v10192_v53  ;;  %6700 = vmatprep.subr.bf16.mxu0 %v10197_v8  ;;  %v10231_v53 = vld [vmem:[#allocation5 + $0xab8] ss:$40 sps:$4 sm:$0xff]  }
 0x2b0   :  { %6741 = vmatprep.subr.bf16.mxu1 %v10200_v56  ;;  %v10234_v8 = vld [vmem:[#allocation5 + $0xfb8] ss:$40 sps:$4 sm:$0xff]   ;;  %v10239_v56 = vld [vmem:[#allocation5 + $0xa6c] ss:$40 sps:$4 sm:$0xff]  }
 0x2b2   :  { %6701 = vmatpush2.bf16.msra.mxu0 %v10195_v57  ;;  %v10242_v57 = vld [vmem:[#allocation5 + $0xf6c] ss:$40 sps:$4 sm:$0xff]  }
 0x2b3   :  { %6742 = vmatpush2.bf16.msra.mxu1 %v10198_v2  ;;  %6752 = vmatprep.subr.bf16.mxu0 %v10203_v59  ;;  %v10237_v2 = vld [vmem:[#allocation5 + $0xa68] ss:$40 sps:$4 sm:$0xff]   ;;  %v10245_v59 = vld [vmem:[#allocation5 + $0xa1c] ss:$40 sps:$4 sm:$0xff]  }
 0x2b4   :  { %6793 = vmatprep.subr.bf16.mxu1 %v10206_v14  ;;  %v10248_v14 = vld [vmem:[#allocation5 + $0xf1c] ss:$40 sps:$4 sm:$0xff]  }
 0x2b5   :  { %v6458_v4 = vpop.f32.mrf.mxu0  ;;  %6703 = vmatmul.mubr.bf16.vlgmr.msra.gmra.mxu0 %v10925_v6 }
 0x2b6   :  { %v6499_v5 = vpop.f32.mrf.mxu1  ;;  %6744 = vmatmul.mubr.bf16.vlgmr.msra.gmra.mxu1 %v10927_v7  ;;  %v6459_v9 = vadd.f32 %v6458_v4, %v1059_v11  ;;  %6753 = vmatpush1.bf16.msra.mxu0 %v10201_v62  ;;  %v10246_v11 = vld [vmem:[#allocation5 + $0xf18] ss:$40 sps:$4 sm:$0xff]   ;;  %v10251_v62 = vld [vmem:[#allocation5 + $0xecc] ss:$40 sps:$4 sm:$0xff]   ;;  %v10260_v4 = vld [vmem:[#allocation5 + $0x137c] ss:$40 sps:$4 sm:$0xff]  }
 0x2b7   :  { %6794 = vmatpush1.bf16.msra.mxu1 %v10204_v63  ;;  %v6460_v13 = vpop.f32.mrf.mxu0  ;;  %6754 = vmatprep.subr.bf16.mxu0 %v10209_v0  ;;  %v10254_v63 = vld [vmem:[#allocation5 + $0x13cc] ss:$40 sps:$4 sm:$0xff]   ;;  %v10249_v0 = vld [vmem:[#allocation5 + $0xec8] ss:$40 sps:$4 sm:$0xff]  }
 0x2b8   :  { %v6501_v15 = vpop.f32.mrf.mxu1  ;;  %6795 = vmatprep.subr.bf16.mxu1 %v10212_v1  ;;  %v11068_v21 = vadd.f32 %v6499_v5, %v6459_v9  ;;  %v6461_v26 = vadd.f32 %v6460_v13, %v1063_v3  ;;  %6784 = vmatprep.mubr.bf16.mxu0 %v10937_v36  ;;  %v10252_v1 = vld [vmem:[#allocation5 + $0x13c8] ss:$40 sps:$4 sm:$0xff]   ;;  %v10257_v3 = vld [vmem:[#allocation5 + $0xe7c] ss:$40 sps:$4 sm:$0xff]   ;;  %v10255_v5 = vld [vmem:[#allocation5 + $0xe78] ss:$40 sps:$4 sm:$0xff]  }
 0x2b9   :  { %6825 = vmatprep.mubr.bf16.mxu1 %v10941_v37  ;;  %v6462_v27 = vpop.f32.mrf.mxu0  ;;  %v10258_v9 = vld [vmem:[#allocation5 + $0x1378] ss:$40 sps:$4 sm:$0xff]   ;;  %v10261_v13 = vld [vmem:[#allocation5 + $0xe28] ss:$40 sps:$4 sm:$0xff]  }
 0x2ba   :  { %v6503_v46 = vpop.f32.mrf.mxu1  ;;  %v11072_v29 = vadd.f32 %v6501_v15, %v6461_v26  ;;  %6755 = vmatpush1.bf16.msra.mxu0 %v10207_v10  ;;  %v10263_v10 = vld [vmem:[#allocation5 + $0xe2c] ss:$40 sps:$4 sm:$0xff]   ;;  %v10264_v15 = vld [vmem:[#allocation5 + $0x1328] ss:$40 sps:$4 sm:$0xff]   ;;  %v10267_v26 = vld [vmem:[#allocation5 + $0xdd8] ss:$40 sps:$4 sm:$0xff]  }
 0x2bb   :  { %6796 = vmatpush1.bf16.msra.mxu1 %v10210_v12  ;;  %v6463_v55 = vpop.f32.mrf.mxu0  ;;  %6756 = vmatprep.subr.bf16.mxu0 %v10215_v18  ;;  %v10266_v12 = vld [vmem:[#allocation5 + $0x132c] ss:$40 sps:$4 sm:$0xff]   ;;  %v10269_v18 = vld [vmem:[#allocation5 + $0xddc] ss:$40 sps:$4 sm:$0xff]   ;;  %v10270_v27 = vld [vmem:[#allocation5 + $0x12d8] ss:$40 sps:$4 sm:$0xff]  }
 0x2bc   :  { %v6504_v33 = vpop.f32.mrf.mxu1  ;;  %6797 = vmatprep.subr.bf16.mxu1 %v10218_v20  ;;  %v10272_v20 = vld [vmem:[#allocation5 + $0x12dc] ss:$40 sps:$4 sm:$0xff]   ;;  %v10275_v46 = vld [vmem:[#allocation5 + $0xd8c] ss:$40 sps:$4 sm:$0xff]   ;;  %v10276_v55 = vld [vmem:[#allocation5 + $0x1288] ss:$40 sps:$4 sm:$0xff]  }
 0x2bd   :  { %v10281_v33 = vld [vmem:[#allocation5 + $0xd3c] ss:$40 sps:$4 sm:$0xff]  }
 0x2be   :  { %6757 = vmatpush1.bf16.msra.mxu0 %v10213_v30  ;;  %v10278_v30 = vld [vmem:[#allocation5 + $0x128c] ss:$40 sps:$4 sm:$0xff]  }
 0x2bf   :  { %6798 = vmatpush1.bf16.msra.mxu1 %v10216_v32  ;;  %6758 = vmatprep.subr.bf16.mxu0 %v10221_v39  ;;  %v10273_v32 = vld [vmem:[#allocation5 + $0xd88] ss:$40 sps:$4 sm:$0xff]   ;;  %v10284_v39 = vld [vmem:[#allocation5 + $0x123c] ss:$40 sps:$4 sm:$0xff]  }
 0x2c0   :  { %6799 = vmatprep.subr.bf16.mxu1 %v10224_v52  ;;  %v10279_v52 = vld [vmem:[#allocation5 + $0xd38] ss:$40 sps:$4 sm:$0xff]  }
 0x2c2   :  { %6759 = vmatpush1.bf16.msra.mxu0 %v10219_v40  ;;  %v10282_v40 = vld [vmem:[#allocation5 + $0x1238] ss:$40 sps:$4 sm:$0xff]  }
 0x2c3   :  { %6800 = vmatpush1.bf16.msra.mxu1 %v10222_v42  ;;  %6760 = vmatprep.subr.bf16.mxu0 %v10227_v22  ;;  %v10287_v42 = vld [vmem:[#allocation5 + $0xcec] ss:$40 sps:$4 sm:$0xff]  }
 0x2c4   :  { %6801 = vmatprep.subr.bf16.mxu1 %v10230_v58  ;;  %v10290_v22 = vld [vmem:[#allocation5 + $0x11ec] ss:$40 sps:$4 sm:$0xff]   ;;  %v10285_v58 = vld [vmem:[#allocation5 + $0xce8] ss:$40 sps:$4 sm:$0xff]  }
 0x2c6   :  { %6761 = vmatpush1.bf16.msra.mxu0 %v10225_v43  ;;  %v10288_v43 = vld [vmem:[#allocation5 + $0x11e8] ss:$40 sps:$4 sm:$0xff]  }
 0x2c7   :  { %6802 = vmatpush1.bf16.msra.mxu1 %v10228_v23  ;;  %6762 = vmatprep.subr.bf16.mxu0 %v10233_v45  ;;  %v10293_v23 = vld [vmem:[#allocation5 + $0xc9c] ss:$40 sps:$4 sm:$0xff]  }
 0x2c8   :  { %6803 = vmatprep.subr.bf16.mxu1 %v10236_v49  ;;  %v10296_v45 = vld [vmem:[#allocation5 + $0x119c] ss:$40 sps:$4 sm:$0xff]   ;;  %v10291_v49 = vld [vmem:[#allocation5 + $0xc98] ss:$40 sps:$4 sm:$0xff]  }
 0x2ca   :  { %6763 = vmatpush1.bf16.msra.mxu0 %v10231_v53  ;;  %v10294_v53 = vld [vmem:[#allocation5 + $0x1198] ss:$40 sps:$4 sm:$0xff]  }
 0x2cb   :  { %6804 = vmatpush1.bf16.msra.mxu1 %v10234_v8  ;;  %6764 = vmatprep.subr.bf16.mxu0 %v10239_v56  ;;  %v10299_v8 = vld [vmem:[#allocation5 + $0x164c] ss:$40 sps:$4 sm:$0xff]  }
 0x2cc   :  { %6805 = vmatprep.subr.bf16.mxu1 %v10242_v57  ;;  %v10302_v56 = vld [vmem:[#allocation5 + $0x1b4c] ss:$40 sps:$4 sm:$0xff]   ;;  %v10297_v57 = vld [vmem:[#allocation5 + $0x1648] ss:$40 sps:$4 sm:$0xff]  }
 0x2ce   :  { %6765 = vmatpush1.bf16.msra.mxu0 %v10237_v2  ;;  %v10300_v2 = vld [vmem:[#allocation5 + $0x1b48] ss:$40 sps:$4 sm:$0xff]  }
 0x2cf   :  { %6806 = vmatpush1.bf16.msra.mxu1 %v10240_v38  ;;  %6766 = vmatprep.subr.bf16.mxu0 %v10245_v59  ;;  %v1066_v38 = vsub.s32 6, %v10981_v44  ;;  %v10305_v59 = vld [vmem:[#allocation5 + $0x15fc] ss:$40 sps:$4 sm:$0xff]  }
 0x2d0   :  { %6807 = vmatprep.subr.bf16.mxu1 %v10248_v14  ;;  %v10308_v14 = vld [vmem:[#allocation5 + $0x1afc] ss:$40 sps:$4 sm:$0xff]  }
 0x2d2   :  { %6767 = vmatpush1.bf16.msra.mxu0 %v10243_v60  ;;  %v11076_v60 = vrot.slane %v11062_v61, %v1066_v38  ;;  %v10350_v38 = vld [vmem:[#allocation5 + $0x1dcc] ss:$40 sps:$4 sm:$0xff]  }
 0x2d3   :  { %6808 = vmatpush1.bf16.msra.mxu1 %v10246_v11  ;;  %6768 = vmatprep.subr.bf16.mxu0 %v10251_v62 }
 0x2d4   :  { %6809 = vmatprep.subr.bf16.mxu1 %v10254_v63 }
 0x2d6   :  { %6769 = vmatpush2.bf16.msra.mxu0 %v10249_v0  ;;  %v10303_v0 = vld [vmem:[#allocation5 + $0x15f8] ss:$40 sps:$4 sm:$0xff]  }
 0x2d7   :  { %6810 = vmatpush2.bf16.msra.mxu1 %v10252_v1  ;;  %6770 = vmatprep.subr.bf16.mxu0 %v10257_v3  ;;  %v10306_v1 = vld [vmem:[#allocation5 + $0x1af8] ss:$40 sps:$4 sm:$0xff]  }
 0x2d8   :  { %6811 = vmatprep.subr.bf16.mxu1 %v10260_v4 }
 0x2da   :  { %6771 = vmatpush2.bf16.msra.mxu0 %v10255_v5  ;;  %v10311_v5 = vld [vmem:[#allocation5 + $0x15ac] ss:$40 sps:$4 sm:$0xff]  }
 0x2db   :  { %6812 = vmatpush2.bf16.msra.mxu1 %v10258_v9  ;;  %6772 = vmatprep.subr.bf16.mxu0 %v10263_v10  ;;  %v10314_v9 = vld [vmem:[#allocation5 + $0x1aac] ss:$40 sps:$4 sm:$0xff]  }
 0x2dc   :  { %6813 = vmatprep.subr.bf16.mxu1 %v10266_v12 }
 0x2de   :  { %6773 = vmatpush2.bf16.msra.mxu0 %v10261_v13 }
 0x2df   :  { %6814 = vmatpush2.bf16.msra.mxu1 %v10264_v15  ;;  %6774 = vmatprep.subr.bf16.mxu0 %v10269_v18  ;;  %v10309_v18 = vld [vmem:[#allocation5 + $0x15a8] ss:$40 sps:$4 sm:$0xff]  }
 0x2e0   :  { %6815 = vmatprep.subr.bf16.mxu1 %v10272_v20  ;;  %v10312_v20 = vld [vmem:[#allocation5 + $0x1aa8] ss:$40 sps:$4 sm:$0xff]  }
 0x2e2   :  { %6775 = vmatpush2.bf16.msra.mxu0 %v10267_v26 }
 0x2e3   :  { %6816 = vmatpush2.bf16.msra.mxu1 %v10270_v27  ;;  %6776 = vmatprep.subr.bf16.mxu0 %v10275_v46  ;;  %v10317_v46 = vld [vmem:[#allocation5 + $0x155c] ss:$40 sps:$4 sm:$0xff]  }
 0x2e4   :  { %6817 = vmatprep.subr.bf16.mxu1 %v10278_v30  ;;  %v10320_v30 = vld [vmem:[#allocation5 + $0x1a5c] ss:$40 sps:$4 sm:$0xff]  }
 0x2e6   :  { %6777 = vmatpush2.bf16.msra.mxu0 %v10273_v32  ;;  %v10318_v32 = vld [vmem:[#allocation5 + $0x1a58] ss:$40 sps:$4 sm:$0xff]  }
 0x2e7   :  { %6818 = vmatpush2.bf16.msra.mxu1 %v10276_v55  ;;  %6778 = vmatprep.subr.bf16.mxu0 %v10281_v33  ;;  %v10323_v55 = vld [vmem:[#allocation5 + $0x150c] ss:$40 sps:$4 sm:$0xff]  }
 0x2e8   :  { %6819 = vmatprep.subr.bf16.mxu1 %v10284_v39  ;;  %v10326_v33 = vld [vmem:[#allocation5 + $0x1a0c] ss:$40 sps:$4 sm:$0xff]   ;;  %v10321_v39 = vld [vmem:[#allocation5 + $0x1508] ss:$40 sps:$4 sm:$0xff]  }
 0x2ea   :  { %6779 = vmatpush2.bf16.msra.mxu0 %v10279_v52  ;;  %v10324_v52 = vld [vmem:[#allocation5 + $0x1a08] ss:$40 sps:$4 sm:$0xff]  }
 0x2eb   :  { %6820 = vmatpush2.bf16.msra.mxu1 %v10282_v40  ;;  %6780 = vmatprep.subr.bf16.mxu0 %v10287_v42  ;;  %v10329_v40 = vld [vmem:[#allocation5 + $0x14bc] ss:$40 sps:$4 sm:$0xff]  }
 0x2ec   :  { %6821 = vmatprep.subr.bf16.mxu1 %v10290_v22  ;;  %v10332_v42 = vld [vmem:[#allocation5 + $0x19bc] ss:$40 sps:$4 sm:$0xff]   ;;  %v10327_v22 = vld [vmem:[#allocation5 + $0x14b8] ss:$40 sps:$4 sm:$0xff]  }
 0x2ee   :  { %6781 = vmatpush2.bf16.msra.mxu0 %v10285_v58  ;;  %v10330_v58 = vld [vmem:[#allocation5 + $0x19b8] ss:$40 sps:$4 sm:$0xff]  }
 0x2ef   :  { %6822 = vmatpush2.bf16.msra.mxu1 %v10288_v43  ;;  %6782 = vmatprep.subr.bf16.mxu0 %v10293_v23  ;;  %v10335_v43 = vld [vmem:[#allocation5 + $0x146c] ss:$40 sps:$4 sm:$0xff]  }
 0x2f0   :  { %6823 = vmatprep.subr.bf16.mxu1 %v10296_v45  ;;  %v10338_v23 = vld [vmem:[#allocation5 + $0x196c] ss:$40 sps:$4 sm:$0xff]   ;;  %v10333_v45 = vld [vmem:[#allocation5 + $0x1468] ss:$40 sps:$4 sm:$0xff]  }
 0x2f2   :  { %6783 = vmatpush2.bf16.msra.mxu0 %v10291_v49  ;;  %v10336_v49 = vld [vmem:[#allocation5 + $0x1968] ss:$40 sps:$4 sm:$0xff]  }
 0x2f3   :  { %6824 = vmatpush2.bf16.msra.mxu1 %v10294_v53  ;;  %6834 = vmatprep.subr.bf16.mxu0 %v10299_v8  ;;  %v10341_v53 = vld [vmem:[#allocation5 + $0x141c] ss:$40 sps:$4 sm:$0xff]  }
 0x2f4   :  { %6875 = vmatprep.subr.bf16.mxu1 %v10302_v56  ;;  %v10344_v8 = vld [vmem:[#allocation5 + $0x191c] ss:$40 sps:$4 sm:$0xff]   ;;  %v10339_v56 = vld [vmem:[#allocation5 + $0x1418] ss:$40 sps:$4 sm:$0xff]  }
 0x2f5   :  { %v6540_v11 = vpop.f32.mrf.mxu0  ;;  %6785 = vmatmul.mubr.bf16.vlgmr.msra.gmra.mxu0 %v10947_v16 }
 0x2f6   :  { %v6581_v62 = vpop.f32.mrf.mxu1  ;;  %6826 = vmatmul.mubr.bf16.vlgmr.msra.gmra.mxu1 %v10951_v17  ;;  %v6541_v63 = vadd.f32 %v6540_v11, %v11068_v21  ;;  %6835 = vmatpush1.bf16.msra.mxu0 %v10297_v57  ;;  %v10342_v57 = vld [vmem:[#allocation5 + $0x1918] ss:$40 sps:$4 sm:$0xff]   ;;  %v10353_v11 = vld [vmem:[#allocation5 + $0x187c] ss:$40 sps:$4 sm:$0xff]  }
 0x2f7   :  { %6876 = vmatpush1.bf16.msra.mxu1 %v10300_v2  ;;  %v6542_v3 = vpop.f32.mrf.mxu0  ;;  %6836 = vmatprep.subr.bf16.mxu0 %v10305_v59  ;;  %v10347_v2 = vld [vmem:[#allocation5 + $0x18cc] ss:$40 sps:$4 sm:$0xff]   ;;  %v10345_v59 = vld [vmem:[#allocation5 + $0x18c8] ss:$40 sps:$4 sm:$0xff]  }
 0x2f8   :  { %v6583_v4 = vpop.f32.mrf.mxu1  ;;  %6877 = vmatprep.subr.bf16.mxu1 %v10308_v14  ;;  %v11081_v10 = vadd.f32 %v6581_v62, %v6541_v63  ;;  %v6543_v12 = vadd.f32 %v6542_v3, %v11072_v29  ;;  %6866 = vmatprep.mubr.bf16.mxu0 %v10959_v24  ;;  %v10315_v29 = vld [vmem:[#allocation5 + $0x1558] ss:$40 sps:$4 sm:$0xff]   ;;  %v10348_v14 = vld [vmem:[#allocation5 + $0x1dc8] ss:$40 sps:$4 sm:$0xff]   ;;  %v10356_v62 = vld [vmem:[#allocation5 + $0x1d7c] ss:$40 sps:$4 sm:$0xff]  }
 0x2f9   :  { %6907 = vmatprep.mubr.bf16.mxu1 %v10963_v25  ;;  %v6544_v13 = vpop.f32.mrf.mxu0  ;;  %v10351_v63 = vld [vmem:[#allocation5 + $0x1878] ss:$40 sps:$4 sm:$0xff]   ;;  %v10362_v3 = vld [vmem:[#allocation5 + $0x1d2c] ss:$40 sps:$4 sm:$0xff]  }
 0x2fa   :  { %v6585_v21 = vpop.f32.mrf.mxu1  ;;  %v11086_v15 = vadd.f32 %v6583_v4, %v6543_v12  ;;  %6837 = vmatpush1.bf16.msra.mxu0 %v10303_v0  ;;  %v10354_v0 = vld [vmem:[#allocation5 + $0x1d78] ss:$40 sps:$4 sm:$0xff]   ;;  %v10357_v4 = vld [vmem:[#allocation5 + $0x1828] ss:$40 sps:$4 sm:$0xff]   ;;  %v10368_v12 = vld [vmem:[#allocation5 + $0x1cdc] ss:$40 sps:$4 sm:$0xff]  }
 0x2fb   :  { %6878 = vmatpush1.bf16.msra.mxu1 %v10306_v1  ;;  %v6545_v26 = vpop.f32.mrf.mxu0  ;;  %6838 = vmatprep.subr.bf16.mxu0 %v10311_v5  ;;  %v10359_v1 = vld [vmem:[#allocation5 + $0x182c] ss:$40 sps:$4 sm:$0xff]   ;;  %v10360_v5 = vld [vmem:[#allocation5 + $0x1d28] ss:$40 sps:$4 sm:$0xff]   ;;  %v10363_v13 = vld [vmem:[#allocation5 + $0x17d8] ss:$40 sps:$4 sm:$0xff]  }
 0x2fc   :  { %v6586_v27 = vpop.f32.mrf.mxu1  ;;  %6879 = vmatprep.subr.bf16.mxu1 %v10314_v9  ;;  %v10365_v9 = vld [vmem:[#allocation5 + $0x17dc] ss:$40 sps:$4 sm:$0xff]   ;;  %v10366_v21 = vld [vmem:[#allocation5 + $0x1cd8] ss:$40 sps:$4 sm:$0xff]   ;;  %v10369_v26 = vld [vmem:[#allocation5 + $0x1788] ss:$40 sps:$4 sm:$0xff]  }
 0x2fd   :  { %v10372_v27 = vld [vmem:[#allocation5 + $0x1c88] ss:$40 sps:$4 sm:$0xff]  }
 0x2fe   :  { %6839 = vmatpush1.bf16.msra.mxu0 %v10309_v18  ;;  %v10371_v18 = vld [vmem:[#allocation5 + $0x178c] ss:$40 sps:$4 sm:$0xff]  }
 0x2ff   :  { %6880 = vmatpush1.bf16.msra.mxu1 %v10312_v20  ;;  %6840 = vmatprep.subr.bf16.mxu0 %v10317_v46  ;;  %v10374_v20 = vld [vmem:[#allocation5 + $0x1c8c] ss:$40 sps:$4 sm:$0xff]   ;;  %v10377_v46 = vld [vmem:[#allocation5 + $0x173c] ss:$40 sps:$4 sm:$0xff]  }
 0x300   :  { %6881 = vmatprep.subr.bf16.mxu1 %v10320_v30  ;;  %v10380_v30 = vld [vmem:[#allocation5 + $0x1c3c] ss:$40 sps:$4 sm:$0xff]  }
 0x302   :  { %6841 = vmatpush1.bf16.msra.mxu0 %v10315_v29  ;;  %v10375_v29 = vld [vmem:[#allocation5 + $0x1738] ss:$40 sps:$4 sm:$0xff]  }
 0x303   :  { %6882 = vmatpush1.bf16.msra.mxu1 %v10318_v32  ;;  %6842 = vmatprep.subr.bf16.mxu0 %v10323_v55  ;;  %v10378_v32 = vld [vmem:[#allocation5 + $0x1c38] ss:$40 sps:$4 sm:$0xff]   ;;  %v10383_v55 = vld [vmem:[#allocation5 + $0x16ec] ss:$40 sps:$4 sm:$0xff]  }
 0x304   :  { %6883 = vmatprep.subr.bf16.mxu1 %v10326_v33  ;;  %v10386_v33 = vld [vmem:[#allocation5 + $0x1bec] ss:$40 sps:$4 sm:$0xff]  }
 0x306   :  { %6843 = vmatpush1.bf16.msra.mxu0 %v10321_v39  ;;  %v10381_v39 = vld [vmem:[#allocation5 + $0x16e8] ss:$40 sps:$4 sm:$0xff]  }
 0x307   :  { %6884 = vmatpush1.bf16.msra.mxu1 %v10324_v52  ;;  %6844 = vmatprep.subr.bf16.mxu0 %v10329_v40  ;;  %v10384_v52 = vld [vmem:[#allocation5 + $0x1be8] ss:$40 sps:$4 sm:$0xff]   ;;  %v10389_v40 = vld [vmem:[#allocation5 + $0x169c] ss:$40 sps:$4 sm:$0xff]  }
 0x308   :  { %6885 = vmatprep.subr.bf16.mxu1 %v10332_v42  ;;  %v10392_v42 = vld [vmem:[#allocation5 + $0x1b9c] ss:$40 sps:$4 sm:$0xff]  }
 0x30a   :  { %6845 = vmatpush1.bf16.msra.mxu0 %v10327_v22  ;;  %v10387_v22 = vld [vmem:[#allocation5 + $0x1698] ss:$40 sps:$4 sm:$0xff]  }
 0x30b   :  { %6886 = vmatpush1.bf16.msra.mxu1 %v10330_v58  ;;  %6846 = vmatprep.subr.bf16.mxu0 %v10335_v43  ;;  %v10390_v58 = vld [vmem:[#allocation5 + $0x1b98] ss:$40 sps:$4 sm:$0xff]   ;;  %v10395_v43 = vld [vmem:[#allocation5 + $0x254] ss:$40 sps:$4 sm:$0xff]  }
 0x30c   :  { %6887 = vmatprep.subr.bf16.mxu1 %v10338_v23  ;;  %v10398_v23 = vld [vmem:[#allocation5 + $0x754] ss:$40 sps:$4 sm:$0xff]  }
 0x30e   :  { %6847 = vmatpush1.bf16.msra.mxu0 %v10333_v45  ;;  %v10393_v45 = vld [vmem:[#allocation5 + $0x250] ss:$40 sps:$4 sm:$0xff]  }
 0x30f   :  { %6888 = vmatpush1.bf16.msra.mxu1 %v10336_v49  ;;  %6848 = vmatprep.subr.bf16.mxu0 %v10341_v53  ;;  %v10396_v49 = vld [vmem:[#allocation5 + $0x750] ss:$40 sps:$4 sm:$0xff]   ;;  %v10401_v53 = vld [vmem:[#allocation5 + $0x204] ss:$40 sps:$4 sm:$0xff]  }
 0x310   :  { %6889 = vmatprep.subr.bf16.mxu1 %v10344_v8  ;;  %v10404_v8 = vld [vmem:[#allocation5 + $0x704] ss:$40 sps:$4 sm:$0xff]  }
 0x312   :  { %6849 = vmatpush1.bf16.msra.mxu0 %v10339_v56 }
 0x313   :  { %6890 = vmatpush1.bf16.msra.mxu1 %v10342_v57  ;;  %6850 = vmatprep.subr.bf16.mxu0 %v10347_v2 }
 0x314   :  { %6891 = vmatprep.subr.bf16.mxu1 %v10350_v38  ;;  %v10399_v38 = vld [vmem:[#allocation5 + $0x200] ss:$40 sps:$4 sm:$0xff]  }
 0x316   :  { %6851 = vmatpush2.bf16.msra.mxu0 %v10345_v59  ;;  %v10402_v59 = vld [vmem:[#allocation5 + $0x700] ss:$40 sps:$4 sm:$0xff]  }
 0x317   :  { %6892 = vmatpush2.bf16.msra.mxu1 %v10348_v14  ;;  %6852 = vmatprep.subr.bf16.mxu0 %v10353_v11 }
 0x318   :  { %6893 = vmatprep.subr.bf16.mxu1 %v10356_v62  ;;  %v10407_v62 = vld [vmem:[#allocation5 + $0x1b4] ss:$40 sps:$4 sm:$0xff]  }
 0x31a   :  { %6853 = vmatpush2.bf16.msra.mxu0 %v10351_v63  ;;  %v10410_v63 = vld [vmem:[#allocation5 + $0x6b4] ss:$40 sps:$4 sm:$0xff]  }
 0x31b   :  { %6894 = vmatpush2.bf16.msra.mxu1 %v10354_v0  ;;  %6854 = vmatprep.subr.bf16.mxu0 %v10359_v1 }
 0x31c   :  { %6895 = vmatprep.subr.bf16.mxu1 %v10362_v3 }
 0x31e   :  { %6855 = vmatpush2.bf16.msra.mxu0 %v10357_v4 }
 0x31f   :  { %6896 = vmatpush2.bf16.msra.mxu1 %v10360_v5  ;;  %6856 = vmatprep.subr.bf16.mxu0 %v10365_v9  ;;  %v10405_v9 = vld [vmem:[#allocation5 + $0x1b0] ss:$40 sps:$4 sm:$0xff]  }
 0x320   :  { %6897 = vmatprep.subr.bf16.mxu1 %v10368_v12  ;;  %v10408_v12 = vld [vmem:[#allocation5 + $0x6b0] ss:$40 sps:$4 sm:$0xff]  }
 0x322   :  { %6857 = vmatpush2.bf16.msra.mxu0 %v10363_v13 }
 0x323   :  { %6898 = vmatpush2.bf16.msra.mxu1 %v10366_v21  ;;  %6858 = vmatprep.subr.bf16.mxu0 %v10371_v18  ;;  %v10416_v18 = vld [vmem:[#allocation5 + $0x664] ss:$40 sps:$4 sm:$0xff]  }
 0x324   :  { %6899 = vmatprep.subr.bf16.mxu1 %v10374_v20 }
 0x326   :  { %6859 = vmatpush2.bf16.msra.mxu0 %v10369_v26  ;;  %v10411_v26 = vld [vmem:[#allocation5 + $0x160] ss:$40 sps:$4 sm:$0xff]  }
 0x327   :  { %6900 = vmatpush2.bf16.msra.mxu1 %v10372_v27  ;;  %6860 = vmatprep.subr.bf16.mxu0 %v10377_v46  ;;  %v10414_v27 = vld [vmem:[#allocation5 + $0x660] ss:$40 sps:$4 sm:$0xff]   ;;  %v10419_v46 = vld [vmem:[#allocation5 + $0x114] ss:$40 sps:$4 sm:$0xff]  }
 0x328   :  { %6901 = vmatprep.subr.bf16.mxu1 %v10380_v30  ;;  %v10422_v30 = vld [vmem:[#allocation5 + $0x614] ss:$40 sps:$4 sm:$0xff]  }
 0x32a   :  { %6861 = vmatpush2.bf16.msra.mxu0 %v10375_v29  ;;  %v10417_v29 = vld [vmem:[#allocation5 + $0x110] ss:$40 sps:$4 sm:$0xff]  }
 0x32b   :  { %6902 = vmatpush2.bf16.msra.mxu1 %v10378_v32  ;;  %6862 = vmatprep.subr.bf16.mxu0 %v10383_v55  ;;  %v10420_v32 = vld [vmem:[#allocation5 + $0x610] ss:$40 sps:$4 sm:$0xff]   ;;  %v10428_v55 = vld [vmem:[#allocation5 + $0x5c4] ss:$40 sps:$4 sm:$0xff]  }
 0x32c   :  { %6903 = vmatprep.subr.bf16.mxu1 %v10386_v33  ;;  %v10423_v33 = vld [vmem:[#allocation5 + $0xc0] ss:$40 sps:$4 sm:$0xff]  }
 0x32e   :  { %6863 = vmatpush2.bf16.msra.mxu0 %v10381_v39  ;;  %v10426_v39 = vld [vmem:[#allocation5 + $0x5c0] ss:$40 sps:$4 sm:$0xff]  }
 0x32f   :  { %6904 = vmatpush2.bf16.msra.mxu1 %v10384_v52  ;;  %6864 = vmatprep.subr.bf16.mxu0 %v10389_v40  ;;  %v10431_v52 = vld [vmem:[#allocation5 + $0x74] ss:$40 sps:$4 sm:$0xff]  }
 0x330   :  { %6905 = vmatprep.subr.bf16.mxu1 %v10392_v42  ;;  %v10434_v40 = vld [vmem:[#allocation5 + $0x574] ss:$40 sps:$4 sm:$0xff]   ;;  %v10429_v42 = vld [vmem:[#allocation5 + $0x70] ss:$40 sps:$4 sm:$0xff]  }
 0x332   :  { %6865 = vmatpush2.bf16.msra.mxu0 %v10387_v22  ;;  %v10432_v22 = vld [vmem:[#allocation5 + $0x570] ss:$40 sps:$4 sm:$0xff]  }
 0x333   :  { %6906 = vmatpush2.bf16.msra.mxu1 %v10390_v58  ;;  %6916 = vmatprep.subr.bf16.mxu0 %v10395_v43  ;;  %v10437_v58 = vld [vmem:[#allocation5 + $0x24] ss:$40 sps:$4 sm:$0xff]  }
 0x334   :  { %6957 = vmatprep.subr.bf16.mxu1 %v10398_v23  ;;  %v10440_v43 = vld [vmem:[#allocation5 + $0x524] ss:$40 sps:$4 sm:$0xff]   ;;  %v10435_v23 = vld [vmem:[#allocation5 + $0x20] ss:$40 sps:$4 sm:$0xff]  }
 0x335   :  { %v6622_v56 = vpop.f32.mrf.mxu0  ;;  %6867 = vmatmul.mubr.bf16.vlgmr.msra.gmra.mxu0 %v10971_v34 }
 0x336   :  { %v6663_v57 = vpop.f32.mrf.mxu1  ;;  %6908 = vmatmul.mubr.bf16.vlgmr.msra.gmra.mxu1 %v10975_v35  ;;  %v6623_v2 = vadd.f32 %v6622_v56, %v11081_v10  ;;  %6917 = vmatpush1.bf16.msra.mxu0 %v10393_v45  ;;  %v10438_v45 = vld [vmem:[#allocation5 + $0x520] ss:$40 sps:$4 sm:$0xff]   ;;  %v10444_v56 = vld [vmem:[#allocation5 + $0x9d0] ss:$40 sps:$4 sm:$0xff]  }
 0x337   :  { %6958 = vmatpush1.bf16.msra.mxu1 %v10396_v49  ;;  %v6624_v14 = vpop.f32.mrf.mxu0  ;;  %6918 = vmatprep.subr.bf16.mxu0 %v10401_v53  ;;  %v10443_v49 = vld [vmem:[#allocation5 + $0x4d4] ss:$40 sps:$4 sm:$0xff]  }
 0x338   :  { %v6665_v11 = vpop.f32.mrf.mxu1  ;;  %6959 = vmatprep.subr.bf16.mxu1 %v10404_v8  ;;  %v11091_v0 = vadd.f32 %v6663_v57, %v6623_v2  ;;  %v6625_v1 = vadd.f32 %v6624_v14, %v11086_v15  ;;  %6948 = vmatprep.mubr.bf16.mxu0 %v10919_v47  ;;  %v10413_v15 = vld [vmem:[#allocation5 + $0x164] ss:$40 sps:$4 sm:$0xff]   ;;  %v10446_v53 = vld [vmem:[#allocation5 + $0x9d4] ss:$40 sps:$4 sm:$0xff]   ;;  %v10441_v8 = vld [vmem:[#allocation5 + $0x4d0] ss:$40 sps:$4 sm:$0xff]  }
 0x339   :  { %6989 = vmatprep.mubr.bf16.mxu1 %v10921_v51  ;;  %v6626_v3 = vpop.f32.mrf.mxu0  ;;  %v10449_v57 = vld [vmem:[#allocation5 + $0x484] ss:$40 sps:$4 sm:$0xff]   ;;  %v10455_v14 = vld [vmem:[#allocation5 + $0x434] ss:$40 sps:$4 sm:$0xff]  }
 0x33a   :  { %v6667_v10 = vpop.f32.mrf.mxu1  ;;  %v7166_v4 = vmul.f32 %v11091_v0, %v11091_v0  ;;  %v11098_v5 = vadd.f32 %v6665_v11, %v6625_v1  ;;  %6919 = vmatpush1.bf16.msra.mxu0 %v10399_v38  ;;  %v10452_v2 = vld [vmem:[#allocation5 + $0x984] ss:$40 sps:$4 sm:$0xff]   ;;  %v10447_v38 = vld [vmem:[#allocation5 + $0x480] ss:$40 sps:$4 sm:$0xff]   ;;  %v10458_v11 = vld [vmem:[#allocation5 + $0x934] ss:$40 sps:$4 sm:$0xff]  }
 0x33b   :  { %6960 = vmatpush1.bf16.msra.mxu1 %v10402_v59  ;;  %v6627_v13 = vpop.f32.mrf.mxu0  ;;  %6920 = vmatprep.subr.bf16.mxu0 %v10407_v62  ;;  %v10450_v59 = vld [vmem:[#allocation5 + $0x980] ss:$40 sps:$4 sm:$0xff]   ;;  %v10453_v62 = vld [vmem:[#allocation5 + $0x430] ss:$40 sps:$4 sm:$0xff]   ;;  %v10461_v1 = vld [vmem:[#allocation5 + $0x3e4] ss:$40 sps:$4 sm:$0xff]  }
 0x33c   :  { %v6668_v21 = vpop.f32.mrf.mxu1  ;;  %6961 = vmatprep.subr.bf16.mxu1 %v10410_v63  ;;  %v7175_v47 = vadd.f32 %v11058_v48, %v7166_v4  ;;  %v7167_v51 = vmul.f32 %v11098_v5, %v11098_v5  ;;  %v10425_v48 = vld [vmem:[#allocation5 + $0xc4] ss:$40 sps:$4 sm:$0xff]   ;;  %v10456_v63 = vld [vmem:[#allocation5 + $0x930] ss:$40 sps:$4 sm:$0xff]   ;;  %v10459_v10 = vld [vmem:[#allocation5 + $0x3e0] ss:$40 sps:$4 sm:$0xff]  }
 0x33d   :  { %v10464_v3 = vld [vmem:[#allocation5 + $0x8e4] ss:$40 sps:$4 sm:$0xff]   ;;  %v10462_v4 = vld [vmem:[#allocation5 + $0x8e0] ss:$40 sps:$4 sm:$0xff]   ;;  %v10465_v13 = vld [vmem:[#allocation5 + $0x390] ss:$40 sps:$4 sm:$0xff]  }
 0x33e   :  { %v11103_v20 = vadd.f32 %v7175_v47, %v7167_v51  ;;  %6921 = vmatpush1.bf16.msra.mxu0 %v10405_v9  ;;  %v10467_v9 = vld [vmem:[#allocation5 + $0x394] ss:$40 sps:$4 sm:$0xff]   ;;  %v10468_v21 = vld [vmem:[#allocation5 + $0x890] ss:$40 sps:$4 sm:$0xff]   ;;  %v10471_v47 = vld [vmem:[#allocation5 + $0x340] ss:$40 sps:$4 sm:$0xff]  }
 0x33f   :  { %6962 = vmatpush1.bf16.msra.mxu1 %v10408_v12  ;;  %6922 = vmatprep.subr.bf16.mxu0 %v10413_v15  ;;  %v10470_v12 = vld [vmem:[#allocation5 + $0x894] ss:$40 sps:$4 sm:$0xff]   ;;  %v10473_v15 = vld [vmem:[#allocation5 + $0x344] ss:$40 sps:$4 sm:$0xff]   ;;  %v10474_v51 = vld [vmem:[#allocation5 + $0x840] ss:$40 sps:$4 sm:$0xff]  }
 0x340   :  { %6963 = vmatprep.subr.bf16.mxu1 %v10416_v18  ;;  %v10476_v18 = vld [vmem:[#allocation5 + $0x844] ss:$40 sps:$4 sm:$0xff]  }
 0x342   :  { %6923 = vmatpush1.bf16.msra.mxu0 %v10411_v26  ;;  %v10479_v26 = vld [vmem:[#allocation5 + $0x2f4] ss:$40 sps:$4 sm:$0xff]  }
 0x343   :  { %6964 = vmatpush1.bf16.msra.mxu1 %v10414_v27  ;;  %6924 = vmatprep.subr.bf16.mxu0 %v10419_v46  ;;  %v10482_v27 = vld [vmem:[#allocation5 + $0x7f4] ss:$40 sps:$4 sm:$0xff]   ;;  %v10477_v46 = vld [vmem:[#allocation5 + $0x2f0] ss:$40 sps:$4 sm:$0xff]  }
 0x344   :  { %6965 = vmatprep.subr.bf16.mxu1 %v10422_v30  ;;  %v10480_v30 = vld [vmem:[#allocation5 + $0x7f0] ss:$40 sps:$4 sm:$0xff]  }
 0x346   :  { %6925 = vmatpush1.bf16.msra.mxu0 %v10417_v29  ;;  %v10485_v29 = vld [vmem:[#allocation5 + $0x2a4] ss:$40 sps:$4 sm:$0xff]  }
 0x347   :  { %6966 = vmatpush1.bf16.msra.mxu1 %v10420_v32  ;;  %6926 = vmatprep.subr.bf16.mxu0 %v10425_v48  ;;  %v10488_v32 = vld [vmem:[#allocation5 + $0x7a4] ss:$40 sps:$4 sm:$0xff]   ;;  %v10483_v48 = vld [vmem:[#allocation5 + $0x2a0] ss:$40 sps:$4 sm:$0xff]  }
 0x348   :  { %6967 = vmatprep.subr.bf16.mxu1 %v10428_v55  ;;  %v10486_v55 = vld [vmem:[#allocation5 + $0x7a0] ss:$40 sps:$4 sm:$0xff]  }
 0x34a   :  { %6927 = vmatpush1.bf16.msra.mxu0 %v10423_v33  ;;  %v10491_v33 = vld [vmem:[#allocation5 + $0xc54] ss:$40 sps:$4 sm:$0xff]  }
 0x34b   :  { %6968 = vmatpush1.bf16.msra.mxu1 %v10426_v39  ;;  %6928 = vmatprep.subr.bf16.mxu0 %v10431_v52  ;;  %v10494_v39 = vld [vmem:[#allocation5 + $0x1154] ss:$40 sps:$4 sm:$0xff]   ;;  %v1070_v52 = vsub.s32 7, %v10981_v44 }
 0x34c   :  { %6969 = vmatprep.subr.bf16.mxu1 %v10434_v40  ;;  %v10489_v40 = vld [vmem:[#allocation5 + $0xc50] ss:$40 sps:$4 sm:$0xff]  }
 0x34e   :  { %6929 = vmatpush1.bf16.msra.mxu0 %v10429_v42  ;;  %v10492_v42 = vld [vmem:[#allocation5 + $0x1150] ss:$40 sps:$4 sm:$0xff]  }
 0x34f   :  { %6970 = vmatpush1.bf16.msra.mxu1 %v10432_v22  ;;  %6930 = vmatprep.subr.bf16.mxu0 %v10437_v58  ;;  %v10497_v22 = vld [vmem:[#allocation5 + $0xc04] ss:$40 sps:$4 sm:$0xff]  }
 0x350   :  { %6971 = vmatprep.subr.bf16.mxu1 %v10440_v43  ;;  %v10500_v58 = vld [vmem:[#allocation5 + $0x1104] ss:$40 sps:$4 sm:$0xff]   ;;  %v1071_v43 = vrot.slane %v11062_v61, %v1070_v52 }
 0x351   :  { %v10545_v52 = vld [vmem:[#allocation5 + $0xe84] ss:$40 sps:$4 sm:$0xff]  }
 0x352   :  { %6931 = vmatpush1.bf16.msra.mxu0 %v10435_v23 }
 0x353   :  { %6972 = vmatpush1.bf16.msra.mxu1 %v10438_v45  ;;  %6932 = vmatprep.subr.bf16.mxu0 %v10443_v49 }
 0x354   :  { %6973 = vmatprep.subr.bf16.mxu1 %v10446_v53  ;;  %v10495_v53 = vld [vmem:[#allocation5 + $0xc00] ss:$40 sps:$4 sm:$0xff]  }
 0x356   :  { %6933 = vmatpush2.bf16.msra.mxu0 %v10441_v8  ;;  %v10498_v8 = vld [vmem:[#allocation5 + $0x1100] ss:$40 sps:$4 sm:$0xff]  }
 0x357   :  { %6974 = vmatpush2.bf16.msra.mxu1 %v10444_v56  ;;  %6934 = vmatprep.subr.bf16.mxu0 %v10449_v57 }
 0x358   :  { %6975 = vmatprep.subr.bf16.mxu1 %v10452_v2  ;;  %v10503_v2 = vld [vmem:[#allocation5 + $0xbb4] ss:$40 sps:$4 sm:$0xff]  }
 0x35a   :  { %6935 = vmatpush2.bf16.msra.mxu0 %v10447_v38  ;;  %v10506_v38 = vld [vmem:[#allocation5 + $0x10b4] ss:$40 sps:$4 sm:$0xff]  }
 0x35b   :  { %6976 = vmatpush2.bf16.msra.mxu1 %v10450_v59  ;;  %6936 = vmatprep.subr.bf16.mxu0 %v10455_v14  ;;  %v10501_v14 = vld [vmem:[#allocation5 + $0xbb0] ss:$40 sps:$4 sm:$0xff]  }
 0x35c   :  { %6977 = vmatprep.subr.bf16.mxu1 %v10458_v11  ;;  %v10504_v11 = vld [vmem:[#allocation5 + $0x10b0] ss:$40 sps:$4 sm:$0xff]  }
 0x35e   :  { %6937 = vmatpush2.bf16.msra.mxu0 %v10453_v62 }
 0x35f   :  { %6978 = vmatpush2.bf16.msra.mxu1 %v10456_v63  ;;  %6938 = vmatprep.subr.bf16.mxu0 %v10461_v1  ;;  %v10509_v1 = vld [vmem:[#allocation5 + $0xb64] ss:$40 sps:$4 sm:$0xff]  }
 0x360   :  { %6979 = vmatprep.subr.bf16.mxu1 %v10464_v3  ;;  %v10512_v3 = vld [vmem:[#allocation5 + $0x1064] ss:$40 sps:$4 sm:$0xff]  }
 0x362   :  { %6939 = vmatpush2.bf16.msra.mxu0 %v10459_v10  ;;  %v10507_v10 = vld [vmem:[#allocation5 + $0xb60] ss:$40 sps:$4 sm:$0xff]  }
 0x363   :  { %6980 = vmatpush2.bf16.msra.mxu1 %v10462_v4  ;;  %6940 = vmatprep.subr.bf16.mxu0 %v10467_v9  ;;  %v10518_v4 = vld [vmem:[#allocation5 + $0x1014] ss:$40 sps:$4 sm:$0xff]   ;;  %v10513_v9 = vld [vmem:[#allocation5 + $0xb10] ss:$40 sps:$4 sm:$0xff]  }
 0x364   :  { %6981 = vmatprep.subr.bf16.mxu1 %v10470_v12  ;;  %v10516_v12 = vld [vmem:[#allocation5 + $0x1010] ss:$40 sps:$4 sm:$0xff]  }
 0x366   :  { %6941 = vmatpush2.bf16.msra.mxu0 %v10465_v13  ;;  %v10521_v13 = vld [vmem:[#allocation5 + $0xac4] ss:$40 sps:$4 sm:$0xff]  }
 0x367   :  { %6982 = vmatpush2.bf16.msra.mxu1 %v10468_v21  ;;  %6942 = vmatprep.subr.bf16.mxu0 %v10473_v15  ;;  %v10524_v21 = vld [vmem:[#allocation5 + $0xfc4] ss:$40 sps:$4 sm:$0xff]   ;;  %v10519_v15 = vld [vmem:[#allocation5 + $0xac0] ss:$40 sps:$4 sm:$0xff]  }
 0x368   :  { %6983 = vmatprep.subr.bf16.mxu1 %v10476_v18  ;;  %v10522_v18 = vld [vmem:[#allocation5 + $0xfc0] ss:$40 sps:$4 sm:$0xff]  }
 0x36a   :  { %6943 = vmatpush2.bf16.msra.mxu0 %v10471_v47  ;;  %v10527_v47 = vld [vmem:[#allocation5 + $0xa74] ss:$40 sps:$4 sm:$0xff]  }
 0x36b   :  { %6984 = vmatpush2.bf16.msra.mxu1 %v10474_v51  ;;  %6944 = vmatprep.subr.bf16.mxu0 %v10479_v26  ;;  %v10530_v51 = vld [vmem:[#allocation5 + $0xf74] ss:$40 sps:$4 sm:$0xff]   ;;  %v10525_v26 = vld [vmem:[#allocation5 + $0xa70] ss:$40 sps:$4 sm:$0xff]  }
 0x36c   :  { %6985 = vmatprep.subr.bf16.mxu1 %v10482_v27  ;;  %v10528_v27 = vld [vmem:[#allocation5 + $0xf70] ss:$40 sps:$4 sm:$0xff]  }
 0x36e   :  { %6945 = vmatpush2.bf16.msra.mxu0 %v10477_v46  ;;  %v10533_v46 = vld [vmem:[#allocation5 + $0xa24] ss:$40 sps:$4 sm:$0xff]  }
 0x36f   :  { %6986 = vmatpush2.bf16.msra.mxu1 %v10480_v30  ;;  %6946 = vmatprep.subr.bf16.mxu0 %v10485_v29  ;;  %v10536_v30 = vld [vmem:[#allocation5 + $0xf24] ss:$40 sps:$4 sm:$0xff]   ;;  %v10531_v29 = vld [vmem:[#allocation5 + $0xa20] ss:$40 sps:$4 sm:$0xff]  }
 0x370   :  { %6987 = vmatprep.subr.bf16.mxu1 %v10488_v32  ;;  %v10534_v32 = vld [vmem:[#allocation5 + $0xf20] ss:$40 sps:$4 sm:$0xff]  }
 0x372   :  { %6947 = vmatpush2.bf16.msra.mxu0 %v10483_v48  ;;  %v10539_v48 = vld [vmem:[#allocation5 + $0xed4] ss:$40 sps:$4 sm:$0xff]  }
 0x373   :  { %6988 = vmatpush2.bf16.msra.mxu1 %v10486_v55  ;;  %6998 = vmatprep.subr.bf16.mxu0 %v10491_v33  ;;  %v10542_v55 = vld [vmem:[#allocation5 + $0x13d4] ss:$40 sps:$4 sm:$0xff]   ;;  %v10537_v33 = vld [vmem:[#allocation5 + $0xed0] ss:$40 sps:$4 sm:$0xff]  }
 0x374   :  { %7039 = vmatprep.subr.bf16.mxu1 %v10494_v39  ;;  %v10540_v39 = vld [vmem:[#allocation5 + $0x13d0] ss:$40 sps:$4 sm:$0xff]  }
 0x375   :  { %v6704_v23 = vpop.f32.mrf.mxu0  ;;  %6949 = vmatmul.mubr.bf16.vlgmr.msra.gmra.mxu0 %v10925_v6 }
 0x376   :  { %v6745_v45 = vpop.f32.mrf.mxu1  ;;  %6990 = vmatmul.mubr.bf16.vlgmr.msra.gmra.mxu1 %v10927_v7  ;;  %v6705_v49 = vadd.f32 %v6704_v23, %v11076_v60  ;;  %6999 = vmatpush1.bf16.msra.mxu0 %v10489_v40  ;;  %v10548_v40 = vld [vmem:[#allocation5 + $0x1384] ss:$40 sps:$4 sm:$0xff]   ;;  %v10549_v23 = vld [vmem:[#allocation5 + $0xe30] ss:$40 sps:$4 sm:$0xff]  }
 0x377   :  { %7040 = vmatpush1.bf16.msra.mxu1 %v10492_v42  ;;  %v6706_v56 = vpop.f32.mrf.mxu0  ;;  %7000 = vmatprep.subr.bf16.mxu0 %v10497_v22  ;;  %v10543_v42 = vld [vmem:[#allocation5 + $0xe80] ss:$40 sps:$4 sm:$0xff]  }
 0x378   :  { %v6747_v57 = vpop.f32.mrf.mxu1  ;;  %7041 = vmatprep.subr.bf16.mxu1 %v10500_v58  ;;  %v11110_v59 = vadd.f32 %v6745_v45, %v6705_v49  ;;  %v6707_v61 = vadd.f32 %v6706_v56, %v1071_v43  ;;  %7030 = vmatprep.mubr.bf16.mxu0 %v10937_v36  ;;  %v10510_v36 = vld [vmem:[#allocation5 + $0x1060] ss:$40 sps:$4 sm:$0xff]   ;;  %v10551_v58 = vld [vmem:[#allocation5 + $0xe34] ss:$40 sps:$4 sm:$0xff]   ;;  %v10552_v45 = vld [vmem:[#allocation5 + $0x1330] ss:$40 sps:$4 sm:$0xff]  }
 0x379   :  { %7071 = vmatprep.mubr.bf16.mxu1 %v10941_v37  ;;  %v6708_v6 = vpop.f32.mrf.mxu0  ;;  %v10515_v37 = vld [vmem:[#allocation5 + $0xb14] ss:$40 sps:$4 sm:$0xff]   ;;  %v10546_v22 = vld [vmem:[#allocation5 + $0x1380] ss:$40 sps:$4 sm:$0xff]   ;;  %v10557_v49 = vld [vmem:[#allocation5 + $0xde4] ss:$40 sps:$4 sm:$0xff]  }
 0x37a   :  { %v6749_v7 = vpop.f32.mrf.mxu1  ;;  %v11114_v60 = vadd.f32 %v6747_v57, %v6707_v61  ;;  %7001 = vmatpush1.bf16.msra.mxu0 %v10495_v53  ;;  %v10554_v43 = vld [vmem:[#allocation5 + $0x1334] ss:$40 sps:$4 sm:$0xff]   ;;  %v10560_v53 = vld [vmem:[#allocation5 + $0x12e4] ss:$40 sps:$4 sm:$0xff]   ;;  %v10558_v56 = vld [vmem:[#allocation5 + $0x12e0] ss:$40 sps:$4 sm:$0xff]  }
 0x37b   :  { %7042 = vmatpush1.bf16.msra.mxu1 %v10498_v8  ;;  %v6709_v62 = vpop.f32.mrf.mxu0  ;;  %7002 = vmatprep.subr.bf16.mxu0 %v10503_v2  ;;  %v10555_v8 = vld [vmem:[#allocation5 + $0xde0] ss:$40 sps:$4 sm:$0xff]   ;;  %v10563_v57 = vld [vmem:[#allocation5 + $0xd94] ss:$40 sps:$4 sm:$0xff]   ;;  %v10564_v61 = vld [vmem:[#allocation5 + $0x1290] ss:$40 sps:$4 sm:$0xff]  }
 0x37c   :  { %v6750_v63 = vpop.f32.mrf.mxu1  ;;  %7043 = vmatprep.subr.bf16.mxu1 %v10506_v38  ;;  %v10566_v2 = vld [vmem:[#allocation5 + $0x1294] ss:$40 sps:$4 sm:$0xff]   ;;  %v10561_v38 = vld [vmem:[#allocation5 + $0xd90] ss:$40 sps:$4 sm:$0xff]   ;;  %v10569_v6 = vld [vmem:[#allocation5 + $0xd44] ss:$40 sps:$4 sm:$0xff]  }
 0x37d   :  { %v10572_v7 = vld [vmem:[#allocation5 + $0x1244] ss:$40 sps:$4 sm:$0xff]   ;;  %v10575_v62 = vld [vmem:[#allocation5 + $0xcf4] ss:$40 sps:$4 sm:$0xff]  }
 0x37e   :  { %7003 = vmatpush1.bf16.msra.mxu0 %v10501_v14  ;;  %v10567_v14 = vld [vmem:[#allocation5 + $0xd40] ss:$40 sps:$4 sm:$0xff]   ;;  %v10578_v63 = vld [vmem:[#allocation5 + $0x11f4] ss:$40 sps:$4 sm:$0xff]  }
 0x37f   :  { %7044 = vmatpush1.bf16.msra.mxu1 %v10504_v11  ;;  %7004 = vmatprep.subr.bf16.mxu0 %v10509_v1  ;;  %v10570_v11 = vld [vmem:[#allocation5 + $0x1240] ss:$40 sps:$4 sm:$0xff]   ;;  %v10573_v1 = vld [vmem:[#allocation5 + $0xcf0] ss:$40 sps:$4 sm:$0xff]  }
 0x380   :  { %7045 = vmatprep.subr.bf16.mxu1 %v10512_v3  ;;  %v10576_v3 = vld [vmem:[#allocation5 + $0x11f0] ss:$40 sps:$4 sm:$0xff]  }
 0x382   :  { %7005 = vmatpush1.bf16.msra.mxu0 %v10507_v10  ;;  %v10581_v10 = vld [vmem:[#allocation5 + $0xca4] ss:$40 sps:$4 sm:$0xff]  }
 0x383   :  { %7046 = vmatpush1.bf16.msra.mxu1 %v10510_v36  ;;  %7006 = vmatprep.subr.bf16.mxu0 %v10515_v37  ;;  %v10584_v36 = vld [vmem:[#allocation5 + $0x11a4] ss:$40 sps:$4 sm:$0xff]   ;;  %v10579_v37 = vld [vmem:[#allocation5 + $0xca0] ss:$40 sps:$4 sm:$0xff]  }
 0x384   :  { %7047 = vmatprep.subr.bf16.mxu1 %v10518_v4  ;;  %v10582_v4 = vld [vmem:[#allocation5 + $0x11a0] ss:$40 sps:$4 sm:$0xff]  }
 0x386   :  { %7007 = vmatpush1.bf16.msra.mxu0 %v10513_v9  ;;  %v10587_v9 = vld [vmem:[#allocation5 + $0x1654] ss:$40 sps:$4 sm:$0xff]  }
 0x387   :  { %7048 = vmatpush1.bf16.msra.mxu1 %v10516_v12  ;;  %7008 = vmatprep.subr.bf16.mxu0 %v10521_v13  ;;  %v10590_v12 = vld [vmem:[#allocation5 + $0x1b54] ss:$40 sps:$4 sm:$0xff]   ;;  %v10585_v13 = vld [vmem:[#allocation5 + $0x1650] ss:$40 sps:$4 sm:$0xff]  }
 0x388   :  { %7049 = vmatprep.subr.bf16.mxu1 %v10524_v21  ;;  %v10588_v21 = vld [vmem:[#allocation5 + $0x1b50] ss:$40 sps:$4 sm:$0xff]  }
 0x38a   :  { %7009 = vmatpush1.bf16.msra.mxu0 %v10519_v15  ;;  %v10593_v15 = vld [vmem:[#allocation5 + $0x1604] ss:$40 sps:$4 sm:$0xff]  }
 0x38b   :  { %7050 = vmatpush1.bf16.msra.mxu1 %v10522_v18  ;;  %7010 = vmatprep.subr.bf16.mxu0 %v10527_v47  ;;  %v10596_v18 = vld [vmem:[#allocation5 + $0x1b04] ss:$40 sps:$4 sm:$0xff]  }
 0x38c   :  { %7051 = vmatprep.subr.bf16.mxu1 %v10530_v51 }
 0x38e   :  { %7011 = vmatpush1.bf16.msra.mxu0 %v10525_v26 }
 0x38f   :  { %7052 = vmatpush1.bf16.msra.mxu1 %v10528_v27  ;;  %7012 = vmatprep.subr.bf16.mxu0 %v10533_v46  ;;  %v10591_v27 = vld [vmem:[#allocation5 + $0x1600] ss:$40 sps:$4 sm:$0xff]  }
 0x390   :  { %7053 = vmatprep.subr.bf16.mxu1 %v10536_v30  ;;  %v10594_v46 = vld [vmem:[#allocation5 + $0x1b00] ss:$40 sps:$4 sm:$0xff]  }
 0x392   :  { %7013 = vmatpush1.bf16.msra.mxu0 %v10531_v29 }
 0x393   :  { %7054 = vmatpush1.bf16.msra.mxu1 %v10534_v32  ;;  %7014 = vmatprep.subr.bf16.mxu0 %v10539_v48  ;;  %v10599_v32 = vld [vmem:[#allocation5 + $0x15b4] ss:$40 sps:$4 sm:$0xff]  }
 0x394   :  { %7055 = vmatprep.subr.bf16.mxu1 %v10542_v55  ;;  %v10602_v48 = vld [vmem:[#allocation5 + $0x1ab4] ss:$40 sps:$4 sm:$0xff]  }
 0x396   :  { %7015 = vmatpush2.bf16.msra.mxu0 %v10537_v33 }
 0x397   :  { %7056 = vmatpush2.bf16.msra.mxu1 %v10540_v39  ;;  %7016 = vmatprep.subr.bf16.mxu0 %v10545_v52  ;;  %v10597_v39 = vld [vmem:[#allocation5 + $0x15b0] ss:$40 sps:$4 sm:$0xff]  }
 0x398   :  { %7057 = vmatprep.subr.bf16.mxu1 %v10548_v40  ;;  %v10600_v52 = vld [vmem:[#allocation5 + $0x1ab0] ss:$40 sps:$4 sm:$0xff]  }
 0x39a   :  { %7017 = vmatpush2.bf16.msra.mxu0 %v10543_v42 }
 0x39b   :  { %7058 = vmatpush2.bf16.msra.mxu1 %v10546_v22  ;;  %7018 = vmatprep.subr.bf16.mxu0 %v10551_v58  ;;  %v10605_v22 = vld [vmem:[#allocation5 + $0x1564] ss:$40 sps:$4 sm:$0xff]  }
 0x39c   :  { %7059 = vmatprep.subr.bf16.mxu1 %v10554_v43  ;;  %v10608_v58 = vld [vmem:[#allocation5 + $0x1a64] ss:$40 sps:$4 sm:$0xff]   ;;  %v10614_v43 = vld [vmem:[#allocation5 + $0x1a14] ss:$40 sps:$4 sm:$0xff]  }
 0x39e   :  { %7019 = vmatpush2.bf16.msra.mxu0 %v10549_v23  ;;  %v10609_v23 = vld [vmem:[#allocation5 + $0x1510] ss:$40 sps:$4 sm:$0xff]  }
 0x39f   :  { %7060 = vmatpush2.bf16.msra.mxu1 %v10552_v45  ;;  %7020 = vmatprep.subr.bf16.mxu0 %v10557_v49  ;;  %v10612_v45 = vld [vmem:[#allocation5 + $0x1a10] ss:$40 sps:$4 sm:$0xff]   ;;  %v10617_v49 = vld [vmem:[#allocation5 + $0x14c4] ss:$40 sps:$4 sm:$0xff]  }
 0x3a0   :  { %7061 = vmatprep.subr.bf16.mxu1 %v10560_v53  ;;  %v10620_v53 = vld [vmem:[#allocation5 + $0x19c4] ss:$40 sps:$4 sm:$0xff]  }
 0x3a2   :  { %7021 = vmatpush2.bf16.msra.mxu0 %v10555_v8  ;;  %v10615_v8 = vld [vmem:[#allocation5 + $0x14c0] ss:$40 sps:$4 sm:$0xff]  }
 0x3a3   :  { %7062 = vmatpush2.bf16.msra.mxu1 %v10558_v56  ;;  %7022 = vmatprep.subr.bf16.mxu0 %v10563_v57  ;;  %v10618_v56 = vld [vmem:[#allocation5 + $0x19c0] ss:$40 sps:$4 sm:$0xff]   ;;  %v10623_v57 = vld [vmem:[#allocation5 + $0x1474] ss:$40 sps:$4 sm:$0xff]  }
 0x3a4   :  { %7063 = vmatprep.subr.bf16.mxu1 %v10566_v2  ;;  %v10626_v2 = vld [vmem:[#allocation5 + $0x1974] ss:$40 sps:$4 sm:$0xff]  }
 0x3a6   :  { %7023 = vmatpush2.bf16.msra.mxu0 %v10561_v38  ;;  %v10621_v38 = vld [vmem:[#allocation5 + $0x1470] ss:$40 sps:$4 sm:$0xff]  }
 0x3a7   :  { %7064 = vmatpush2.bf16.msra.mxu1 %v10564_v61  ;;  %7024 = vmatprep.subr.bf16.mxu0 %v10569_v6  ;;  %v10624_v61 = vld [vmem:[#allocation5 + $0x1970] ss:$40 sps:$4 sm:$0xff]   ;;  %v10629_v6 = vld [vmem:[#allocation5 + $0x1424] ss:$40 sps:$4 sm:$0xff]  }
 0x3a8   :  { %7065 = vmatprep.subr.bf16.mxu1 %v10572_v7  ;;  %v10632_v7 = vld [vmem:[#allocation5 + $0x1924] ss:$40 sps:$4 sm:$0xff]  }
 0x3aa   :  { %7025 = vmatpush2.bf16.msra.mxu0 %v10567_v14  ;;  %v10627_v14 = vld [vmem:[#allocation5 + $0x1420] ss:$40 sps:$4 sm:$0xff]  }
 0x3ab   :  { %7066 = vmatpush2.bf16.msra.mxu1 %v10570_v11  ;;  %7026 = vmatprep.subr.bf16.mxu0 %v10575_v62  ;;  %v10630_v11 = vld [vmem:[#allocation5 + $0x1920] ss:$40 sps:$4 sm:$0xff]   ;;  %v10635_v62 = vld [vmem:[#allocation5 + $0x18d4] ss:$40 sps:$4 sm:$0xff]  }
 0x3ac   :  { %7067 = vmatprep.subr.bf16.mxu1 %v10578_v63  ;;  %v10638_v63 = vld [vmem:[#allocation5 + $0x1dd4] ss:$40 sps:$4 sm:$0xff]  }
 0x3ae   :  { %7027 = vmatpush2.bf16.msra.mxu0 %v10573_v1  ;;  %v10633_v1 = vld [vmem:[#allocation5 + $0x18d0] ss:$40 sps:$4 sm:$0xff]  }
 0x3af   :  { %7068 = vmatpush2.bf16.msra.mxu1 %v10576_v3  ;;  %7028 = vmatprep.subr.bf16.mxu0 %v10581_v10  ;;  %v10636_v3 = vld [vmem:[#allocation5 + $0x1dd0] ss:$40 sps:$4 sm:$0xff]   ;;  %v10641_v10 = vld [vmem:[#allocation5 + $0x1884] ss:$40 sps:$4 sm:$0xff]  }
 0x3b0   :  { %7069 = vmatprep.subr.bf16.mxu1 %v10584_v36  ;;  %v10644_v36 = vld [vmem:[#allocation5 + $0x1d84] ss:$40 sps:$4 sm:$0xff]  }
 0x3b2   :  { %7029 = vmatpush2.bf16.msra.mxu0 %v10579_v37  ;;  %v10639_v37 = vld [vmem:[#allocation5 + $0x1880] ss:$40 sps:$4 sm:$0xff]  }
 0x3b3   :  { %7070 = vmatpush2.bf16.msra.mxu1 %v10582_v4  ;;  %7080 = vmatprep.subr.bf16.mxu0 %v10587_v9  ;;  %v10642_v4 = vld [vmem:[#allocation5 + $0x1d80] ss:$40 sps:$4 sm:$0xff]   ;;  %v10647_v9 = vld [vmem:[#allocation5 + $0x1834] ss:$40 sps:$4 sm:$0xff]  }
 0x3b4   :  { %7121 = vmatprep.subr.bf16.mxu1 %v10590_v12  ;;  %v10650_v12 = vld [vmem:[#allocation5 + $0x1d34] ss:$40 sps:$4 sm:$0xff]  }
 0x3b5   :  { %v6786_v47 = vpop.f32.mrf.mxu0  ;;  %7031 = vmatmul.mubr.bf16.vlgmr.msra.gmra.mxu0 %v10947_v16 }
 0x3b6   :  { %v6827_v51 = vpop.f32.mrf.mxu1  ;;  %7072 = vmatmul.mubr.bf16.vlgmr.msra.gmra.mxu1 %v10951_v17  ;;  %v6787_v26 = vadd.f32 %v6786_v47, %v11110_v59  ;;  %7081 = vmatpush1.bf16.msra.mxu0 %v10585_v13  ;;  %v10645_v13 = vld [vmem:[#allocation5 + $0x1830] ss:$40 sps:$4 sm:$0xff]   ;;  %v10651_v47 = vld [vmem:[#allocation5 + $0x17e0] ss:$40 sps:$4 sm:$0xff]  }
 0x3b7   :  { %7122 = vmatpush1.bf16.msra.mxu1 %v10588_v21  ;;  %v6788_v30 = vpop.f32.mrf.mxu0  ;;  %7082 = vmatprep.subr.bf16.mxu0 %v10593_v15  ;;  %v10648_v21 = vld [vmem:[#allocation5 + $0x1d30] ss:$40 sps:$4 sm:$0xff]   ;;  %v10653_v15 = vld [vmem:[#allocation5 + $0x17e4] ss:$40 sps:$4 sm:$0xff]  }
 0x3b8   :  { %v6829_v29 = vpop.f32.mrf.mxu1  ;;  %7123 = vmatprep.subr.bf16.mxu1 %v10596_v18  ;;  %v11119_v55 = vadd.f32 %v6827_v51, %v6787_v26  ;;  %v6789_v33 = vadd.f32 %v6788_v30, %v11114_v60  ;;  %7112 = vmatprep.mubr.bf16.mxu0 %v10959_v24  ;;  %v10603_v60 = vld [vmem:[#allocation5 + $0x1560] ss:$40 sps:$4 sm:$0xff]   ;;  %v10656_v18 = vld [vmem:[#allocation5 + $0x1ce4] ss:$40 sps:$4 sm:$0xff]   ;;  %v10659_v26 = vld [vmem:[#allocation5 + $0x1794] ss:$40 sps:$4 sm:$0xff]  }
 0x3b9   :  { %7153 = vmatprep.mubr.bf16.mxu1 %v10963_v25  ;;  %v6790_v16 = vpop.f32.mrf.mxu0  ;;  %v10606_v24 = vld [vmem:[#allocation5 + $0x1a60] ss:$40 sps:$4 sm:$0xff]   ;;  %v10611_v25 = vld [vmem:[#allocation5 + $0x1514] ss:$40 sps:$4 sm:$0xff]   ;;  %v10660_v30 = vld [vmem:[#allocation5 + $0x1c90] ss:$40 sps:$4 sm:$0xff]  }
 0x3ba   :  { %v6831_v17 = vpop.f32.mrf.mxu1  ;;  %v11124_v59 = vadd.f32 %v6829_v29, %v6789_v33  ;;  %7083 = vmatpush1.bf16.msra.mxu0 %v10591_v27  ;;  %v10654_v51 = vld [vmem:[#allocation5 + $0x1ce0] ss:$40 sps:$4 sm:$0xff]   ;;  %v10662_v27 = vld [vmem:[#allocation5 + $0x1c94] ss:$40 sps:$4 sm:$0xff]   ;;  %v10665_v29 = vld [vmem:[#allocation5 + $0x1744] ss:$40 sps:$4 sm:$0xff]  }
 0x3bb   :  { %7124 = vmatpush1.bf16.msra.mxu1 %v10594_v46  ;;  %v6791_v40 = vpop.f32.mrf.mxu0  ;;  %7084 = vmatprep.subr.bf16.mxu0 %v10599_v32  ;;  %v10657_v46 = vld [vmem:[#allocation5 + $0x1790] ss:$40 sps:$4 sm:$0xff]   ;;  %v10668_v32 = vld [vmem:[#allocation5 + $0x1c44] ss:$40 sps:$4 sm:$0xff]   ;;  %v10666_v33 = vld [vmem:[#allocation5 + $0x1c40] ss:$40 sps:$4 sm:$0xff]  }
 0x3bc   :  { %v6832_v42 = vpop.f32.mrf.mxu1  ;;  %7125 = vmatprep.subr.bf16.mxu1 %v10602_v48  ;;  %v10663_v48 = vld [vmem:[#allocation5 + $0x1740] ss:$40 sps:$4 sm:$0xff]   ;;  %v10671_v16 = vld [vmem:[#allocation5 + $0x16f4] ss:$40 sps:$4 sm:$0xff]   ;;  %v10677_v40 = vld [vmem:[#allocation5 + $0x16a4] ss:$40 sps:$4 sm:$0xff]  }
 0x3bd   :  { %v10674_v17 = vld [vmem:[#allocation5 + $0x1bf4] ss:$40 sps:$4 sm:$0xff]   ;;  %v10680_v42 = vld [vmem:[#allocation5 + $0x1ba4] ss:$40 sps:$4 sm:$0xff]  }
 0x3be   :  { %7085 = vmatpush1.bf16.msra.mxu0 %v10597_v39  ;;  %v10669_v39 = vld [vmem:[#allocation5 + $0x16f0] ss:$40 sps:$4 sm:$0xff]  }
 0x3bf   :  { %7126 = vmatpush1.bf16.msra.mxu1 %v10600_v52  ;;  %7086 = vmatprep.subr.bf16.mxu0 %v10605_v22  ;;  %v10672_v52 = vld [vmem:[#allocation5 + $0x1bf0] ss:$40 sps:$4 sm:$0xff]   ;;  %v10675_v22 = vld [vmem:[#allocation5 + $0x16a0] ss:$40 sps:$4 sm:$0xff]  }
 0x3c0   :  { %7127 = vmatprep.subr.bf16.mxu1 %v10608_v58  ;;  %v10678_v58 = vld [vmem:[#allocation5 + $0x1ba0] ss:$40 sps:$4 sm:$0xff]  }
 0x3c2   :  { %7087 = vmatpush1.bf16.msra.mxu0 %v10603_v60  ;;  %v10681_v60 = vld [vmem:[#allocation8 + $0x78] sm:$0xff]  }
 0x3c3   :  { %7128 = vmatpush1.bf16.msra.mxu1 %v10606_v24  ;;  %7088 = vmatprep.subr.bf16.mxu0 %v10611_v25  ;;  %v10682_v24 = vld [vmem:[#allocation8 + $0xf8] sm:$0xff]  }
 0x3c4   :  { %7129 = vmatprep.subr.bf16.mxu1 %v10614_v43  ;;  %v10683_v25 = vld [vmem:[#allocation8 + $0x38] sm:$0xff]  }
 0x3c5   :  { %v10684_v43 = vld [vmem:[#allocation8 + $0xb8] sm:$0xff]  }
 0x3c6   :  { %7089 = vmatpush1.bf16.msra.mxu0 %v10609_v23  ;;  %v7187_v23 = vpack.c.bf16 %v11015_v28, %v11015_v28 }
 0x3c7   :  { %7130 = vmatpush1.bf16.msra.mxu1 %v10612_v45  ;;  %7090 = vmatprep.subr.bf16.mxu0 %v10617_v49  ;;  %v10685_v45 = vld [vmem:[#allocation8 + $0x70] sm:$0xff]  }
 0x3c8   :  { %7131 = vmatprep.subr.bf16.mxu1 %v10620_v53  ;;  %v10686_v49 = vld [vmem:[#allocation8 + $0xf0] sm:$0xff]   ;;  %v7189_v53 = vpack.c.bf16 %v11053_v41, %v11053_v41 }
 0x3ca   :  { %7091 = vmatpush1.bf16.msra.mxu0 %v10615_v8 }
 0x3cb   :  { %7132 = vmatpush1.bf16.msra.mxu1 %v10618_v56  ;;  %7092 = vmatprep.subr.bf16.mxu0 %v10623_v57 }
 0x3cc   :  { %7133 = vmatprep.subr.bf16.mxu1 %v10626_v2  ;;  %v10687_v2 = vld [vmem:[#allocation8 + $0x30] sm:$0xff]  }
 0x3ce   :  { %7093 = vmatpush1.bf16.msra.mxu0 %v10621_v38 }
 0x3cf   :  { %7134 = vmatpush1.bf16.msra.mxu1 %v10624_v61  ;;  %7094 = vmatprep.subr.bf16.mxu0 %v10629_v6  ;;  %v10688_v61 = vld [vmem:[#allocation8 + $0xb0] sm:$0xff]   ;;  %v10689_v6 = vld [vmem:[#allocation8 + $0x68] sm:$0xff]  }
 0x3d0   :  { %7135 = vmatprep.subr.bf16.mxu1 %v10632_v7 }
 0x3d2   :  { %7095 = vmatpush1.bf16.msra.mxu0 %v10627_v14 }
 0x3d3   :  { %7136 = vmatpush1.bf16.msra.mxu1 %v10630_v11  ;;  %7096 = vmatprep.subr.bf16.mxu0 %v10635_v62  ;;  %v10691_v62 = vld [vmem:[#allocation8 + $0x28] sm:$0xff]  }
 0x3d4   :  { %7137 = vmatprep.subr.bf16.mxu1 %v10638_v63 }
 0x3d6   :  { %7097 = vmatpush2.bf16.msra.mxu0 %v10633_v1 }
 0x3d7   :  { %7138 = vmatpush2.bf16.msra.mxu1 %v10636_v3  ;;  %7098 = vmatprep.subr.bf16.mxu0 %v10641_v10  ;;  %v10692_v3 = vld [vmem:[#allocation8 + $0xa8] sm:$0xff]   ;;  %v10693_v10 = vld [vmem:[#allocation8 + $0x60] sm:$0xff]  }
 0x3d8   :  { %7139 = vmatprep.subr.bf16.mxu1 %v10644_v36 }
 0x3da   :  { %7099 = vmatpush2.bf16.msra.mxu0 %v10639_v37  ;;  %v10694_v37 = vld [vmem:[#allocation8 + $0xe0] sm:$0xff]  }
 0x3db   :  { %7140 = vmatpush2.bf16.msra.mxu1 %v10642_v4  ;;  %7100 = vmatprep.subr.bf16.mxu0 %v10647_v9  ;;  %v10695_v4 = vld [vmem:[#allocation8 + $0x20] sm:$0xff]  }
 0x3dc   :  { %7141 = vmatprep.subr.bf16.mxu1 %v10650_v12  ;;  %v10696_v12 = vld [vmem:[#allocation8 + $0xa0] sm:$0xff]  }
 0x3de   :  { %7101 = vmatpush2.bf16.msra.mxu0 %v10645_v13  ;;  %v10697_v13 = vld [vmem:[#allocation8 + $0x58] sm:$0xff]  }
 0x3df   :  { %7142 = vmatpush2.bf16.msra.mxu1 %v10648_v21  ;;  %7102 = vmatprep.subr.bf16.mxu0 %v10653_v15  ;;  %v10698_v21 = vld [vmem:[#allocation8 + $0xd8] sm:$0xff]  }
 0x3e0   :  { %7143 = vmatprep.subr.bf16.mxu1 %v10656_v18  ;;  %v10699_v15 = vld [vmem:[#allocation8 + $0x18] sm:$0xff]   ;;  %v10701_v18 = vld [vmem:[#allocation8 + $0x50] sm:$0xff]  }
 0x3e2   :  { %7103 = vmatpush2.bf16.msra.mxu0 %v10651_v47  ;;  %v10702_v47 = vld [vmem:[#allocation8 + $0xd0] sm:$0xff]  }
 0x3e3   :  { %7144 = vmatpush2.bf16.msra.mxu1 %v10654_v51  ;;  %7104 = vmatprep.subr.bf16.mxu0 %v10659_v26  ;;  %v10703_v51 = vld [vmem:[#allocation8 + $0x10] sm:$0xff]  }
 0x3e4   :  { %7145 = vmatprep.subr.bf16.mxu1 %v10662_v27  ;;  %v10704_v26 = vld [vmem:[#allocation8 + $0x90] sm:$0xff]   ;;  %v10705_v27 = vld [vmem:[#allocation8 + $0x48] sm:$0xff]  }
 0x3e6   :  { %7105 = vmatpush2.bf16.msra.mxu0 %v10657_v46  ;;  %v10706_v46 = vld [vmem:[#allocation8 + $0xc8] sm:$0xff]  }
 0x3e7   :  { %7146 = vmatpush2.bf16.msra.mxu1 %v10660_v30  ;;  %7106 = vmatprep.subr.bf16.mxu0 %v10665_v29  ;;  %v10707_v30 = vld [vmem:[#allocation8 + $0x8] sm:$0xff]  }
 0x3e8   :  { %7147 = vmatprep.subr.bf16.mxu1 %v10668_v32  ;;  %v10708_v29 = vld [vmem:[#allocation8 + $0x88] sm:$0xff]   ;;  %v10709_v32 = vld [vmem:[#allocation8 + $0x40] sm:$0xff]  }
 0x3ea   :  { %7107 = vmatpush2.bf16.msra.mxu0 %v10663_v48  ;;  %v10710_v48 = vld [vmem:[#allocation8 + $0xc0] sm:$0xff]  }
 0x3eb   :  { %7148 = vmatpush2.bf16.msra.mxu1 %v10666_v33  ;;  %7108 = vmatprep.subr.bf16.mxu0 %v10671_v16  ;;  %v10711_v33 = vld [vmem:[#allocation8] sm:$0xff]  }
 0x3ec   :  { %7149 = vmatprep.subr.bf16.mxu1 %v10674_v17  ;;  %v10712_v16 = vld [vmem:[#allocation8 + $0x80] sm:$0xff]   ;;  %v10713_v17 = vld [vmem:[#allocation8 + $0x178] sm:$0xff]  }
 0x3ee   :  { %7109 = vmatpush2.bf16.msra.mxu0 %v10669_v39  ;;  %v10714_v39 = vld [vmem:[#allocation8 + $0x1f8] sm:$0xff]  }
 0x3ef   :  { %7150 = vmatpush2.bf16.msra.mxu1 %v10672_v52  ;;  %7110 = vmatprep.subr.bf16.mxu0 %v10677_v40  ;;  %v10715_v52 = vld [vmem:[#allocation8 + $0x138] sm:$0xff]   ;;  %v7186_v40 = vpack.c.bf16 %v11010_v19, %v11010_v19  ;;  %v10720_v19 = vld [vmem:[#allocation8 + $0x1b0] sm:$0xff]  }
 0x3f0   :  { %7151 = vmatprep.subr.bf16.mxu1 %v10680_v42  ;;  %v10716_v42 = vld [vmem:[#allocation8 + $0x1b8] sm:$0xff]  }
 0x3f2   :  { %7111 = vmatpush2.bf16.msra.mxu0 %v10675_v22  ;;  %v7188_v22 = vpack.c.bf16 %v11046_v31, %v11046_v31  ;;  %v10722_v31 = vld [vmem:[#allocation8 + $0x1e8] sm:$0xff]  }
 0x3f3   :  { %7152 = vmatpush2.bf16.msra.mxu1 %v10678_v58  ;;  %9110 = vmatprep.subr.bf16.mxu0 %v10681_v60  ;;  %v10717_v58 = vld [vmem:[#allocation8 + $0x170] sm:$0xff]   ;;  %v7191_v60 = vpack.c.bf16 %v11098_v5, %v11098_v5  ;;  %v10724_v5 = vld [vmem:[#allocation8 + $0x1a8] sm:$0xff]  }
 0x3f4   :  { %9132 = vmatprep.subr.bf16.mxu1 %v10682_v24  ;;  %v10718_v24 = vld [vmem:[#allocation8 + $0x1f0] sm:$0xff]  }
 0x3f5   :  { %v6868_v8 = vpop.f32.mrf.mxu0  ;;  %7113 = vmatmul.mubr.bf16.vlgmr.msra.gmra.mxu0 %v10971_v34  ;;  %v10690_v34 = vld [vmem:[#allocation8 + $0xe8] sm:$0xff]  }
 0x3f6   :  { %v6909_v56 = vpop.f32.mrf.mxu1  ;;  %7154 = vmatmul.mubr.bf16.vlgmr.msra.gmra.mxu1 %v10975_v35  ;;  %v6869_v57 = vadd.f32 %v6868_v8, %v11119_v55  ;;  %9111 = vmatpush3.bf16.msra.mxu0 %v10683_v25  ;;  %v10727_v8 = vld [vmem:[#allocation8 + $0x120] sm:$0xff]  }
 0x3f7   :  { %7868 = vmatprep.mubr.bf16.mxu0 %v7187_v23  ;;  %9133 = vmatpush3.bf16.msra.mxu1 %v10684_v43  ;;  %v6870_v38 = vpop.f32.mrf.mxu0  ;;  %v10719_v43 = vld [vmem:[#allocation8 + $0x130] sm:$0xff]   ;;  %v10721_v23 = vld [vmem:[#allocation8 + $0x168] sm:$0xff]  }
 0x3f8   :  { %7908 = vmatprep.mubr.bf16.mxu1 %v7189_v53  ;;  %v6911_v28 = vpop.f32.mrf.mxu1  ;;  %v11133_v7 = vadd.f32 %v6909_v56, %v6869_v57  ;;  %v6871_v41 = vadd.f32 %v6870_v38, %v11124_v59  ;;  %9112 = vmatprep.subr.bf16.mxu0 %v10685_v45  ;;  %v10723_v45 = vld [vmem:[#allocation8 + $0x128] sm:$0xff]   ;;  %v10726_v53 = vld [vmem:[#allocation8 + $0x1e0] sm:$0xff]   ;;  %v10729_v57 = vld [vmem:[#allocation8 + $0x158] sm:$0xff]  }
 0x3f9   :  { %9134 = vmatprep.subr.bf16.mxu1 %v10686_v49  ;;  %v6872_v14 = vpop.f32.mrf.mxu0  ;;  %v10725_v49 = vld [vmem:[#allocation8 + $0x160] sm:$0xff]   ;;  %v10731_v38 = vld [vmem:[#allocation8 + $0x118] sm:$0xff]  }
 0x3fa   :  { %v6913_v35 = vpop.f32.mrf.mxu1  ;;  %v7168_v55 = vmul.f32 %v11133_v7, %v11133_v7  ;;  %v11138_v11 = vadd.f32 %v6911_v28, %v6871_v41  ;;  %9113 = vmatpush3.bf16.msra.mxu0 %v10687_v2  ;;  %v10728_v56 = vld [vmem:[#allocation8 + $0x1a0] sm:$0xff]   ;;  %v10730_v2 = vld [vmem:[#allocation8 + $0x1d8] sm:$0xff]   ;;  %v10735_v41 = vld [vmem:[#allocation8 + $0x110] sm:$0xff]  }
 0x3fb   :  { %9135 = vmatpush3.bf16.msra.mxu1 %v10688_v61  ;;  %v6873_v63 = vpop.f32.mrf.mxu0  ;;  %9114 = vmatprep.subr.bf16.mxu0 %v10689_v6  ;;  %v10732_v28 = vld [vmem:[#allocation8 + $0x198] sm:$0xff]   ;;  %v10733_v61 = vld [vmem:[#allocation8 + $0x150] sm:$0xff]   ;;  %v10737_v14 = vld [vmem:[#allocation8 + $0x148] sm:$0xff]  }
 0x3fc   :  { %v6914_v1 = vpop.f32.mrf.mxu1  ;;  %v7177_v59 = vadd.f32 %v11103_v20, %v7168_v55  ;;  %v7169_v36 = vmul.f32 %v11138_v11, %v11138_v11  ;;  %9136 = vmatprep.subr.bf16.mxu1 %v10690_v34  ;;  %v10700_v20 = vld [vmem:[#allocation8 + $0x98] sm:$0xff]   ;;  %v7193_v25 = vpack.c.bf16 %v11138_v11, %v11138_v11  ;;  %v10734_v6 = vld [vmem:[#allocation8 + $0x1d0] sm:$0xff]   ;;  %v10738_v35 = vld [vmem:[#allocation8 + $0x1c8] sm:$0xff]  }
 0x3fd   :  { %v10736_v34 = vld [vmem:[#allocation8 + $0x190] sm:$0xff]   ;;  %v10739_v55 = vld [vmem:[#allocation8 + $0x108] sm:$0xff]   ;;  %v10742_v63 = vld [vmem:[#allocation8 + $0x1c0] sm:$0xff]  }
 0x3fe   :  { %9115 = vmatpush3.bf16.msra.mxu0 %v10691_v62  ;;  %v11143_v9 = vadd.f32 %v7177_v59, %v7169_v36  ;;  %v10740_v11 = vld [vmem:[#allocation8 + $0x188] sm:$0xff]   ;;  %v10741_v62 = vld [vmem:[#allocation8 + $0x140] sm:$0xff]   ;;  %v10745_v59 = vld [vmem:[#allocation8 + $0x278] sm:$0xff]  }
 0x3ff   :  { %9137 = vmatpush3.bf16.msra.mxu1 %v10692_v3  ;;  %9116 = vmatprep.subr.bf16.mxu0 %v10693_v10  ;;  %v10743_v1 = vld [vmem:[#allocation8 + $0x100] sm:$0xff]   ;;  %v1037_v10 = vld [vmem:[#allocation7 + $0x8] sm:$0x3] }
 0x400   :  { %9138 = vmatprep.subr.bf16.mxu1 %v10694_v37  ;;  %v10744_v3 = vld [vmem:[#allocation8 + $0x180] sm:$0xff]   ;;  %v1075_v36 = vrot.slane %v1037_v10, %v1042_v50  ;;  %v10746_v37 = vld [vmem:[#allocation8 + $0x238] sm:$0xff]   ;;  %v10748_v50 = vld [vmem:[#allocation8 + $0x230] sm:$0xff]  }
 0x402   :  { %9117 = vmatpush3.bf16.msra.mxu0 %v10695_v4  ;;  %v7190_v4 = vpack.c.bf16 %v11091_v0, %v11091_v0  ;;  %v10749_v0 = vld [vmem:[#allocation8 + $0x268] sm:$0xff]  }
 0x403   :  { %9139 = vmatpush3.bf16.msra.mxu1 %v10696_v12  ;;  %9118 = vmatprep.subr.bf16.mxu0 %v10697_v13  ;;  %v10747_v12 = vld [vmem:[#allocation8 + $0x270] sm:$0xff]   ;;  %v7192_v13 = vpack.c.bf16 %v11133_v7, %v11133_v7  ;;  %v10750_v7 = vld [vmem:[#allocation8 + $0x228] sm:$0xff]  }
 0x404   :  { %9140 = vmatprep.subr.bf16.mxu1 %v10698_v21  ;;  %v1079_v21 = vrot.slane %v1037_v10, %v1046_v54 }
 0x406   :  { %9119 = vmatpush3.bf16.msra.mxu0 %v10699_v15 }
 0x407   :  { %9141 = vmatpush3.bf16.msra.mxu1 %v10700_v20  ;;  %9120 = vmatprep.subr.bf16.mxu0 %v10701_v18 }
 0x408   :  { %9142 = vmatprep.subr.bf16.mxu1 %v10702_v47 }
 0x40a   :  { %9121 = vmatpush3.bf16.msra.mxu0 %v10703_v51 }
 0x40b   :  { %9143 = vmatpush3.bf16.msra.mxu1 %v10704_v26  ;;  %9122 = vmatprep.subr.bf16.mxu0 %v10705_v27 }
 0x40c   :  { %9144 = vmatprep.subr.bf16.mxu1 %v10706_v46 }
 0x40e   :  { %9123 = vmatpush3.bf16.msra.mxu0 %v10707_v30 }
 0x40f   :  { %9145 = vmatpush3.bf16.msra.mxu1 %v10708_v29  ;;  %9124 = vmatprep.subr.bf16.mxu0 %v10709_v32  ;;  %v10751_v32 = vld [vmem:[#allocation8 + $0x260] sm:$0xff]  }
 0x410   :  { %9146 = vmatprep.subr.bf16.mxu1 %v10710_v48  ;;  %v10752_v48 = vld [vmem:[#allocation8 + $0x220] sm:$0xff]  }
 0x412   :  { %9125 = vmatpush3.bf16.msra.mxu0 %v10711_v33  ;;  %v10753_v33 = vld [vmem:[#allocation8 + $0x258] sm:$0xff]  }
 0x413   :  { %9147 = vmatpush3.bf16.msra.mxu1 %v10712_v16  ;;  %9154 = vmatprep.subr.bf16.mxu0 %v10713_v17  ;;  %v10754_v16 = vld [vmem:[#allocation8 + $0x218] sm:$0xff]   ;;  %v10755_v17 = vld [vmem:[#allocation8 + $0x250] sm:$0xff]  }
 0x414   :  { %9176 = vmatprep.subr.bf16.mxu1 %v10714_v39  ;;  %v10756_v39 = vld [vmem:[#allocation8 + $0x210] sm:$0xff]  }
 0x415   :  { %7869 = vmatmul.mubr.bf16.vlgmr.msra.gmra.mxu0 %v7186_v40  ;;  %v10758_v40 = vld [vmem:[#allocation8 + $0x208] sm:$0xff]  }
 0x416   :  { %7909 = vmatmul.mubr.bf16.vlgmr.msra.gmra.mxu1 %v7188_v22  ;;  %9155 = vmatpush3.bf16.msra.mxu0 %v10715_v52  ;;  %v10757_v52 = vld [vmem:[#allocation8 + $0x248] sm:$0xff]   ;;  %v10760_v22 = vld [vmem:[#allocation8 + $0x200] sm:$0xff]  }
 0x417   :  { %7948 = vmatprep.mubr.bf16.mxu0 %v7191_v60  ;;  %9177 = vmatpush3.bf16.msra.mxu1 %v10716_v42  ;;  %v10759_v42 = vld [vmem:[#allocation8 + $0x240] sm:$0xff]  }
 0x418   :  { %7988 = vmatprep.mubr.bf16.mxu1 %v7193_v25  ;;  %9156 = vmatprep.subr.bf16.mxu0 %v10717_v58 }
 0x419   :  { %9178 = vmatprep.subr.bf16.mxu1 %v10718_v24 }
 0x41a   :  { %9157 = vmatpush3.bf16.msra.mxu0 %v10719_v43 }
 0x41b   :  { %9179 = vmatpush3.bf16.msra.mxu1 %v10720_v19  ;;  %9158 = vmatprep.subr.bf16.mxu0 %v10721_v23 }
 0x41c   :  { %9180 = vmatprep.subr.bf16.mxu1 %v10722_v31 }
 0x41e   :  { %9159 = vmatpush3.bf16.msra.mxu0 %v10723_v45 }
 0x41f   :  { %9181 = vmatpush3.bf16.msra.mxu1 %v10724_v5  ;;  %9160 = vmatprep.subr.bf16.mxu0 %v10725_v49 }
 0x420   :  { %9182 = vmatprep.subr.bf16.mxu1 %v10726_v53 }
 0x422   :  { %9161 = vmatpush3.bf16.msra.mxu0 %v10727_v8 }
 0x423   :  { %9183 = vmatpush3.bf16.msra.mxu1 %v10728_v56  ;;  %9162 = vmatprep.subr.bf16.mxu0 %v10729_v57 }
 0x424   :  { %9184 = vmatprep.subr.bf16.mxu1 %v10730_v2 }
 0x426   :  { %9163 = vmatpush3.bf16.msra.mxu0 %v10731_v38 }
 0x427   :  { %9185 = vmatpush3.bf16.msra.mxu1 %v10732_v28  ;;  %9164 = vmatprep.subr.bf16.mxu0 %v10733_v61 }
 0x428   :  { %9186 = vmatprep.subr.bf16.mxu1 %v10734_v6 }
 0x42a   :  { %9165 = vmatpush3.bf16.msra.mxu0 %v10735_v41 }
 0x42b   :  { %9187 = vmatpush3.bf16.msra.mxu1 %v10736_v34  ;;  %9166 = vmatprep.subr.bf16.mxu0 %v10737_v14 }
 0x42c   :  { %9188 = vmatprep.subr.bf16.mxu1 %v10738_v35 }
 0x42e   :  { %9167 = vmatpush3.bf16.msra.mxu0 %v10739_v55 }
 0x42f   :  { %9189 = vmatpush3.bf16.msra.mxu1 %v10740_v11  ;;  %9168 = vmatprep.subr.bf16.mxu0 %v10741_v62 }
 0x430   :  { %9190 = vmatprep.subr.bf16.mxu1 %v10742_v63 }
 0x432   :  { %9169 = vmatpush3.bf16.msra.mxu0 %v10743_v1 }
 0x433   :  { %9191 = vmatpush3.bf16.msra.mxu1 %v10744_v3  ;;  %9198 = vmatprep.subr.bf16.mxu0 %v10745_v59 }
 0x435   :  { %v6950_v15 = vpop.f32.mrf.mxu0  ;;  %7949 = vmatmul.mubr.bf16.vlgmr.msra.gmra.mxu0 %v7190_v4 }
 0x436   :  { %v6991_v20 = vpop.f32.mrf.mxu1  ;;  %v6951_v18 = vadd.f32 %v6950_v15, %v1075_v36  ;;  %7989 = vmatmul.mubr.bf16.vlgmr.msra.gmra.mxu1 %v7192_v13  ;;  %9199 = vmatpush3.bf16.msra.mxu0 %v10746_v37 }
 0x437   :  { %v6952_v47 = vpop.f32.mrf.mxu0  ;;  %9200 = vmatprep.subr.bf16.mxu0 %v10747_v12 }
 0x438   :  { %v6993_v51 = vpop.f32.mrf.mxu1  ;;  %v6992_v26 = vadd.f32 %v6991_v20, %v6951_v18  ;;  %v6953_v27 = vadd.f32 %v6952_v47, %v1079_v21 }
 0x439   :  { %v6954_v46 = vpop.f32.mrf.mxu0 }
 0x43a   :  { %v6995_v30 = vpop.f32.mrf.mxu1  ;;  %v6994_v29 = vadd.f32 %v6993_v51, %v6953_v27  ;;  %9201 = vmatpush3.bf16.msra.mxu0 %v10748_v50 }
 0x43b   :  { %v6955_v44 = vpop.f32.mrf.mxu0  ;;  %9202 = vmatprep.subr.bf16.mxu0 %v10749_v0 }
 0x43c   :  { %v6996_v54 = vpop.f32.mrf.mxu1 }
 0x43e   :  { %9203 = vmatpush3.bf16.msra.mxu0 %v10750_v7 }
 0x43f   :  { %9204 = vmatprep.subr.bf16.mxu0 %v10751_v32 }
 0x442   :  { %9205 = vmatpush3.bf16.msra.mxu0 %v10752_v48 }
 0x443   :  { %9206 = vmatprep.subr.bf16.mxu0 %v10753_v33 }
 0x446   :  { %9207 = vmatpush3.bf16.msra.mxu0 %v10754_v16 }
 0x447   :  { %9208 = vmatprep.subr.bf16.mxu0 %v10755_v17 }
 0x44a   :  { %9209 = vmatpush3.bf16.msra.mxu0 %v10756_v39 }
 0x44b   :  { %9210 = vmatprep.subr.bf16.mxu0 %v10757_v52 }
 0x44e   :  { %9211 = vmatpush3.bf16.msra.mxu0 %v10758_v40 }
 0x44f   :  { %9212 = vmatprep.subr.bf16.mxu0 %v10759_v42 }
 0x452   :  { %9213 = vmatpush3.bf16.msra.mxu0 %v10760_v22 }
 0x475   :  { %v7032_v58 = vpop.f32.mrf.mxu0 }
 0x476   :  { %v7073_v60 = vpop.f32.mrf.mxu1  ;;  %v7033_v45 = vadd.f32 %v7032_v58, %v6992_v26 }
 0x477   :  { %v7034_v24 = vpop.f32.mrf.mxu0 }
 0x478   :  { %v7075_v25 = vpop.f32.mrf.mxu1  ;;  %v7035_v5 = vadd.f32 %v7034_v24, %v6994_v29  ;;  %v7074_v49 = vadd.f32 %v7073_v60, %v7033_v45 }
 0x479   :  { %v7036_v43 = vpop.f32.mrf.mxu0 }
 0x47a   :  { %v7077_v19 = vpop.f32.mrf.mxu1  ;;  %v7076_v56 = vadd.f32 %v7075_v25, %v7035_v5 }
 0x47b   :  { %v7037_v23 = vpop.f32.mrf.mxu0 }
 0x47c   :  { %v7078_v31 = vpop.f32.mrf.mxu1 }
 0x4b5   :  { %v7114_v53 = vpop.f32.mrf.mxu0 }
 0x4b6   :  { %v7155_v8 = vpop.f32.mrf.mxu1  ;;  %v7115_v57 = vadd.f32 %v7114_v53, %v7074_v49 }
 0x4b7   :  { %v7116_v2 = vpop.f32.mrf.mxu0 }
 0x4b8   :  { %v7157_v38 = vpop.f32.mrf.mxu1  ;;  %v7156_v28 = vadd.f32 %v7155_v8, %v7115_v57  ;;  %v7117_v61 = vadd.f32 %v7116_v2, %v7076_v56 }
 0x4b9   :  { %v7118_v6 = vpop.f32.mrf.mxu0 }
 0x4ba   :  { %v7159_v41 = vpop.f32.mrf.mxu1  ;;  %v7170_v34 = vmul.f32 %v7156_v28, %v7156_v28  ;;  %v7158_v14 = vadd.f32 %v7157_v38, %v7117_v61  ;;  %v7194_v1 = vpack.c.bf16 %v7156_v28, %v7156_v28 }
 0x4bb   :  { %v7119_v35 = vpop.f32.mrf.mxu0 }
 0x4bc   :  { %v7160_v55 = vpop.f32.mrf.mxu1  ;;  %v7195_v11 = vpack.c.bf16 %v7158_v14, %v7158_v14  ;;  %v7171_v62 = vmul.f32 %v7158_v14, %v7158_v14  ;;  %v7179_v63 = vadd.f32 %v11143_v9, %v7170_v34 }
 0x4be   :  { %8028 = vmatprep.mubr.bf16.mxu0 %v7195_v11  ;;  %v7180_v3 = vadd.f32 %v7179_v63, %v7171_v62 }
 0x4bf   :  { %8029 = vmatmul.mubr.bf16.vlgmr.msra.gmra.mxu0 %v7194_v1 }
 0x4c0   :  { %7181 = vadd.xlane.f32.xlu0 %v7180_v3 }
 0x4d5   :  { %v9126_v10 = vpop.f32.mrf.mxu0 }
 0x4d6   :  { %v9148_v59 = vpop.f32.mrf.mxu1 }
 0x4d7   :  { %v9127_v36 = vpop.f32.mrf.mxu0 }
 0x4d8   :  { %v9128_v37 = vadd.f32 %v9127_v36, %v9126_v10  ;;  %v9149_v4 = vpop.f32.mrf.mxu1 }
 0x4d9   :  { %v9150_v12 = vadd.f32 %v9149_v4, %v9148_v59  ;;  %v9129_v13 = vpop.f32.mrf.mxu0 }
 0x4da   :  { %v9151_v21 = vpop.f32.mrf.mxu1 }
 0x4db   :  { %v7911_v15 = vadd.f32 %v9150_v12, %v9128_v37  ;;  %v9130_v20 = vpop.f32.mrf.mxu0 }
 0x4dc   :  { %v9152_v18 = vpop.f32.mrf.mxu1 }
 0x4f5   :  { %v9170_v50 = vpop.f32.mrf.mxu0 }
 0x4f6   :  { %v9192_v47 = vpop.f32.mrf.mxu1 }
 0x4f7   :  { %v9171_v51 = vpop.f32.mrf.mxu0 }
 0x4f8   :  { %v9172_v9 = vadd.f32 %v9171_v51, %v9170_v50  ;;  %v9193_v0 = vpop.f32.mrf.mxu1 }
 0x4f9   :  { %v9194_v26 = vadd.f32 %v9193_v0, %v9192_v47  ;;  %v9173_v27 = vpop.f32.mrf.mxu0 }
 0x4fa   :  { %v7951_v46 = vadd.f32 %v9172_v9, %v7911_v15  ;;  %v9195_v30 = vpop.f32.mrf.mxu1 }
 0x4fb   :  { %v9174_v29 = vpop.f32.mrf.mxu0 }
 0x4fc   :  { %v7991_v7 = vadd.f32 %v9194_v26, %v7951_v46  ;;  %v9196_v44 = vpop.f32.mrf.mxu1 }
 0x549   :  { %v7182_v54 = vpop.xlane.xlu0 %7181 }
 0x54a   :  { %v7183_v32 = vmax.f32 %v7182_v54, 1e-24 }
 0x54c   :  { %10761 = vrsqrt.f32 %v7183_v32 }
 0x559   :  { %v10762_v33 = vpop.eup %10761 }
 0x55a   :  { %v7185_v52 = vmul.f32 32.0, %v10762_v33 }
 0x57f   :  { %v9214_v48 = vpop.f32.mrf.mxu0 }
 0x581   :  { %v9215_v16 = vpop.f32.mrf.mxu0 }
 0x582   :  { %v9216_v17 = vadd.f32 %v9215_v16, %v9214_v48 }
 0x583   :  { %v9217_v39 = vpop.f32.mrf.mxu0 }
 0x584   :  { %v8031_v40 = vadd.f32 %v9216_v17, %v7991_v7 }
 0x585   :  { %v9218_v42 = vpop.f32.mrf.mxu0 }
 0x586   :  { %v8036_v22 = vmul.f32 %v8031_v40, %v7185_v52 }
 0x588   :  { %v9109_v58 = vclamps-f32 %v8036_v22, 31.999996 }
 0x58a   :  { %8039 = vst [vmem:[#allocation10] sm:$0xff] %v9109_v58 }
 0x58b   :  { %10856 = shalt.err (!%p10853_p10)
}
 0x58c   :  { %8049 = dma.vmem_to_hbm [thread:$0]  %s8047_s3, 128, %s11169_s4, [#allocation4]  }
 0x58d   :  { %10871 = dma.done.wait [#allocation4], 128  }
 0x58e   :  { %10872 = vsyncadd [#allocation4], 4294967168 }
 0x58f   :  { %8053 = vsyncpa [#allocation3], 1 }
 0x590   :  { %8054 = vsyncpa [#allocation6], 1 }
 0x591   :  { %8055 = vsyncpa [#allocation9], 1 }
 0x592   :  { %8056 = vsyncpa [#allocation4], 1 }

</bundles_post_ra>
